<compile_context>
chip_gen: v7x
topology: tpu7x:2x2x1
jax: 0.10.0
libtpu: 0.0.40
codegen_flags: <defaults>
</compile_context>

<pallas_src>
import jax
import jax.numpy as jnp
from jax import lax
from jax.experimental import pallas as pl
from jax.experimental.pallas import tpu as pltpu

EPS = 1e-5          # PyTorch LayerNorm / SwitchNorm1d default eps
_LANE = 128

_MM_CP = pltpu.CompilerParams(
    dimension_semantics=("parallel",),          # v7x: both TensorCores split the weight stream
    vmem_limit_bytes=48 * 1024 * 1024,          # explicit scoped-VMEM budget with headroom
)
_SMALL_CP = pltpu.CompilerParams(dimension_semantics=("arbitrary",))


def _round_up(n, m):
    return (n + m - 1) // m * m


def _col_tile(n):
    """Lane-dense output-column tile; 256 fills the v6e/v7x MXU N dimension."""
    if n % 256 == 0:
        return 256
    if n % _LANE == 0:
        return _LANE
    return n


def _erf_approx(u):
    # Abramowitz & Stegun 7.1.26 (max abs err ~1.5e-7); only exp / mul / add / where.
    a1, a2, a3, a4, a5 = 0.254829592, -0.284496736, 1.421413741, -1.453152027, 1.061405429
    p = 0.3275911
    au = jnp.abs(u)
    t = 1.0 / (1.0 + p * au)
    poly = ((((a5 * t + a4) * t + a3) * t + a2) * t + a1) * t
    e = 1.0 - poly * jnp.exp(-au * au)
    return jnp.where(u < 0.0, -e, e)


def _gelu_exact(x):
    # nn.GELU() default = exact erf formulation.
    return 0.5 * x * (1.0 + _erf_approx(x * 0.7071067811865476))


# ---------------------------------------------------------------------------
# LayerNorm (PyTorch semantics: biased variance over the last dim)
# ---------------------------------------------------------------------------
def _layernorm_kernel(x_ref, g_ref, b_ref, o_ref):
    x = x_ref[...]
    mu = jnp.mean(x, axis=-1, keepdims=True)
    xc = x - mu
    var = jnp.mean(xc * xc, axis=-1, keepdims=True)
    o_ref[...] = xc * lax.rsqrt(var + EPS) * g_ref[...] + b_ref[...]


def _layernorm(x, g, b):
    B, D = x.shape
    return pl.pallas_call(
        _layernorm_kernel,
        out_shape=jax.ShapeDtypeStruct((B, D), jnp.float32),
        grid_spec=pltpu.PrefetchScalarGridSpec(
            num_scalar_prefetch=0,
            grid=(1,),
            in_specs=[
                pl.BlockSpec((B, D), lambda i: (0, 0)),
                pl.BlockSpec((1, D), lambda i: (0, 0)),
                pl.BlockSpec((1, D), lambda i: (0, 0)),
            ],
            out_specs=pl.BlockSpec((B, D), lambda i: (0, 0)),
        ),
        compiler_params=_SMALL_CP,
    )(x, g, b)


# ---------------------------------------------------------------------------
# SwitchNorm1d (training-mode statistics, unbiased variances as torch.var)
# ---------------------------------------------------------------------------
def _switchnorm_kernel(c_ref, w_ref, b_ref, mix_ref, o_ref):
    c = c_ref[...]
    B, C = c.shape
    m_ln = jnp.mean(c, axis=1, keepdims=True)
    v_ln = jnp.sum(jnp.square(c - m_ln), axis=1, keepdims=True) / float(C - 1)
    m_bn = jnp.mean(c, axis=0, keepdims=True)
    v_bn = jnp.sum(jnp.square(c - m_bn), axis=0, keepdims=True) / float(B - 1)
    # mix = [softmax(mean_weight), softmax(var_weight)]  (precomputed, SMEM scalars)
    mean = mix_ref[0] * m_ln + mix_ref[1] * m_bn
    var = mix_ref[2] * v_ln + mix_ref[3] * v_bn
    o_ref[...] = (c - mean) * lax.rsqrt(var + EPS) * w_ref[...] + b_ref[...]


def _switchnorm(c, w, b, mix):
    B, C = c.shape
    return pl.pallas_call(
        _switchnorm_kernel,
        out_shape=jax.ShapeDtypeStruct((B, C), jnp.float32),
        grid_spec=pltpu.PrefetchScalarGridSpec(
            num_scalar_prefetch=0,
            grid=(1,),
            in_specs=[
                pl.BlockSpec((B, C), lambda i: (0, 0)),
                pl.BlockSpec((1, C), lambda i: (0, 0)),
                pl.BlockSpec((1, C), lambda i: (0, 0)),
                pl.BlockSpec(memory_space=pltpu.MemorySpace.SMEM),
            ],
            out_specs=pl.BlockSpec((B, C), lambda i: (0, 0)),
        ),
        compiler_params=_SMALL_CP,
    )(c, w, b, mix)


# ---------------------------------------------------------------------------
# Fused q / k / v projection: one bf16 weight stream over output columns.
#   qkv = x1 @ W_x + c1 @ W_c   with  W_x:(D, D+2*Dcp)  W_c:(C, D+2*Dcp)
# ---------------------------------------------------------------------------
def _qkv_kernel(x1_ref, c1_ref, wx_ref, wc_ref, o_ref):
    acc = jnp.dot(x1_ref[...].astype(jnp.bfloat16), wx_ref[...],
                  preferred_element_type=jnp.float32)
    acc += jnp.dot(c1_ref[...].astype(jnp.bfloat16), wc_ref[...],
                   preferred_element_type=jnp.float32)
    o_ref[...] = acc


def _qkv(x1, c1, w_x, w_c):
    B, D = x1.shape
    C = c1.shape[1]
    N = w_x.shape[1]
    tn = _col_tile(N)
    assert N % tn == 0
    return pl.pallas_call(
        _qkv_kernel,
        out_shape=jax.ShapeDtypeStruct((B, N), jnp.float32),
        grid_spec=pltpu.PrefetchScalarGridSpec(
            num_scalar_prefetch=0,
            grid=(N // tn,),
            in_specs=[
                pl.BlockSpec((B, D), lambda j: (0, 0)),    # activations resident across tiles
                pl.BlockSpec((B, C), lambda j: (0, 0)),
                pl.BlockSpec((D, tn), lambda j: (0, j)),   # bf16 weight stream
                pl.BlockSpec((C, tn), lambda j: (0, j)),
            ],
            out_specs=pl.BlockSpec((B, tn), lambda j: (0, j)),
        ),
        compiler_params=_MM_CP,
    )(x1, c1, w_x, w_c)


# ---------------------------------------------------------------------------
# Rank-1 cross attention core:  out[b,i] = sum_j softmax_j(q[b,i]*k[b,j]) v[b,j] + x1[b,i]
# Shapes are pre-plumbed in the wrapper so no rank-changing reshape happens in-kernel:
#   q, x1: (B, D, 1)   k, v: (B, 1, Dcp)   (Dcp = D+C padded to a lane multiple, masked)
# ---------------------------------------------------------------------------
def _attn_core(q3, k3, v3, x1_3, dc):
    B, D, _ = q3.shape
    dcp = k3.shape[-1]
    tm = 128 if D % 128 == 0 else D

    def kernel(q_ref, k_ref, v_ref, x1_ref, o_ref):
        s = q_ref[...] * k_ref[...]                         # (B, tm, dcp); attn scale == 1
        col = lax.broadcasted_iota(jnp.int32, s.shape, 2)
        m = jnp.max(s, axis=-1, keepdims=True)              # padded scores are exactly 0 -> valid bound
        p = jnp.where(col < dc, jnp.exp(s - m), 0.0)
        denom = jnp.sum(p, axis=-1, keepdims=True)
        num = jnp.sum(p * v_ref[...], axis=-1, keepdims=True)
        o_ref[...] = num * pl.reciprocal(denom, approx=True) + x1_ref[...]

    return pl.pallas_call(
        kernel,
        out_shape=jax.ShapeDtypeStruct((B, D, 1), jnp.float32),
        grid_spec=pltpu.PrefetchScalarGridSpec(
            num_scalar_prefetch=0,
            grid=(D // tm,),
            in_specs=[
                pl.BlockSpec((B, tm, 1), lambda i: (0, i, 0)),
                pl.BlockSpec((B, 1, dcp), lambda i: (0, 0, 0)),
                pl.BlockSpec((B, 1, dcp), lambda i: (0, 0, 0)),
                pl.BlockSpec((B, tm, 1), lambda i: (0, i, 0)),
            ],
            out_specs=pl.BlockSpec((B, tm, 1), lambda i: (0, i, 0)),
        ),
        compiler_params=_MM_CP,
    )(q3, k3, v3, x1_3)


# ---------------------------------------------------------------------------
# Generic weight-streaming Linear: y = act(x @ W + b) [+ residual]
# ---------------------------------------------------------------------------
def _linear(x_full, w_t, bias, *, residual=None, gelu=False):
    B, K = x_full.shape
    N = w_t.shape[1]
    tn = _col_tile(N)
    assert N % tn == 0
    has_res = residual is not None

    def kernel(*refs):
        if has_res:
            x_ref, w_ref, b_ref, r_ref, o_ref = refs
        else:
            x_ref, w_ref, b_ref, o_ref = refs
        y = jnp.dot(x_ref[...].astype(jnp.bfloat16), w_ref[...],
                    preferred_element_type=jnp.float32) + b_ref[...]
        if gelu:
            y = _gelu_exact(y)
        if has_res:
            y = y + r_ref[...]
        o_ref[...] = y

    in_specs = [
        pl.BlockSpec((B, K), lambda j: (0, 0)),     # activations resident across weight tiles
        pl.BlockSpec((K, tn), lambda j: (0, j)),    # bf16 weight stream
        pl.BlockSpec((1, tn), lambda j: (0, j)),
    ]
    args = [x_full, w_t, bias]
    if has_res:
        in_specs.append(pl.BlockSpec((B, tn), lambda j: (0, j)))
        args.append(residual)

    return pl.pallas_call(
        kernel,
        out_shape=jax.ShapeDtypeStruct((B, N), jnp.float32),
        grid_spec=pltpu.PrefetchScalarGridSpec(
            num_scalar_prefetch=0,
            grid=(N // tn,),
            in_specs=in_specs,
            out_specs=pl.BlockSpec((B, tn), lambda j: (0, j)),
        ),
        compiler_params=_MM_CP,
    )(*args)


# ---------------------------------------------------------------------------
# Parameters (PyTorch layout) and kernel-layout preparation
# ---------------------------------------------------------------------------
def make_params(key, d_model, d_comp):
    """Synthetic parameters in PyTorch layout ((out, in) Linear weights)."""
    dc = d_model + d_comp
    ks = jax.random.split(key, 16)
    f32 = jnp.float32

    def lin_w(k, out_f, in_f):
        return (jax.random.normal(k, (out_f, in_f)) / jnp.sqrt(in_f)).astype(f32)

    return dict(
        ln1_g=(1.0 + 0.02 * jax.random.normal(ks[0], (d_model,))).astype(f32),
        ln1_b=(0.02 * jax.random.normal(ks[1], (d_model,))).astype(f32),
        ln2_g=(1.0 + 0.02 * jax.random.normal(ks[2], (d_model,))).astype(f32),
        ln2_b=(0.02 * jax.random.normal(ks[3], (d_model,))).astype(f32),
        sn_w=(1.0 + 0.02 * jax.random.normal(ks[4], (d_comp,))).astype(f32),
        sn_b=(0.02 * jax.random.normal(ks[5], (d_comp,))).astype(f32),
        sn_mean_w=jnp.ones((2,), f32),      # module init; softmax -> [0.5, 0.5]
        sn_var_w=jnp.ones((2,), f32),
        q_w=lin_w(ks[6], d_model, d_model),             # to_q   (bias=False)
        kv_w=lin_w(ks[7], 2 * dc, dc),                  # to_kv  (bias=False, interleaved k/v rows)
        proj_w=lin_w(ks[8], d_model, d_model),
        proj_b=(0.01 * jax.random.normal(ks[9], (d_model,))).astype(f32),
        fc1_w=lin_w(ks[10], d_model, d_model),          # mlp_ratio=1.0 -> hidden == d_model
        fc1_b=(0.01 * jax.random.normal(ks[11], (d_model,))).astype(f32),
        fc2_w=lin_w(ks[12], d_model, d_model),
        fc2_b=(0.01 * jax.random.normal(ks[13], (d_model,))).astype(f32),
    )


def prepare_params(p, d_model, d_comp):
    """Torch layout -> kernel layout: transpose to (in, out), de-interleave the kv
    weight, zero-pad k/v output columns to a lane multiple, fuse q/k/v into one
    weight-streaming matrix, and store all big weights in bfloat16."""
    f32, bf16 = jnp.float32, jnp.bfloat16
    dc = d_model + d_comp
    dcp = _round_up(dc, _LANE)

    wk_t = p["kv_w"][0::2, :].T          # (dc_in, dc_out): k_j comes from row 2j of kv_w
    wv_t = p["kv_w"][1::2, :].T

    def pad_cols(w):
        return jnp.pad(w, ((0, 0), (0, dcp - w.shape[1])))

    # rows [0:d_model] multiply x1, rows [d_model:] multiply c1
    w_qkv_x = jnp.concatenate(
        [p["q_w"].T, pad_cols(wk_t[:d_model]), pad_cols(wv_t[:d_model])], axis=1)
    w_qkv_c = jnp.concatenate(
        [jnp.zeros((d_comp, d_model), f32), pad_cols(wk_t[d_model:]), pad_cols(wv_t[d_model:])],
        axis=1)

    return dict(
        ln1_g=p["ln1_g"].reshape(1, -1), ln1_b=p["ln1_b"].reshape(1, -1),
        ln2_g=p["ln2_g"].reshape(1, -1), ln2_b=p["ln2_b"].reshape(1, -1),
        sn_w=p["sn_w"].reshape(1, -1), sn_b=p["sn_b"].reshape(1, -1),
        sn_mix=jnp.concatenate(
            [jax.nn.softmax(p["sn_mean_w"]), jax.nn.softmax(p["sn_var_w"])]).astype(f32),
        w_qkv_x=w_qkv_x.astype(bf16),
        w_qkv_c=w_qkv_c.astype(bf16),
        w_proj=p["proj_w"].T.astype(bf16), b_proj=p["proj_b"].reshape(1, -1),
        w_fc1=p["fc1_w"].T.astype(bf16), b_fc1=p["fc1_b"].reshape(1, -1),
        w_fc2=p["fc2_w"].T.astype(bf16), b_fc2=p["fc2_b"].reshape(1, -1),
    )


# ---------------------------------------------------------------------------
# Full layer forward (Pallas)
# ---------------------------------------------------------------------------
def cross_transformer_forward(x, complement, kp):
    # TODO(synk): all Dropout layers run as identity (inference); no in-kernel RNG dropout.
    B, D = x.shape
    C = complement.shape[1]
    assert D % _LANE == 0
    dc = D + C
    dcp = _round_up(dc, _LANE)

    # input norms: computed once, outside the weight-streaming loops
    x1 = _layernorm(x, kp["ln1_g"], kp["ln1_b"])
    c1 = _switchnorm(complement, kp["sn_w"], kp["sn_b"], kp["sn_mix"])

    # fused q / k / v projection (single bf16 weight stream)
    qkv = _qkv(x1, c1, kp["w_qkv_x"], kp["w_qkv_c"])
    q3 = qkv[:, :D].reshape(B, D, 1)
    k3 = qkv[:, D:D + dcp].reshape(B, 1, dcp)
    v3 = qkv[:, D + dcp:].reshape(B, 1, dcp)

    # rank-1 cross attention (masked softmax over the padded k axis) + in-attn residual
    a_res = _attn_core(q3, k3, v3, x1.reshape(B, D, 1), dc).reshape(B, D)

    # output projection + encoder residual
    x2 = _linear(a_res, kp["w_proj"], kp["b_proj"], residual=x1)

    # MLP block: LN -> fc1 + GELU -> fc2 + residual
    x2n = _layernorm(x2, kp["ln2_g"], kp["ln2_b"])
    h = _linear(x2n, kp["w_fc1"], kp["b_fc1"], gelu=True)
    return _linear(h, kp["w_fc2"], kp["b_fc2"], residual=x2)


# ---------------------------------------------------------------------------
# Pure-JAX reference (mirrors the PyTorch module; weights rounded to bf16 and
# bf16 MXU matmuls with f32 accumulation, exactly like the kernel path)
# ---------------------------------------------------------------------------
def reference(x, complement, p):
    B, D = x.shape
    C = complement.shape[1]
    bf16, f32 = jnp.bfloat16, jnp.float32

    def mm(a, w_torch):          # a @ w_torch.T
        return jnp.dot(a.astype(bf16), w_torch.T.astype(bf16), preferred_element_type=f32)

    def ln(v, g, b):
        mu = v.mean(-1, keepdims=True)
        var = jnp.square(v - mu).mean(-1, keepdims=True)
        return (v - mu) / jnp.sqrt(var + EPS) * g + b

    x1 = ln(x, p["ln1_g"], p["ln1_b"])

    c = complement
    m_ln = c.mean(1, keepdims=True)
    v_ln = jnp.square(c - m_ln).sum(1, keepdims=True) / (C - 1)
    m_bn = c.mean(0, keepdims=True)
    v_bn = jnp.square(c - m_bn).sum(0, keepdims=True) / (B - 1)
    mw = jax.nn.softmax(p["sn_mean_w"])
    vw = jax.nn.softmax(p["sn_var_w"])
    c1 = (c - (mw[0] * m_ln + mw[1] * m_bn)) / jnp.sqrt(
        vw[0] * v_ln + vw[1] * v_bn + EPS) * p["sn_w"] + p["sn_b"]

    cat = jnp.concatenate([x1, c1], axis=1)
    q = mm(x1, p["q_w"])
    kv = mm(cat, p["kv_w"])
    k, v = kv[:, 0::2], kv[:, 1::2]
    s = q[:, :, None] * k[:, None, :]           # attention scale = 1 ** -0.5 == 1
    attn = jax.nn.softmax(s, axis=-1)
    a = jnp.einsum("bij,bj->bi", attn, v) + x1
    x2 = x1 + (mm(a, p["proj_w"]) + p["proj_b"])

    x2n = ln(x2, p["ln2_g"], p["ln2_b"])
    h = jax.nn.gelu(mm(x2n, p["fc1_w"]) + p["fc1_b"], approximate=False)
    return x2 + mm(h, p["fc2_w"]) + p["fc2_b"]


if __name__ == "__main__":
    # The module hard-wires (d_model=2048, d_comp=8); same structure at reduced width.
    B, D, C = 2, 256, 8

    key = jax.random.PRNGKey(0)
    kx, kc, kw = jax.random.split(key, 3)
    x = jax.random.normal(kx, (B, D), jnp.float32)
    complement = jax.random.normal(kc, (B, C), jnp.float32)

    params = make_params(kw, D, C)
    kparams = prepare_params(params, D, C)

    fwd = jax.jit(cross_transformer_forward)
    out = jax.block_until_ready(fwd(x, complement, kparams))

    expected = reference(x, complement, params)
    assert out.shape == (B, D)
    max_err = float(jnp.max(jnp.abs(out - expected)))
    assert jnp.allclose(out, expected, atol=2e-3, rtol=2e-3), max_err
    print("KERNEL_OK")
</pallas_src>

<mosaic_0001>
module attributes {stable_mosaic.version = 11 : i64} {
  func.func @_layernorm_kernel(%arg0: i32, %arg1: memref<2x256xf32, #tpu.memory_space<vmem>>, %arg2: memref<1x256xf32, #tpu.memory_space<vmem>>, %arg3: memref<1x256xf32, #tpu.memory_space<vmem>>, %arg4: memref<2x256xf32, #tpu.memory_space<vmem>>) attributes {dimension_semantics = [#tpu.dimension_semantics<arbitrary>], iteration_bounds = array<i64: 1>, scalar_prefetch = 0 : i64, scratch_operands = 0 : i64, tpu.core_type = #tpu.core_type<tc>, window_params = [{pipeline_mode = #tpu.pipeline_mode<synchronous>, transform_indices = @transform_0, window_bounds = array<i64: 2, 256>}, {pipeline_mode = #tpu.pipeline_mode<synchronous>, transform_indices = @transform_1, window_bounds = array<i64: 1, 256>}, {pipeline_mode = #tpu.pipeline_mode<synchronous>, transform_indices = @transform_2, window_bounds = array<i64: 1, 256>}, {pipeline_mode = #tpu.pipeline_mode<synchronous>, transform_indices = @transform_3, window_bounds = array<i64: 2, 256>}]} {
    %c0 = arith.constant 0 : index
    %c0_0 = arith.constant 0 : index
    %0 = vector.load %arg1[%c0, %c0_0] : memref<2x256xf32, #tpu.memory_space<vmem>>, vector<2x256xf32>
    %cst = arith.constant dense<0.000000e+00> : vector<2xf32>
    %1 = vector.multi_reduction <add>, %0, %cst [1] : vector<2x256xf32> to vector<2xf32>
    %2 = vector.shape_cast %1 : vector<2xf32> to vector<2x1xf32>
    %cst_1 = arith.constant 2.560000e+02 : f32
    %3 = vector.broadcast %cst_1 : f32 to vector<2x1xf32>
    %4 = arith.divf %2, %3 : vector<2x1xf32>
    %5 = vector.broadcast %4 : vector<2x1xf32> to vector<2x256xf32>
    %6 = arith.subf %0, %5 : vector<2x256xf32>
    %7 = arith.mulf %6, %6 : vector<2x256xf32>
    %cst_2 = arith.constant dense<0.000000e+00> : vector<2xf32>
    %8 = vector.multi_reduction <add>, %7, %cst_2 [1] : vector<2x256xf32> to vector<2xf32>
    %9 = vector.shape_cast %8 : vector<2xf32> to vector<2x1xf32>
    %cst_3 = arith.constant 2.560000e+02 : f32
    %10 = vector.broadcast %cst_3 : f32 to vector<2x1xf32>
    %11 = arith.divf %9, %10 : vector<2x1xf32>
    %cst_4 = arith.constant 9.99999974E-6 : f32
    %12 = vector.broadcast %cst_4 : f32 to vector<2x1xf32>
    %13 = arith.addf %11, %12 : vector<2x1xf32>
    %14 = math.rsqrt %13 : vector<2x1xf32>
    %15 = vector.broadcast %14 : vector<2x1xf32> to vector<2x256xf32>
    %16 = arith.mulf %6, %15 : vector<2x256xf32>
    %c0_5 = arith.constant 0 : index
    %c0_6 = arith.constant 0 : index
    %17 = vector.load %arg2[%c0_5, %c0_6] : memref<1x256xf32, #tpu.memory_space<vmem>>, vector<1x256xf32>
    %18 = vector.broadcast %17 : vector<1x256xf32> to vector<2x256xf32>
    %19 = arith.mulf %16, %18 : vector<2x256xf32>
    %c0_7 = arith.constant 0 : index
    %c0_8 = arith.constant 0 : index
    %20 = vector.load %arg3[%c0_7, %c0_8] : memref<1x256xf32, #tpu.memory_space<vmem>>, vector<1x256xf32>
    %21 = vector.broadcast %20 : vector<1x256xf32> to vector<2x256xf32>
    %22 = arith.addf %19, %21 : vector<2x256xf32>
    %c0_9 = arith.constant 0 : index
    %c0_10 = arith.constant 0 : index
    %23 = vector.load %arg4[%c0_9, %c0_10] : memref<2x256xf32, #tpu.memory_space<vmem>>, vector<2x256xf32>
    tpu.vector_store %arg4[%c0_9, %c0_10], %22 {strides = array<i32>} : memref<2x256xf32, #tpu.memory_space<vmem>>, vector<2x256xf32>,
    return
  }
  func.func @transform_0(%arg0: i32) -> (i32, i32) {
    %c0_i32 = arith.constant 0 : i32
    %c0_i32_0 = arith.constant 0 : i32
    %c0_i32_1 = arith.constant 0 : i32
    return %c0_i32, %c0_i32_0 : i32, i32
  }
  func.func @transform_1(%arg0: i32) -> (i32, i32) {
    %c0_i32 = arith.constant 0 : i32
    %c0_i32_0 = arith.constant 0 : i32
    %c0_i32_1 = arith.constant 0 : i32
    return %c0_i32, %c0_i32_0 : i32, i32
  }
  func.func @transform_2(%arg0: i32) -> (i32, i32) {
    %c0_i32 = arith.constant 0 : i32
    %c0_i32_0 = arith.constant 0 : i32
    %c0_i32_1 = arith.constant 0 : i32
    return %c0_i32, %c0_i32_0 : i32, i32
  }
  func.func @transform_3(%arg0: i32) -> (i32, i32) {
    %c0_i32 = arith.constant 0 : i32
    %c0_i32_0 = arith.constant 0 : i32
    %c0_i32_1 = arith.constant 0 : i32
    return %c0_i32, %c0_i32_0 : i32, i32
  }
}

module attributes {stable_mosaic.version = 11 : i64} {
  func.func @_qkv_kernel(%arg0: i32, %arg1: memref<2x256xf32, #tpu.memory_space<vmem>>, %arg2: memref<2x8xf32, #tpu.memory_space<vmem>>, %arg3: memref<256x256xbf16, #tpu.memory_space<vmem>>, %arg4: memref<8x256xbf16, #tpu.memory_space<vmem>>, %arg5: memref<2x256xf32, #tpu.memory_space<vmem>>) attributes {dimension_semantics = [#tpu.dimension_semantics<parallel>], iteration_bounds = array<i64: 4>, scalar_prefetch = 0 : i64, scratch_operands = 0 : i64, tpu.core_type = #tpu.core_type<tc>, window_params = [{pipeline_mode = #tpu.pipeline_mode<synchronous>, transform_indices = @transform_0, window_bounds = array<i64: 2, 256>}, {pipeline_mode = #tpu.pipeline_mode<synchronous>, transform_indices = @transform_1, window_bounds = array<i64: 2, 8>}, {transform_indices = @transform_2, window_bounds = array<i64: 256, 256>}, {transform_indices = @transform_3, window_bounds = array<i64: 8, 256>}, {transform_indices = @transform_4, window_bounds = array<i64: 2, 256>}]} {
    %c0 = arith.constant 0 : index
    %c0_0 = arith.constant 0 : index
    %0 = vector.load %arg1[%c0, %c0_0] : memref<2x256xf32, #tpu.memory_space<vmem>>, vector<2x256xf32>
    %1 = arith.truncf %0 : vector<2x256xf32> to vector<2x256xbf16>
    %c0_1 = arith.constant 0 : index
    %c0_2 = arith.constant 0 : index
    %2 = vector.load %arg3[%c0_1, %c0_2] : memref<256x256xbf16, #tpu.memory_space<vmem>>, vector<256x256xbf16>
    %cst = arith.constant dense<0.000000e+00> : vector<2x256xf32>
    %3 = tpu.matmul %1, %2, %cst {dimension_numbers = #tpu.dot_dimension_numbers<[1], [0], [0], [1], [0, 0, 1, 1], [], []>} : vector<2x256xbf16>, vector<256x256xbf16>, vector<2x256xf32> -> vector<2x256xf32>
    %c0_3 = arith.constant 0 : index
    %c0_4 = arith.constant 0 : index
    %4 = vector.load %arg2[%c0_3, %c0_4] : memref<2x8xf32, #tpu.memory_space<vmem>>, vector<2x8xf32>
    %5 = arith.truncf %4 : vector<2x8xf32> to vector<2x8xbf16>
    %c0_5 = arith.constant 0 : index
    %c0_6 = arith.constant 0 : index
    %6 = vector.load %arg4[%c0_5, %c0_6] : memref<8x256xbf16, #tpu.memory_space<vmem>>, vector<8x256xbf16>
    %cst_7 = arith.constant dense<0.000000e+00> : vector<2x256xf32>
    %7 = tpu.matmul %5, %6, %cst_7 {dimension_numbers = #tpu.dot_dimension_numbers<[1], [0], [0], [1], [0, 0, 1, 1], [], []>} : vector<2x8xbf16>, vector<8x256xbf16>, vector<2x256xf32> -> vector<2x256xf32>
    %8 = arith.addf %3, %7 : vector<2x256xf32>
    %c0_8 = arith.constant 0 : index
    %c0_9 = arith.constant 0 : index
    %9 = vector.load %arg5[%c0_8, %c0_9] : memref<2x256xf32, #tpu.memory_space<vmem>>, vector<2x256xf32>
    tpu.vector_store %arg5[%c0_8, %c0_9], %8 {strides = array<i32>} : memref<2x256xf32, #tpu.memory_space<vmem>>, vector<2x256xf32>,
    return
  }
  func.func @transform_0(%arg0: i32) -> (i32, i32) {
    %c0_i32 = arith.constant 0 : i32
    %c0_i32_0 = arith.constant 0 : i32
    %c0_i32_1 = arith.constant 0 : i32
    return %c0_i32, %c0_i32_0 : i32, i32
  }
  func.func @transform_1(%arg0: i32) -> (i32, i32) {
    %c0_i32 = arith.constant 0 : i32
    %c0_i32_0 = arith.constant 0 : i32
    %c0_i32_1 = arith.constant 0 : i32
    return %c0_i32, %c0_i32_0 : i32, i32
  }
  func.func @transform_2(%arg0: i32) -> (i32, i32) {
    %c0_i32 = arith.constant 0 : i32
    %c0_i32_0 = arith.constant 0 : i32
    return %c0_i32, %arg0 : i32, i32
  }
  func.func @transform_3(%arg0: i32) -> (i32, i32) {
    %c0_i32 = arith.constant 0 : i32
    %c0_i32_0 = arith.constant 0 : i32
    return %c0_i32, %arg0 : i32, i32
  }
  func.func @transform_4(%arg0: i32) -> (i32, i32) {
    %c0_i32 = arith.constant 0 : i32
    %c0_i32_0 = arith.constant 0 : i32
    return %c0_i32, %arg0 : i32, i32
  }
}

module attributes {stable_mosaic.version = 11 : i64} {
  func.func @_switchnorm_kernel(%arg0: i32, %arg1: memref<2x8xf32, #tpu.memory_space<vmem>>, %arg2: memref<1x8xf32, #tpu.memory_space<vmem>>, %arg3: memref<1x8xf32, #tpu.memory_space<vmem>>, %arg4: memref<4xf32, #tpu.memory_space<smem>>, %arg5: memref<2x8xf32, #tpu.memory_space<vmem>>) attributes {dimension_semantics = [#tpu.dimension_semantics<arbitrary>], iteration_bounds = array<i64: 1>, scalar_prefetch = 0 : i64, scratch_operands = 0 : i64, tpu.core_type = #tpu.core_type<tc>, window_params = [{pipeline_mode = #tpu.pipeline_mode<synchronous>, transform_indices = @transform_0, window_bounds = array<i64: 2, 8>}, {pipeline_mode = #tpu.pipeline_mode<synchronous>, transform_indices = @transform_1, window_bounds = array<i64: 1, 8>}, {pipeline_mode = #tpu.pipeline_mode<synchronous>, transform_indices = @transform_2, window_bounds = array<i64: 1, 8>}, {transform_indices = @transform_3, window_bounds = array<i64: 4>}, {pipeline_mode = #tpu.pipeline_mode<synchronous>, transform_indices = @transform_4, window_bounds = array<i64: 2, 8>}]} {
    %c0 = arith.constant 0 : index
    %c0_0 = arith.constant 0 : index
    %0 = vector.load %arg1[%c0, %c0_0] : memref<2x8xf32, #tpu.memory_space<vmem>>, vector<2x8xf32>
    %cst = arith.constant dense<0.000000e+00> : vector<2xf32>
    %1 = vector.multi_reduction <add>, %0, %cst [1] : vector<2x8xf32> to vector<2xf32>
    %2 = vector.shape_cast %1 : vector<2xf32> to vector<2x1xf32>
    %cst_1 = arith.constant 8.000000e+00 : f32
    %3 = vector.broadcast %cst_1 : f32 to vector<2x1xf32>
    %4 = arith.divf %2, %3 : vector<2x1xf32>
    %5 = vector.broadcast %4 : vector<2x1xf32> to vector<2x8xf32>
    %6 = arith.subf %0, %5 : vector<2x8xf32>
    %7 = arith.mulf %6, %6 : vector<2x8xf32>
    %cst_2 = arith.constant dense<0.000000e+00> : vector<2xf32>
    %8 = vector.multi_reduction <add>, %7, %cst_2 [1] : vector<2x8xf32> to vector<2xf32>
    %9 = vector.shape_cast %8 : vector<2xf32> to vector<2x1xf32>
    %cst_3 = arith.constant 7.000000e+00 : f32
    %10 = vector.broadcast %cst_3 : f32 to vector<2x1xf32>
    %11 = arith.divf %9, %10 : vector<2x1xf32>
    %cst_4 = arith.constant dense<0.000000e+00> : vector<8xf32>
    %12 = vector.multi_reduction <add>, %0, %cst_4 [0] : vector<2x8xf32> to vector<8xf32>
    %13 = vector.shape_cast %12 : vector<8xf32> to vector<1x8xf32>
    %cst_5 = arith.constant 2.000000e+00 : f32
    %14 = vector.broadcast %cst_5 : f32 to vector<1x8xf32>
    %15 = arith.divf %13, %14 : vector<1x8xf32>
    %16 = vector.broadcast %15 : vector<1x8xf32> to vector<2x8xf32>
    %17 = arith.subf %0, %16 : vector<2x8xf32>
    %18 = arith.mulf %17, %17 : vector<2x8xf32>
    %cst_6 = arith.constant dense<0.000000e+00> : vector<8xf32>
    %19 = vector.multi_reduction <add>, %18, %cst_6 [0] : vector<2x8xf32> to vector<8xf32>
    %20 = vector.shape_cast %19 : vector<8xf32> to vector<1x8xf32>
    %cst_7 = arith.constant 1.000000e+00 : f32
    %21 = vector.broadcast %cst_7 : f32 to vector<1x8xf32>
    %22 = arith.divf %20, %21 : vector<1x8xf32>
    %c0_8 = arith.constant 0 : index
    %23 = memref.load %arg4[%c0_8] : memref<4xf32, #tpu.memory_space<smem>>
    %24 = vector.broadcast %23 : f32 to vector<2x1xf32>
    %25 = arith.mulf %24, %4 : vector<2x1xf32>
    %c1 = arith.constant 1 : index
    %26 = memref.load %arg4[%c1] : memref<4xf32, #tpu.memory_space<smem>>
    %27 = vector.broadcast %26 : f32 to vector<1x8xf32>
    %28 = arith.mulf %27, %15 : vector<1x8xf32>
    %29 = vector.broadcast %25 : vector<2x1xf32> to vector<2x8xf32>
    %30 = vector.broadcast %28 : vector<1x8xf32> to vector<2x8xf32>
    %31 = arith.addf %29, %30 : vector<2x8xf32>
    %c2 = arith.constant 2 : index
    %32 = memref.load %arg4[%c2] : memref<4xf32, #tpu.memory_space<smem>>
    %33 = vector.broadcast %32 : f32 to vector<2x1xf32>
    %34 = arith.mulf %33, %11 : vector<2x1xf32>
    %c3 = arith.constant 3 : index
    %35 = memref.load %arg4[%c3] : memref<4xf32, #tpu.memory_space<smem>>
    %36 = vector.broadcast %35 : f32 to vector<1x8xf32>
    %37 = arith.mulf %36, %22 : vector<1x8xf32>
    %38 = vector.broadcast %34 : vector<2x1xf32> to vector<2x8xf32>
    %39 = vector.broadcast %37 : vector<1x8xf32> to vector<2x8xf32>
    %40 = arith.addf %38, %39 : vector<2x8xf32>
    %41 = arith.subf %0, %31 : vector<2x8xf32>
    %cst_9 = arith.constant 9.99999974E-6 : f32
    %42 = vector.broadcast %cst_9 : f32 to vector<2x8xf32>
    %43 = arith.addf %40, %42 : vector<2x8xf32>
    %44 = math.rsqrt %43 : vector<2x8xf32>
    %45 = arith.mulf %41, %44 : vector<2x8xf32>
    %c0_10 = arith.constant 0 : index
    %c0_11 = arith.constant 0 : index
    %46 = vector.load %arg2[%c0_10, %c0_11] : memref<1x8xf32, #tpu.memory_space<vmem>>, vector<1x8xf32>
    %47 = vector.broadcast %46 : vector<1x8xf32> to vector<2x8xf32>
    %48 = arith.mulf %45, %47 : vector<2x8xf32>
    %c0_12 = arith.constant 0 : index
    %c0_13 = arith.constant 0 : index
    %49 = vector.load %arg3[%c0_12, %c0_13] : memref<1x8xf32, #tpu.memory_space<vmem>>, vector<1x8xf32>
    %50 = vector.broadcast %49 : vector<1x8xf32> to vector<2x8xf32>
    %51 = arith.addf %48, %50 : vector<2x8xf32>
    %c0_14 = arith.constant 0 : index
    %c0_15 = arith.constant 0 : index
    %52 = vector.load %arg5[%c0_14, %c0_15] : memref<2x8xf32, #tpu.memory_space<vmem>>, vector<2x8xf32>
    tpu.vector_store %arg5[%c0_14, %c0_15], %51 {strides = array<i32>} : memref<2x8xf32, #tpu.memory_space<vmem>>, vector<2x8xf32>,
    return
  }
  func.func @transform_0(%arg0: i32) -> (i32, i32) {
    %c0_i32 = arith.constant 0 : i32
    %c0_i32_0 = arith.constant 0 : i32
    %c0_i32_1 = arith.constant 0 : i32
    return %c0_i32, %c0_i32_0 : i32, i32
  }
  func.func @transform_1(%arg0: i32) -> (i32, i32) {
    %c0_i32 = arith.constant 0 : i32
    %c0_i32_0 = arith.constant 0 : i32
    %c0_i32_1 = arith.constant 0 : i32
    return %c0_i32, %c0_i32_0 : i32, i32
  }
  func.func @transform_2(%arg0: i32) -> (i32, i32) {
    %c0_i32 = arith.constant 0 : i32
    %c0_i32_0 = arith.constant 0 : i32
    %c0_i32_1 = arith.constant 0 : i32
    return %c0_i32, %c0_i32_0 : i32, i32
  }
  func.func @transform_3(%arg0: i32) -> i32 {
    %c0_i32 = arith.constant 0 : i32
    %c0_i32_0 = arith.constant 0 : i32
    return %c0_i32 : i32
  }
  func.func @transform_4(%arg0: i32) -> (i32, i32) {
    %c0_i32 = arith.constant 0 : i32
    %c0_i32_0 = arith.constant 0 : i32
    %c0_i32_1 = arith.constant 0 : i32
    return %c0_i32, %c0_i32_0 : i32, i32
  }
}

module attributes {stable_mosaic.version = 11 : i64} {
  func.func @kernel(%arg0: i32, %arg1: memref<2x256xf32, #tpu.memory_space<vmem>>, %arg2: memref<256x256xbf16, #tpu.memory_space<vmem>>, %arg3: memref<1x256xf32, #tpu.memory_space<vmem>>, %arg4: memref<2x256xf32, #tpu.memory_space<vmem>>, %arg5: memref<2x256xf32, #tpu.memory_space<vmem>>) attributes {dimension_semantics = [#tpu.dimension_semantics<parallel>], iteration_bounds = array<i64: 1>, scalar_prefetch = 0 : i64, scratch_operands = 0 : i64, tpu.core_type = #tpu.core_type<tc>, window_params = [{pipeline_mode = #tpu.pipeline_mode<synchronous>, transform_indices = @transform_0, window_bounds = array<i64: 2, 256>}, {transform_indices = @transform_1, window_bounds = array<i64: 256, 256>}, {transform_indices = @transform_2, window_bounds = array<i64: 1, 256>}, {transform_indices = @transform_3, window_bounds = array<i64: 2, 256>}, {transform_indices = @transform_4, window_bounds = array<i64: 2, 256>}]} {
    %c0 = arith.constant 0 : index
    %c0_0 = arith.constant 0 : index
    %0 = vector.load %arg1[%c0, %c0_0] : memref<2x256xf32, #tpu.memory_space<vmem>>, vector<2x256xf32>
    %1 = arith.truncf %0 : vector<2x256xf32> to vector<2x256xbf16>
    %c0_1 = arith.constant 0 : index
    %c0_2 = arith.constant 0 : index
    %2 = vector.load %arg2[%c0_1, %c0_2] : memref<256x256xbf16, #tpu.memory_space<vmem>>, vector<256x256xbf16>
    %cst = arith.constant dense<0.000000e+00> : vector<2x256xf32>
    %3 = tpu.matmul %1, %2, %cst {dimension_numbers = #tpu.dot_dimension_numbers<[1], [0], [0], [1], [0, 0, 1, 1], [], []>} : vector<2x256xbf16>, vector<256x256xbf16>, vector<2x256xf32> -> vector<2x256xf32>
    %c0_3 = arith.constant 0 : index
    %c0_4 = arith.constant 0 : index
    %4 = vector.load %arg3[%c0_3, %c0_4] : memref<1x256xf32, #tpu.memory_space<vmem>>, vector<1x256xf32>
    %5 = vector.broadcast %4 : vector<1x256xf32> to vector<2x256xf32>
    %6 = arith.addf %3, %5 : vector<2x256xf32>
    %c0_5 = arith.constant 0 : index
    %c0_6 = arith.constant 0 : index
    %7 = vector.load %arg4[%c0_5, %c0_6] : memref<2x256xf32, #tpu.memory_space<vmem>>, vector<2x256xf32>
    %8 = arith.addf %6, %7 : vector<2x256xf32>
    %c0_7 = arith.constant 0 : index
    %c0_8 = arith.constant 0 : index
    %9 = vector.load %arg5[%c0_7, %c0_8] : memref<2x256xf32, #tpu.memory_space<vmem>>, vector<2x256xf32>
    tpu.vector_store %arg5[%c0_7, %c0_8], %8 {strides = array<i32>} : memref<2x256xf32, #tpu.memory_space<vmem>>, vector<2x256xf32>,
    return
  }
  func.func @transform_0(%arg0: i32) -> (i32, i32) {
    %c0_i32 = arith.constant 0 : i32
    %c0_i32_0 = arith.constant 0 : i32
    %c0_i32_1 = arith.constant 0 : i32
    return %c0_i32, %c0_i32_0 : i32, i32
  }
  func.func @transform_1(%arg0: i32) -> (i32, i32) {
    %c0_i32 = arith.constant 0 : i32
    %c0_i32_0 = arith.constant 0 : i32
    return %c0_i32, %arg0 : i32, i32
  }
  func.func @transform_2(%arg0: i32) -> (i32, i32) {
    %c0_i32 = arith.constant 0 : i32
    %c0_i32_0 = arith.constant 0 : i32
    return %c0_i32, %arg0 : i32, i32
  }
  func.func @transform_3(%arg0: i32) -> (i32, i32) {
    %c0_i32 = arith.constant 0 : i32
    %c0_i32_0 = arith.constant 0 : i32
    return %c0_i32, %arg0 : i32, i32
  }
  func.func @transform_4(%arg0: i32) -> (i32, i32) {
    %c0_i32 = arith.constant 0 : i32
    %c0_i32_0 = arith.constant 0 : i32
    return %c0_i32, %arg0 : i32, i32
  }
}

module attributes {stable_mosaic.version = 11 : i64} {
  func.func @kernel(%arg0: i32, %arg1: memref<2x128x1xf32, #tpu.memory_space<vmem>>, %arg2: memref<2x1x384xf32, #tpu.memory_space<vmem>>, %arg3: memref<2x1x384xf32, #tpu.memory_space<vmem>>, %arg4: memref<2x128x1xf32, #tpu.memory_space<vmem>>, %arg5: memref<2x128x1xf32, #tpu.memory_space<vmem>>) attributes {dimension_semantics = [#tpu.dimension_semantics<parallel>], iteration_bounds = array<i64: 2>, scalar_prefetch = 0 : i64, scratch_operands = 0 : i64, tpu.core_type = #tpu.core_type<tc>, window_params = [{transform_indices = @transform_0, window_bounds = array<i64: 2, 128, 1>}, {pipeline_mode = #tpu.pipeline_mode<synchronous>, transform_indices = @transform_1, window_bounds = array<i64: 2, 1, 384>}, {pipeline_mode = #tpu.pipeline_mode<synchronous>, transform_indices = @transform_2, window_bounds = array<i64: 2, 1, 384>}, {transform_indices = @transform_3, window_bounds = array<i64: 2, 128, 1>}, {transform_indices = @transform_4, window_bounds = array<i64: 2, 128, 1>}]} {
    %c0 = arith.constant 0 : index
    %c0_0 = arith.constant 0 : index
    %c0_1 = arith.constant 0 : index
    %0 = vector.load %arg1[%c0, %c0_0, %c0_1] : memref<2x128x1xf32, #tpu.memory_space<vmem>>, vector<2x128x1xf32>
    %c0_2 = arith.constant 0 : index
    %c0_3 = arith.constant 0 : index
    %c0_4 = arith.constant 0 : index
    %1 = vector.load %arg2[%c0_2, %c0_3, %c0_4] : memref<2x1x384xf32, #tpu.memory_space<vmem>>, vector<2x1x384xf32>
    %2 = vector.broadcast %0 : vector<2x128x1xf32> to vector<2x128x384xf32>
    %3 = vector.broadcast %1 : vector<2x1x384xf32> to vector<2x128x384xf32>
    %4 = arith.mulf %2, %3 : vector<2x128x384xf32>
    %5 = tpu.iota {dimensions = array<i32: 2>} : vector<2x128x384xi32>
    %cst = arith.constant dense<0xFF800000> : vector<2x128xf32>
    %6 = vector.multi_reduction <maximumf>, %4, %cst [2] : vector<2x128x384xf32> to vector<2x128xf32>
    %7 = vector.shape_cast %6 : vector<2x128xf32> to vector<2x128x1xf32>
    %c264_i32 = arith.constant 264 : i32
    %8 = vector.broadcast %c264_i32 : i32 to vector<2x128x384xi32>
    %9 = arith.cmpi slt, %5, %8 : vector<2x128x384xi32>
    %10 = vector.broadcast %7 : vector<2x128x1xf32> to vector<2x128x384xf32>
    %11 = arith.subf %4, %10 : vector<2x128x384xf32>
    %12 = math.exp %11 : vector<2x128x384xf32>
    %cst_5 = arith.constant 0.000000e+00 : f32
    %13 = vector.broadcast %cst_5 : f32 to vector<2x128x384xf32>
    %14 = arith.select %9, %12, %13 : vector<2x128x384xi1>, vector<2x128x384xf32>
    %cst_6 = arith.constant dense<0.000000e+00> : vector<2x128xf32>
    %15 = vector.multi_reduction <add>, %14, %cst_6 [2] : vector<2x128x384xf32> to vector<2x128xf32>
    %16 = vector.shape_cast %15 : vector<2x128xf32> to vector<2x128x1xf32>
    %c0_7 = arith.constant 0 : index
    %c0_8 = arith.constant 0 : index
    %c0_9 = arith.constant 0 : index
    %17 = vector.load %arg3[%c0_7, %c0_8, %c0_9] : memref<2x1x384xf32, #tpu.memory_space<vmem>>, vector<2x1x384xf32>
    %18 = vector.broadcast %17 : vector<2x1x384xf32> to vector<2x128x384xf32>
    %19 = arith.mulf %14, %18 : vector<2x128x384xf32>
    %cst_10 = arith.constant dense<0.000000e+00> : vector<2x128xf32>
    %20 = vector.multi_reduction <add>, %19, %cst_10 [2] : vector<2x128x384xf32> to vector<2x128xf32>
    %21 = vector.shape_cast %20 : vector<2x128xf32> to vector<2x128x1xf32>
    %22 = tpu.reciprocal %16 {approx = true} : vector<2x128x1xf32> -> vector<2x128x1xf32>
    %23 = arith.mulf %21, %22 : vector<2x128x1xf32>
    %c0_11 = arith.constant 0 : index
    %c0_12 = arith.constant 0 : index
    %c0_13 = arith.constant 0 : index
    %24 = vector.load %arg4[%c0_11, %c0_12, %c0_13] : memref<2x128x1xf32, #tpu.memory_space<vmem>>, vector<2x128x1xf32>
    %25 = arith.addf %23, %24 : vector<2x128x1xf32>
    %c0_14 = arith.constant 0 : index
    %c0_15 = arith.constant 0 : index
    %c0_16 = arith.constant 0 : index
    %26 = vector.load %arg5[%c0_14, %c0_15, %c0_16] : memref<2x128x1xf32, #tpu.memory_space<vmem>>, vector<2x128x1xf32>
    tpu.vector_store %arg5[%c0_14, %c0_15, %c0_16], %25 {strides = array<i32>} : memref<2x128x1xf32, #tpu.memory_space<vmem>>, vector<2x128x1xf32>,
    return
  }
  func.func @transform_0(%arg0: i32) -> (i32, i32, i32) {
    %c0_i32 = arith.constant 0 : i32
    %c0_i32_0 = arith.constant 0 : i32
    %c0_i32_1 = arith.constant 0 : i32
    return %c0_i32, %arg0, %c0_i32_0 : i32, i32, i32
  }
  func.func @transform_1(%arg0: i32) -> (i32, i32, i32) {
    %c0_i32 = arith.constant 0 : i32
    %c0_i32_0 = arith.constant 0 : i32
    %c0_i32_1 = arith.constant 0 : i32
    %c0_i32_2 = arith.constant 0 : i32
    return %c0_i32, %c0_i32_0, %c0_i32_1 : i32, i32, i32
  }
  func.func @transform_2(%arg0: i32) -> (i32, i32, i32) {
    %c0_i32 = arith.constant 0 : i32
    %c0_i32_0 = arith.constant 0 : i32
    %c0_i32_1 = arith.constant 0 : i32
    %c0_i32_2 = arith.constant 0 : i32
    return %c0_i32, %c0_i32_0, %c0_i32_1 : i32, i32, i32
  }
  func.func @transform_3(%arg0: i32) -> (i32, i32, i32) {
    %c0_i32 = arith.constant 0 : i32
    %c0_i32_0 = arith.constant 0 : i32
    %c0_i32_1 = arith.constant 0 : i32
    return %c0_i32, %arg0, %c0_i32_0 : i32, i32, i32
  }
  func.func @transform_4(%arg0: i32) -> (i32, i32, i32) {
    %c0_i32 = arith.constant 0 : i32
    %c0_i32_0 = arith.constant 0 : i32
    %c0_i32_1 = arith.constant 0 : i32
    return %c0_i32, %arg0, %c0_i32_0 : i32, i32, i32
  }
}

module attributes {stable_mosaic.version = 11 : i64} {
  func.func @kernel(%arg0: i32, %arg1: memref<2x256xf32, #tpu.memory_space<vmem>>, %arg2: memref<256x256xbf16, #tpu.memory_space<vmem>>, %arg3: memref<1x256xf32, #tpu.memory_space<vmem>>, %arg4: memref<2x256xf32, #tpu.memory_space<vmem>>) attributes {dimension_semantics = [#tpu.dimension_semantics<parallel>], iteration_bounds = array<i64: 1>, scalar_prefetch = 0 : i64, scratch_operands = 0 : i64, tpu.core_type = #tpu.core_type<tc>, window_params = [{pipeline_mode = #tpu.pipeline_mode<synchronous>, transform_indices = @transform_0, window_bounds = array<i64: 2, 256>}, {transform_indices = @transform_1, window_bounds = array<i64: 256, 256>}, {transform_indices = @transform_2, window_bounds = array<i64: 1, 256>}, {transform_indices = @transform_3, window_bounds = array<i64: 2, 256>}]} {
    %c0 = arith.constant 0 : index
    %c0_0 = arith.constant 0 : index
    %0 = vector.load %arg1[%c0, %c0_0] : memref<2x256xf32, #tpu.memory_space<vmem>>, vector<2x256xf32>
    %1 = arith.truncf %0 : vector<2x256xf32> to vector<2x256xbf16>
    %c0_1 = arith.constant 0 : index
    %c0_2 = arith.constant 0 : index
    %2 = vector.load %arg2[%c0_1, %c0_2] : memref<256x256xbf16, #tpu.memory_space<vmem>>, vector<256x256xbf16>
    %cst = arith.constant dense<0.000000e+00> : vector<2x256xf32>
    %3 = tpu.matmul %1, %2, %cst {dimension_numbers = #tpu.dot_dimension_numbers<[1], [0], [0], [1], [0, 0, 1, 1], [], []>} : vector<2x256xbf16>, vector<256x256xbf16>, vector<2x256xf32> -> vector<2x256xf32>
    %c0_3 = arith.constant 0 : index
    %c0_4 = arith.constant 0 : index
    %4 = vector.load %arg3[%c0_3, %c0_4] : memref<1x256xf32, #tpu.memory_space<vmem>>, vector<1x256xf32>
    %5 = vector.broadcast %4 : vector<1x256xf32> to vector<2x256xf32>
    %6 = arith.addf %3, %5 : vector<2x256xf32>
    %cst_5 = arith.constant 5.000000e-01 : f32
    %7 = vector.broadcast %cst_5 : f32 to vector<2x256xf32>
    %8 = arith.mulf %7, %6 : vector<2x256xf32>
    %cst_6 = arith.constant 0.707106769 : f32
    %9 = vector.broadcast %cst_6 : f32 to vector<2x256xf32>
    %10 = arith.mulf %6, %9 : vector<2x256xf32>
    %11 = math.absf %10 : vector<2x256xf32>
    %cst_7 = arith.constant 0.327591091 : f32
    %12 = vector.broadcast %cst_7 : f32 to vector<2x256xf32>
    %13 = arith.mulf %12, %11 : vector<2x256xf32>
    %cst_8 = arith.constant 1.000000e+00 : f32
    %14 = vector.broadcast %cst_8 : f32 to vector<2x256xf32>
    %15 = arith.addf %14, %13 : vector<2x256xf32>
    %cst_9 = arith.constant 1.000000e+00 : f32
    %16 = vector.broadcast %cst_9 : f32 to vector<2x256xf32>
    %17 = arith.divf %16, %15 : vector<2x256xf32>
    %cst_10 = arith.constant 1.06140542 : f32
    %18 = vector.broadcast %cst_10 : f32 to vector<2x256xf32>
    %19 = arith.mulf %18, %17 : vector<2x256xf32>
    %cst_11 = arith.constant -1.45315206 : f32
    %20 = vector.broadcast %cst_11 : f32 to vector<2x256xf32>
    %21 = arith.addf %19, %20 : vector<2x256xf32>
    %22 = arith.mulf %21, %17 : vector<2x256xf32>
    %cst_12 = arith.constant 1.42141378 : f32
    %23 = vector.broadcast %cst_12 : f32 to vector<2x256xf32>
    %24 = arith.addf %22, %23 : vector<2x256xf32>
    %25 = arith.mulf %24, %17 : vector<2x256xf32>
    %cst_13 = arith.constant -0.284496725 : f32
    %26 = vector.broadcast %cst_13 : f32 to vector<2x256xf32>
    %27 = arith.addf %25, %26 : vector<2x256xf32>
    %28 = arith.mulf %27, %17 : vector<2x256xf32>
    %cst_14 = arith.constant 0.254829586 : f32
    %29 = vector.broadcast %cst_14 : f32 to vector<2x256xf32>
    %30 = arith.addf %28, %29 : vector<2x256xf32>
    %31 = arith.mulf %30, %17 : vector<2x256xf32>
    %cst_15 = arith.constant 0.000000e+00 : f32
    %32 = vector.broadcast %cst_15 : f32 to vector<2x256xf32>
    %33 = arith.subf %32, %11 : vector<2x256xf32>
    %34 = arith.mulf %33, %11 : vector<2x256xf32>
    %35 = math.exp %34 : vector<2x256xf32>
    %36 = arith.mulf %31, %35 : vector<2x256xf32>
    %cst_16 = arith.constant 1.000000e+00 : f32
    %37 = vector.broadcast %cst_16 : f32 to vector<2x256xf32>
    %38 = arith.subf %37, %36 : vector<2x256xf32>
    %cst_17 = arith.constant 0.000000e+00 : f32
    %39 = vector.broadcast %cst_17 : f32 to vector<2x256xf32>
    %40 = arith.cmpf olt, %10, %39 : vector<2x256xf32>
    %cst_18 = arith.constant 0.000000e+00 : f32
    %41 = vector.broadcast %cst_18 : f32 to vector<2x256xf32>
    %42 = arith.subf %41, %38 : vector<2x256xf32>
    %43 = arith.select %40, %42, %38 : vector<2x256xi1>, vector<2x256xf32>
    %cst_19 = arith.constant 1.000000e+00 : f32
    %44 = vector.broadcast %cst_19 : f32 to vector<2x256xf32>
    %45 = arith.addf %44, %43 : vector<2x256xf32>
    %46 = arith.mulf %8, %45 : vector<2x256xf32>
    %c0_20 = arith.constant 0 : index
    %c0_21 = arith.constant 0 : index
    %47 = vector.load %arg4[%c0_20, %c0_21] : memref<2x256xf32, #tpu.memory_space<vmem>>, vector<2x256xf32>
    tpu.vector_store %arg4[%c0_20, %c0_21], %46 {strides = array<i32>} : memref<2x256xf32, #tpu.memory_space<vmem>>, vector<2x256xf32>,
    return
  }
  func.func @transform_0(%arg0: i32) -> (i32, i32) {
    %c0_i32 = arith.constant 0 : i32
    %c0_i32_0 = arith.constant 0 : i32
    %c0_i32_1 = arith.constant 0 : i32
    return %c0_i32, %c0_i32_0 : i32, i32
  }
  func.func @transform_1(%arg0: i32) -> (i32, i32) {
    %c0_i32 = arith.constant 0 : i32
    %c0_i32_0 = arith.constant 0 : i32
    return %c0_i32, %arg0 : i32, i32
  }
  func.func @transform_2(%arg0: i32) -> (i32, i32) {
    %c0_i32 = arith.constant 0 : i32
    %c0_i32_0 = arith.constant 0 : i32
    return %c0_i32, %arg0 : i32, i32
  }
  func.func @transform_3(%arg0: i32) -> (i32, i32) {
    %c0_i32 = arith.constant 0 : i32
    %c0_i32_0 = arith.constant 0 : i32
    return %c0_i32, %arg0 : i32, i32
  }
}

module attributes {stable_mosaic.version = 11 : i64} {
  func.func @kernel(%arg0: i32, %arg1: memref<2x256xf32, #tpu.memory_space<vmem>>, %arg2: memref<256x256xbf16, #tpu.memory_space<vmem>>, %arg3: memref<1x256xf32, #tpu.memory_space<vmem>>, %arg4: memref<2x256xf32, #tpu.memory_space<vmem>>, %arg5: memref<2x256xf32, #tpu.memory_space<vmem>>) attributes {dimension_semantics = [#tpu.dimension_semantics<parallel>], iteration_bounds = array<i64: 1>, scalar_prefetch = 0 : i64, scratch_operands = 0 : i64, tpu.core_type = #tpu.core_type<tc>, window_params = [{pipeline_mode = #tpu.pipeline_mode<synchronous>, transform_indices = @transform_0, window_bounds = array<i64: 2, 256>}, {transform_indices = @transform_1, window_bounds = array<i64: 256, 256>}, {transform_indices = @transform_2, window_bounds = array<i64: 1, 256>}, {transform_indices = @transform_3, window_bounds = array<i64: 2, 256>}, {transform_indices = @transform_4, window_bounds = array<i64: 2, 256>}]} {
    %c0 = arith.constant 0 : index
    %c0_0 = arith.constant 0 : index
    %0 = vector.load %arg1[%c0, %c0_0] : memref<2x256xf32, #tpu.memory_space<vmem>>, vector<2x256xf32>
    %1 = arith.truncf %0 : vector<2x256xf32> to vector<2x256xbf16>
    %c0_1 = arith.constant 0 : index
    %c0_2 = arith.constant 0 : index
    %2 = vector.load %arg2[%c0_1, %c0_2] : memref<256x256xbf16, #tpu.memory_space<vmem>>, vector<256x256xbf16>
    %cst = arith.constant dense<0.000000e+00> : vector<2x256xf32>
    %3 = tpu.matmul %1, %2, %cst {dimension_numbers = #tpu.dot_dimension_numbers<[1], [0], [0], [1], [0, 0, 1, 1], [], []>} : vector<2x256xbf16>, vector<256x256xbf16>, vector<2x256xf32> -> vector<2x256xf32>
    %c0_3 = arith.constant 0 : index
    %c0_4 = arith.constant 0 : index
    %4 = vector.load %arg3[%c0_3, %c0_4] : memref<1x256xf32, #tpu.memory_space<vmem>>, vector<1x256xf32>
    %5 = vector.broadcast %4 : vector<1x256xf32> to vector<2x256xf32>
    %6 = arith.addf %3, %5 : vector<2x256xf32>
    %c0_5 = arith.constant 0 : index
    %c0_6 = arith.constant 0 : index
    %7 = vector.load %arg4[%c0_5, %c0_6] : memref<2x256xf32, #tpu.memory_space<vmem>>, vector<2x256xf32>
    %8 = arith.addf %6, %7 : vector<2x256xf32>
    %c0_7 = arith.constant 0 : index
    %c0_8 = arith.constant 0 : index
    %9 = vector.load %arg5[%c0_7, %c0_8] : memref<2x256xf32, #tpu.memory_space<vmem>>, vector<2x256xf32>
    tpu.vector_store %arg5[%c0_7, %c0_8], %8 {strides = array<i32>} : memref<2x256xf32, #tpu.memory_space<vmem>>, vector<2x256xf32>,
    return
  }
  func.func @transform_0(%arg0: i32) -> (i32, i32) {
    %c0_i32 = arith.constant 0 : i32
    %c0_i32_0 = arith.constant 0 : i32
    %c0_i32_1 = arith.constant 0 : i32
    return %c0_i32, %c0_i32_0 : i32, i32
  }
  func.func @transform_1(%arg0: i32) -> (i32, i32) {
    %c0_i32 = arith.constant 0 : i32
    %c0_i32_0 = arith.constant 0 : i32
    return %c0_i32, %arg0 : i32, i32
  }
  func.func @transform_2(%arg0: i32) -> (i32, i32) {
    %c0_i32 = arith.constant 0 : i32
    %c0_i32_0 = arith.constant 0 : i32
    return %c0_i32, %arg0 : i32, i32
  }
  func.func @transform_3(%arg0: i32) -> (i32, i32) {
    %c0_i32 = arith.constant 0 : i32
    %c0_i32_0 = arith.constant 0 : i32
    return %c0_i32, %arg0 : i32, i32
  }
  func.func @transform_4(%arg0: i32) -> (i32, i32) {
    %c0_i32 = arith.constant 0 : i32
    %c0_i32_0 = arith.constant 0 : i32
    return %c0_i32, %arg0 : i32, i32
  }
}

</mosaic_0001>

<bundles_post_ra>
// kernel: cross_transformer_forward.8
= control target key start
LH: loop header
LB: loop body
LE: loop exit
PB: predicated region body
PF: predicated region fallthrough
CT: control target
= control target key end

     0   :  { %v19_v0 = vlaneseq  ;;  %v123_v1 = vmov 1983009808   ;;  %vm26_vm0 = vcmask 1041408   ;;  %v124_v12 = vmov 269488144   ;;  %s161_s0 = inlined_call_operand.vmem [shape: f32[2,256], index: 0, kind: input, shape index: {}]   ;;  %s162_s1 = inlined_call_operand.vmem [shape: f32[1,256], index: 1, kind: input, shape index: {}]   ;;  %s163_s2 = inlined_call_operand.vmem [shape: f32[1,256], index: 2, kind: input, shape index: {}]   ;;  %s164_s3 = inlined_call_operand.vmem [shape: f32[2,256], index: 3, kind: output, shape index: {}]  }
   0x1   :  { %v17_v2 = vunpack.c.l.s4 %v123_v1  ;;  %v14_v5 = vld [vmem:[%s161_s0] sm:$0xf]  ;;  %v36_v13 = vunpack.c.l.s4 %v124_v12 }
   0x2   :  { %v20_v3 = vshrl.u32 %v19_v0, 7  ;;  %v74_v31 = vld [vmem:[%s162_s1] sm:$0x3] }
   0x3   :  { %v18_v4 = vunpack.c.0.s8 %v17_v2  ;;  %v37_v14 = vunpack.c.0.s8 %v36_v13  ;;  %v94_v32 = vld [vmem:[%s163_s2] sm:$0x3] }
   0x4   :  { %v78_v29 = vsub.s32 0, %v20_v3  ;;  %v82_v30 = vsub.s32 1, %v20_v3 }
   0x5   :  { %v21_v6 = vsub.s32 %v18_v4, %v20_v3  ;;  %v40_v15 = vsub.s32 %v37_v14, %v20_v3 }
   0x6   :  { %v79_v33 = vrot.slane %v74_v31, %v78_v29  ;;  %v83_v34 = vrot.slane %v74_v31, %v82_v30  ;;  %v99_v35 = vrot.slane %v94_v32, %v78_v29  ;;  %v103_v36 = vrot.slane %v94_v32, %v82_v30 }
   0x7   :  { %v22_v7 = vrot.slane %v14_v5, %v21_v6 }
   0x8   :  { %v84_v37 = vcombine.low %v79_v33, %v83_v34  ;;  %v104_v38 = vcombine.low %v99_v35, %v103_v36 }
   0x9   :  { %v23_v8 = vcombine.high %v22_v7, %v22_v7  ;;  %v27_v9 = vsel %vm26_vm0, %v22_v7, 0.0 }
   0xa   :  { %v91_v40 = vrot.slane %v84_v37, %v21_v6  ;;  %v111_v42 = vrot.slane %v104_v38, %v21_v6 }
   0xb   :  { %v28_v10 = vsel %vm26_vm0, %v23_v8, 0.0 }
   0xc   :  { %v29_v11 = vadd.f32 %v28_v10, %v27_v9 }
   0xe   :  { %30 = vadd.xlane.f32.xlu0 %v29_v11 }
  0x9b   :  { %v31_v16 = vpop.xlane.xlu0 %30 }
  0x9c   :  { %v33_v17 = vmul.f32 0.00390625, %v31_v16 }
  0x9e   :  { %v41_v18 = vrot.slane %v33_v17, %v40_v15 }
  0xa0   :  { %v43_v19 = vsub.f32 %v14_v5, %v41_v18 }
  0xa2   :  { %v44_v20 = vmul.f32 %v43_v19, %v43_v19 }
  0xa4   :  { %v52_v21 = vrot.slane %v44_v20, %v21_v6 }
  0xa6   :  { %v53_v22 = vcombine.high %v52_v21, %v52_v21  ;;  %v56_v23 = vsel %vm26_vm0, %v52_v21, 0.0 }
  0xa8   :  { %v57_v24 = vsel %vm26_vm0, %v53_v22, 0.0 }
  0xa9   :  { %v58_v25 = vadd.f32 %v57_v24, %v56_v23 }
  0xab   :  { %59 = vadd.xlane.f32.xlu0 %v58_v25 }
 0x138   :  { %v60_v26 = vpop.xlane.xlu0 %59 }
 0x139   :  { %v61_v27 = vmul.f32 0.00390625, %v60_v26 }
 0x13b   :  { %v62_v28 = vadd.f32 1e-05, %v61_v27 }
 0x13d   :  { %121 = vrsqrt.f32 %v62_v28 }
 0x147   :  { %v122_v39 = vpop.eup %121 }
 0x148   :  { %v71_v41 = vrot.slane %v122_v39, %v40_v15 }
 0x14a   :  { %v73_v43 = vmul.f32 %v71_v41, %v43_v19 }
 0x14c   :  { %v93_v44 = vmul.f32 %v91_v40, %v73_v43 }
 0x14e   :  { %v113_v45 = vadd.f32 %v111_v42, %v93_v44 }
 0x150   :  { %114 = vst [vmem:[%s164_s3] sm:$0xf] %v113_v45 }

// kernel: cross_transformer_forward.9
= control target key start
LH: loop header
LB: loop body
LE: loop exit
PB: predicated region body
PF: predicated region fallthrough
CT: control target
= control target key end

     0   :  { %9 = vsyncpa [#allocation3], 0  ;;  %s168_s0 = inlined_call_operand.vmem [shape: f32[2,8], index: 0, kind: input, shape index: {}]   ;;  %s169_s1 = inlined_call_operand.vmem [shape: f32[1,8], index: 1, kind: input, shape index: {}]   ;;  %s170_s2 = inlined_call_operand.vmem [shape: f32[1,8], index: 2, kind: input, shape index: {}]   ;;  %s171_s3 = inlined_call_operand.vmem [shape: f32[4], index: 3, kind: input, shape index: {}]   ;;  %s172_s4 = inlined_call_operand.vmem [shape: f32[2,8], index: 4, kind: output, shape index: {}]  }
   0x1   :  { %s22_s17 = sshll.u32 %s171_s3, 4  ;;  %s23_s17 = int_to_ptr.vmem [resolvable:$true] %s22_s17 }
   0x2   :  { %s109_s18 = scalar_lea.vmem %s23_s17, 16  ;;  %p114_p1 = scmp.lt.s32.totalorder %s23_s17, %s23_s17 }
   0x3   :  { %p110_p0 = scmp.ne.s32.totalorder %s23_s17, %s109_s18  ;;  %p115_p2 = scmp.lt.s32.totalorder %s109_s18, %s109_s18 }
   0x5   :  { %p116_p3 = por %p115_p2, %p114_p1 }
   0x7   :  { %p117_p4 = pnand %p116_p3, %p110_p0 }
   0x9   :  { %120 = shalt.err (!%p117_p4)
}
   0xa   :  { %s123_s19 = smov [#allocation2]  }
   0xb   :  { %25 = dma.vmem_to_smem %s23_s17, 16, %s123_s19, [#allocation3]  }
   0xc   :  { %121 = dma.done.wait [#allocation3], 16  }
   0xd   :  { %122 = vsyncadd [#allocation3], 4294967280 }
   0xe   :  { %29 = sfence }
   0xf   :  { %v30_v0 = vld [vmem:[%s168_s0] sm:$0x3]  ;;  %vm31_vm0 = vcmask 58368   ;;  %s101_s3 = sld [smem:[#allocation2 + $0x1]]  ;;  %s61_s22 = sld [smem:[#allocation2]] }
  0x10   :  { %v32_v1 = vsel %vm31_vm0, %v30_v0, 0.0  ;;  %s103_s0 = sld [smem:[#allocation2 + $0x3]]  ;;  %s102_s23 = sld [smem:[#allocation2 + $0x2]]  ;;  %v104_v38 = vld [vmem:[%s169_s1] ss:$0 sm:$0xff] }
  0x11   :  { %33 = vadd.xlane.f32.xlu0 %v32_v1  ;;  %v44_v2 = vrot.slane %v32_v1, 4  ;;  %v105_v40 = vld [vmem:[%s170_s2] ss:$0 sm:$0xff] }
  0x13   :  { %v45_v3 = vadd.f32 %v44_v2, %v32_v1 }
  0x15   :  { %v46_v4 = vrot.slane %v45_v3, 2  ;;  %v65_v9 = vstv %s101_s3  ;;  %v62_v10 = vstv %s61_s22 }
  0x16   :  { %v72_v28 = vstv %s103_s0  ;;  %v69_v29 = vstv %s102_s23 }
  0x17   :  { %v47_v5 = vadd.f32 %v46_v4, %v45_v3 }
  0x19   :  { %v48_v6 = vrot.slane %v47_v5, 1 }
  0x1b   :  { %v49_v7 = vadd.f32 %v48_v6, %v47_v5 }
  0x1d   :  { %v51_v8 = vmul.f32 0.5, %v49_v7 }
  0x1f   :  { %v66_v13 = vmul.f32 %v65_v9, %v51_v8  ;;  %v52_v19 = vsub.f32 %v30_v0, %v51_v8 }
  0x21   :  { %v53_v20 = vmul.f32 %v52_v19, %v52_v19 }
  0x23   :  { %v54_v21 = vsel %vm31_vm0, %v53_v20, 0.0 }
  0x24   :  { %v55_v22 = vrot.slane %v54_v21, 4 }
  0x26   :  { %v56_v23 = vadd.f32 %v55_v22, %v54_v21 }
  0x28   :  { %v57_v24 = vrot.slane %v56_v23, 2 }
  0x2a   :  { %v58_v25 = vadd.f32 %v57_v24, %v56_v23 }
  0x2c   :  { %v59_v26 = vrot.slane %v58_v25, 1 }
  0x2e   :  { %v60_v27 = vadd.f32 %v59_v26, %v58_v25 }
  0x30   :  { %v73_v32 = vmul.f32 %v72_v28, %v60_v27 }
  0x9e   :  { %v34_v11 = vpop.xlane.xlu0 %33 }
  0x9f   :  { %v36_v12 = vmul.f32 0.125, %v34_v11 }
  0xa1   :  { %v37_v14 = vsub.f32 %v30_v0, %v36_v12  ;;  %v63_v15 = vmul.f32 %v62_v10, %v36_v12 }
  0xa3   :  { %v67_v16 = vadd.f32 %v66_v13, %v63_v15  ;;  %v38_v17 = vmul.f32 %v37_v14, %v37_v14 }
  0xa5   :  { %v39_v18 = vsel %vm31_vm0, %v38_v17, 0.0  ;;  %v75_v36 = vsub.f32 %v30_v0, %v67_v16 }
  0xa6   :  { %40 = vadd.xlane.f32.xlu0 %v39_v18 }
 0x133   :  { %v41_v30 = vpop.xlane.xlu0 %40 }
 0x134   :  { %v43_v31 = vmul.f32 0.14285715, %v41_v30 }
 0x136   :  { %v70_v33 = vmul.f32 %v69_v29, %v43_v31 }
 0x138   :  { %v74_v34 = vadd.f32 %v73_v32, %v70_v33 }
 0x13a   :  { %v76_v35 = vadd.f32 1e-05, %v74_v34 }
 0x13c   :  { %107 = vrsqrt.f32 %v76_v35 }
 0x146   :  { %v108_v37 = vpop.eup %107 }
 0x147   :  { %v78_v39 = vmul.f32 %v108_v37, %v75_v36 }
 0x149   :  { %v86_v41 = vmul.f32 %v104_v38, %v78_v39 }
 0x14b   :  { %v94_v42 = vadd.f32 %v105_v40, %v86_v41 }
 0x14d   :  { %95 = vst.msk [vmem:[%s172_s4] sm:$0x3] %vm31_vm0, %v94_v42 }
 0x14e   :  { %100 = vsyncpa [#allocation3], 1 }

// kernel: cross_transformer_forward.10
= control target key start
LH: loop header
LB: loop body
LE: loop exit
PB: predicated region body
PF: predicated region fallthrough
CT: control target
= control target key end

     0   :  { %9 = vsyncpa [#allocation3], 0  ;;  %s1038_s0 = inlined_call_operand.vmem [shape: f32[2,256], index: 0, kind: input, shape index: {}]   ;;  %s1039_s1 = inlined_call_operand.vmem [shape: f32[2,8], index: 1, kind: input, shape index: {}]   ;;  %s1040_s2 = inlined_call_operand.hbm [shape: bf16[256,1024], index: 2, kind: input, shape index: {}]   ;;  %s1041_s3 = inlined_call_operand.vmem [shape: bf16[8,1024], index: 3, kind: input, shape index: {}]   ;;  %s1042_s4 = inlined_call_operand.vmem [shape: f32[2,1024], index: 4, kind: output, shape index: {}]  }
   0x1   :  { %11 = vsyncpa [#allocation3 + $0x1], 0  ;;  %s886_s15 = smov 0   ;;  %s888_s16 = smov 0  }
   0x2   :  { %s890_s17 = smov 0   ;;  %s892_s18 = smov 0  }
   0x3 LB: > { %s641_s19 = sadd.s32 4294967295, %s854_s18   ;;  %s906_s20 = sadd.s32 1, %s854_s18   ;;  %s854_s18 = sphi %s892_s18, %s1048_s18   ;;  %s850_s17 = sphi %s890_s17, %s1047_s17   ;;  %s846_s16 = sphi %s888_s16, %s1046_s16   ;;  %s842_s15 = sphi %s886_s15, %s1045_s15  }
   0x4   : > { %s63_s21 = ssub.s32 %s854_s18, %s906_s20  ;;  %s66_s22 = sadd.s32 1, %s850_s17 }
   0x5   : > { %p64_p0 = scmp.eq.s32.totalorder %s63_s21, 0  ;;  %p73_p1 = scmp.ne.s32.totalorder %s850_s17, %s846_s16 }
   0x6   : > { %p74_p2 = scmp.eq.s32.totalorder %s854_s18, 0  ;;  %p79_p3 = scmp.ne.s32.totalorder %s846_s16, %s842_s15 }
   0x7   : > { %s916_s23 = scalar_select %p64_p0, %s850_s17, %s66_s22  }
   0x8   : > { %p75_p4 = por %p74_p2, %p73_p1  ;;  %p80_p5 = scmp.eq.s32.totalorder %s641_s19, 0 }
   0x9   : > { %p703_p6 = scmp.lt.s32.totalorder %s854_s18, 4  ;;  %s161_s25 = sand.u32 1, %s850_s17  }
   0xa   : > { %p921_p7 = por %p80_p5, %p79_p3  ;;  %s645_s26 = sshll.u32 %s161_s25, 8 }
   0xb   : > { %s694_s27 = sshll.u32 %s854_s18, 7  ;;  %s165_s5 = scalar_lea.vmem [#allocation2], %s645_s26 }
   0xc   : > { %s930_s30 = scalar_lea.hbm %s1040_s2, %s694_s27  ;;  %s172_s6 = sshll.u32 %s165_s5, 4  ;;  %s932_s6 = int_to_ptr.vmem [resolvable:$true] %s172_s6 }
   0xd   : > { %p934_p8 = pnand %p703_p6, %p75_p4  ;;  %s938_s8 = scalar_lea.sflag [#allocation3], %s161_s25 }
   0xe   : > { %s790_s9 = scalar_lea.hbm %s930_s30, 4096  ;;  %s795_s12 = scalar_lea.hbm %s1040_s2, 16384 }
   0xf   : > { %p791_p9 = scmp.ne.s32.totalorder %s930_s30, %s790_s9  ;;  %p792_p10 = pneg %p934_p8 }
  0x10   : > { %p796_p13 = scmp.lt.u32.totalorder %s930_s30, %s1040_s2  ;;  %p797_p0 = scmp.lt.u32.totalorder %s795_s12, %s790_s9 }
  0x11   : > { %p793_p11 = pnand %p792_p10, %p791_p9  ;;  %p799_p2 = scmp.lt.u32.totalorder %s790_s9, %s930_s30 }
  0x12   : > { %p798_p1 = por %p797_p0, %p796_p13 }
  0x13   : > { %p794_p12 = pneg %p793_p11 }
  0x14   : > { %p800_p3 = por %p799_p2, %p798_p1 }
  0x16   : > { %p801_p4 = pnand %p800_p3, %p794_p12 }
  0x18   : > { %804 = shalt.err (!%p801_p4)
}
  0x19   : > { %s805_s15 = scalar_lea.vmem %s932_s6, 4096  ;;  %s856_s21 = smov [#allocation2]  }
  0x1a   : > { %p806_p5 = scmp.ne.s32.totalorder %s932_s6, %s805_s15  ;;  %s810_s22 = sshll.u32 %s856_s21, 4  ;;  %s811_s22 = int_to_ptr.vmem [resolvable:$false] %s810_s22 }
  0x1b   : > { %s812_s25 = scalar_lea.vmem %s811_s22, 8192  ;;  %p813_p11 = scmp.lt.s32.totalorder %s932_s6, %s811_s22 }
  0x1c   : > { %p808_p6 = pnand %p806_p5, %p792_p10  ;;  %p814_p13 = scmp.lt.s32.totalorder %s812_s25, %s805_s15 }
  0x1e   : > { %p809_p9 = pneg %p808_p6  ;;  %p815_p0 = por %p814_p13, %p813_p11 }
  0x20   : > { %p816_p1 = pnand %p815_p0, %p809_p9 }
  0x22   : > { %819 = shalt.err (!%p816_p1)
}
  0x23   : > { %s857_s26 = smov 512   ;;  %s858_s27 = smov 128  }
  0x24   : > { %s859_s28 = smov 8   ;;  %p648_p10 = scmp.ge.s32.totalorder %s854_s18, 1 }
  0x25   : > { %702 = dma.hbm_to_vmem [thread:$0]  (!%p934_p8), %s930_s30, 4096, %s932_s6, %s938_s8, %s857_s26, %s858_s27, %s859_s28  }
  0x26   : > { %p189_p12 = scmp.lt.s32.totalorder %s854_s18, 5 }
  0x28   : > { %p190_p2 = pnand %p648_p10, %p189_p12 }
  0x29   : > { %s195_s29 = sand.u32 (!%p190_p2), 1, %s846_s16  }
  0x2a   : > { %193 = sbr.rel (%p190_p2) target bundleno = 333 (0x14d), region = 36  ;;  %s649_s5 = sshll.u32 (!%p190_p2), %s195_s29, 8 }
  0x2b   : > { %s196_s9 = scalar_lea.sflag (!%p190_p2), [#allocation3], %s195_s29  ;;  %s969_s10 = scalar_lea.vmem (!%p190_p2), [#allocation2], %s649_s5 }
  0x31   : > { %837 = dma.done.wait (%p921_p7), %s196_s9, 4096  }
  0x32   : > { %839 = vsyncadd (%p921_p7), %s196_s9, 4294963200  ;;  %v860_v0 = vmov 0   ;;  %v740_v1 = vld [vmem:[%s969_s10 + $0x4] ss:$8 sps:$4 sm:$0xff]   ;;  %v742_v2 = vld [vmem:[%s969_s10] ss:$8 sps:$4 sm:$0xff]  }
  0x33   : > { %340 = vmatprep.mubr.bf16.mxu1 %v860_v0  ;;  %509 = vmatprep.subr.bf16.mxu0 %v740_v1  ;;  %v743_v3 = vld [vmem:[%s969_s10 + $0x14] ss:$8 sps:$4 sm:$0xff]   ;;  %s650_s30 = sshll.u32 %s641_s19, 1  ;;  %v745_v4 = vld [vmem:[%s969_s10 + $0x10] ss:$8 sps:$4 sm:$0xff]   ;;  %vm301_vm0 = vcmask 1043456  }
  0x34   : > { %510 = vmatpush1.bf16.msra.mxu0 %v742_v2  ;;  %v746_v5 = vld [vmem:[%s969_s10 + $0x24] ss:$8 sps:$4 sm:$0xff]   ;;  %p231_p7 = scmp.lt.s32.totalorder %s650_s30, 7  ;;  %v748_v6 = vld [vmem:[%s969_s10 + $0x20] ss:$8 sps:$4 sm:$0xff]   ;;  %vm297_vm1 = vcmask 64512  }
  0x35   : > { %511 = vmatprep.subr.bf16.mxu0 %v743_v3  ;;  %v749_v7 = vld [vmem:[%s969_s10 + $0x34] ss:$8 sps:$4 sm:$0xff]   ;;  %v751_v8 = vld [vmem:[%s969_s10 + $0x30] ss:$8 sps:$4 sm:$0xff]   ;;  %v752_v9 = vld [vmem:[%s969_s10 + $0x44] ss:$8 sps:$4 sm:$0xff]  }
  0x36   : > { %s1050_s30 = smov (!%p231_p7, %s650_s30), 7  ;;  %v754_v10 = vld [vmem:[%s969_s10 + $0x40] ss:$8 sps:$4 sm:$0xff]   ;;  %v755_v11 = vld [vmem:[%s969_s10 + $0x54] ss:$8 sps:$4 sm:$0xff]  }
  0x37   : > { %s651_s18 = sshll.u32 %s1050_s30, 2  ;;  %v757_v12 = vld [vmem:[%s969_s10 + $0x50] ss:$8 sps:$4 sm:$0xff]   ;;  %v758_v14 = vld [vmem:[%s969_s10 + $0x64] ss:$8 sps:$4 sm:$0xff]   ;;  %s653_s13 = sshll.u32 %s1050_s30, 1 }
  0x38   : > { %512 = vmatpush1.bf16.msra.mxu0 %v745_v4  ;;  %s234_s6 = scalar_lea.vmem %s1041_s3, %s651_s18  ;;  %v289_v17 = vld [vmem:[%s1039_s1] sm:$0x3]  ;;  %v761_v23 = vld [vmem:[%s969_s10 + $0x74] ss:$8 sps:$4 sm:$0xff]   ;;  %v763_v25 = vld [vmem:[%s969_s10 + $0x70] ss:$8 sps:$4 sm:$0xff]   ;;  %s240_s21 = scalar_lea.vmem %s1042_s4, %s653_s13 }
  0x39   : > { %513 = vmatprep.subr.bf16.mxu0 %v746_v5  ;;  %v291_v13 = vld [vmem:[%s234_s6] sm:$0xff]  ;;  %v290_v19 = vpack.c.bf16 %v289_v17, %v289_v17  ;;  %v767_v28 = vld [vmem:[%s969_s10 + $0x94] ss:$8 sps:$4 sm:$0xff]   ;;  %v769_v29 = vld [vmem:[%s969_s10 + $0x90] ss:$8 sps:$4 sm:$0xff]  }
  0x3a   : > { %v656_v15 = vcombine.high %v291_v13, %v291_v13  ;;  %v655_v16 = vcombine.low %v291_v13, %v291_v13  ;;  %v654_v20 = vld.sshfl [vmem:[%s1038_s0] sm:$0x33 pattern:$0x76325410]  ;;  %v764_v26 = vld [vmem:[%s969_s10 + $0x84] ss:$8 sps:$4 sm:$0xff]  }
  0x3b   : > { %v760_v21 = vld [vmem:[%s969_s10 + $0x60] ss:$8 sps:$4 sm:$0xff]   ;;  %v252_v22 = vcombine.high %v654_v20, %v654_v20  ;;  %v770_v30 = vld [vmem:[%s969_s10 + $0xa4] ss:$8 sps:$4 sm:$0xff]   ;;  %v773_v32 = vld [vmem:[%s969_s10 + $0xb4] ss:$8 sps:$4 sm:$0xff]   ;;  %v255_v42 = vpack.c.bf16 %v654_v20, %v654_v20 }
  0x3c   : > { %514 = vmatpush1.bf16.msra.mxu0 %v748_v6  ;;  %657 = vmatprep.subr.msk.bf16.mxu1 %vm301_vm0, %v656_v15  ;;  %v303_v18 = vsel %vm301_vm0, %v655_v16, 0  ;;  %v766_v27 = vld [vmem:[%s969_s10 + $0x80] ss:$8 sps:$4 sm:$0xff]   ;;  %v775_v33 = vld [vmem:[%s969_s10 + $0xb0] ss:$8 sps:$4 sm:$0xff]  }
  0x3d   : > { %515 = vmatprep.subr.bf16.mxu0 %v749_v7  ;;  %309 = vmatpush1.bf16.msra.mxu1 %v303_v18  ;;  %v256_v24 = vpack.c.bf16 %v252_v22, %v252_v22  ;;  %v772_v31 = vld [vmem:[%s969_s10 + $0xa0] ss:$8 sps:$4 sm:$0xff]   ;;  %v776_v34 = vld [vmem:[%s969_s10 + $0xc4] ss:$8 sps:$4 sm:$0xff]   ;;  %v779_v36 = vld [vmem:[%s969_s10 + $0xd4] ss:$8 sps:$4 sm:$0xff]  }
  0x3e   : > { %v778_v35 = vld [vmem:[%s969_s10 + $0xc0] ss:$8 sps:$4 sm:$0xff]   ;;  %v781_v37 = vld [vmem:[%s969_s10 + $0xd0] ss:$8 sps:$4 sm:$0xff]   ;;  %v782_v38 = vld [vmem:[%s969_s10 + $0xe4] ss:$8 sps:$4 sm:$0xff]  }
  0x3f   : > { %541 = vmatprep.mubr.bf16.mxu0 %v256_v24  ;;  %v785_v39 = vld [vmem:[%s969_s10 + $0xe0] ss:$8 sps:$4 sm:$0xff]   ;;  %v787_v40 = vld [vmem:[%s969_s10 + $0xf4] ss:$8 sps:$4 sm:$0xff]   ;;  %v789_v41 = vld [vmem:[%s969_s10 + $0xf0] ss:$8 sps:$4 sm:$0xff]  }
  0x40   : > { %516 = vmatpush1.bf16.msra.mxu0 %v751_v8  ;;  %658 = vmatmul.mubr.msk.bf16.vlgmr.msra.gmra.mrb[0].mxu1 %vm297_vm1, %v290_v19 }
  0x41   : > { %517 = vmatprep.subr.bf16.mxu0 %v752_v9 }
  0x44   : > { %518 = vmatpush1.bf16.msra.mxu0 %v754_v10 }
  0x45   : > { %519 = vmatprep.subr.bf16.mxu0 %v755_v11 }
  0x48   : > { %520 = vmatpush1.bf16.msra.mxu0 %v757_v12 }
  0x49   : > { %521 = vmatprep.subr.bf16.mxu0 %v758_v14 }
  0x4c   : > { %522 = vmatpush1.bf16.msra.mxu0 %v760_v21 }
  0x4d   : > { %523 = vmatprep.subr.bf16.mxu0 %v761_v23 }
  0x50   : > { %524 = vmatpush1.bf16.msra.mxu0 %v763_v25 }
  0x51   : > { %525 = vmatprep.subr.bf16.mxu0 %v764_v26 }
  0x54   : > { %526 = vmatpush1.bf16.msra.mxu0 %v766_v27 }
  0x55   : > { %527 = vmatprep.subr.bf16.mxu0 %v767_v28 }
  0x58   : > { %528 = vmatpush1.bf16.msra.mxu0 %v769_v29 }
  0x59   : > { %529 = vmatprep.subr.bf16.mxu0 %v770_v30 }
  0x5c   : > { %530 = vmatpush1.bf16.msra.mxu0 %v772_v31 }
  0x5d   : > { %531 = vmatprep.subr.bf16.mxu0 %v773_v32 }
  0x60   : > { %532 = vmatpush1.bf16.msra.mxu0 %v775_v33 }
  0x61   : > { %533 = vmatprep.subr.bf16.mxu0 %v776_v34 }
  0x64   : > { %534 = vmatpush1.bf16.msra.mxu0 %v778_v35 }
  0x65   : > { %535 = vmatprep.subr.bf16.mxu0 %v779_v36 }
  0x68   : > { %536 = vmatpush1.bf16.msra.mxu0 %v781_v37 }
  0x69   : > { %537 = vmatprep.subr.bf16.mxu0 %v782_v38 }
  0x6c   : > { %538 = vmatpush1.bf16.msra.mxu0 %v785_v39 }
  0x6d   : > { %539 = vmatprep.subr.bf16.mxu0 %v787_v40 }
  0x70   : > { %540 = vmatpush1.bf16.msra.mxu0 %v789_v41 }
  0x73   : > { %542 = vmatmul.mubr.bf16.vlgmr.msra.gmra.mrb[0].mxu0 %v255_v42 }
 0x113   : > { %v342_v43 = vpop.f32.mrb[0].mxu1 }
 0x114   : > { %v344_v44 = vpop.f32.mrb[1].mxu1 }
 0x115   : > { %v346_v45 = vpop.f32.mrb[2].mxu1 }
 0x116   : > { %v347_v46 = vpop.f32.mrb[3].mxu1 }
 0x146   : > { %v543_v47 = vpop.f32.mrb[0].mxu0 }
 0x147   : > { %v544_v48 = vadd.f32 %v543_v47, %v342_v43  ;;  %v545_v49 = vpop.f32.mrb[1].mxu0 }
 0x148   : > { %v546_v50 = vadd.f32 %v545_v49, %v344_v44  ;;  %v547_v51 = vpop.f32.mrb[2].mxu0 }
 0x149   : > { %v548_v52 = vpop.f32.mrb[3].mxu0 }
 0x14a   : > { %v552_v53 = vcombine.low %v544_v48, %v546_v50 }
 0x14c   : > { %691 = vst.sshfl [vmem:[%s240_s21] sm:$0x33 pattern:$0x76325410] %v552_v53 }
 0x14d PF: > { %p14_p8 = scmp.ge.s32.totalorder %s906_s20, 6   ;;  %s1045_s15 = smov %s846_s16 }
 0x14e   : > { %s1046_s16 = smov %s850_s17  ;;  %s1047_s17 = smov %s916_s23 }
 0x14f   : > { %s1048_s18 = smov %s906_s20  ;;  %16 = sbr.rel (!%p14_p8) target bundleno = 3 (0x3), region = 79 }
 0x156   :  { %584 = vsyncpa [#allocation3], 1 }
 0x157   :  { %586 = vsyncpa [#allocation3 + $0x1], 1 }

// kernel: cross_transformer_forward.12
= control target key start
LH: loop header
LB: loop body
LE: loop exit
PB: predicated region body
PF: predicated region fallthrough
CT: control target
= control target key end

     0   :  { %v65_v36 = vlaneseq  ;;  %s522_s1 = inlined_call_operand.vmem [shape: bf16[256,256], index: 1, kind: input, shape index: {}]   ;;  %s523_s0 = inlined_call_operand.vmem [shape: f32[2,256], index: 0, kind: input, shape index: {}]   ;;  %s524_s2 = inlined_call_operand.vmem [shape: f32[1,256], index: 2, kind: input, shape index: {}]   ;;  %s525_s3 = inlined_call_operand.vmem [shape: f32[2,256], index: 3, kind: input, shape index: {}]   ;;  %s526_s4 = inlined_call_operand.vmem [shape: f32[2,256], index: 4, kind: output, shape index: {}]  }
   0x1   :  { %v341_v0 = vld [vmem:[%s522_s1 + $0x4] ss:$8 sps:$4 sm:$0xff]   ;;  %v343_v1 = vld [vmem:[%s522_s1] ss:$8 sps:$4 sm:$0xff]   ;;  %v344_v2 = vld [vmem:[%s522_s1 + $0x14] ss:$8 sps:$4 sm:$0xff]  }
   0x2   :  { %235 = vmatprep.subr.bf16.mxu0 %v341_v0  ;;  %v346_v3 = vld [vmem:[%s522_s1 + $0x10] ss:$8 sps:$4 sm:$0xff]   ;;  %v347_v4 = vld [vmem:[%s522_s1 + $0x24] ss:$8 sps:$4 sm:$0xff]   ;;  %v349_v5 = vld [vmem:[%s522_s1 + $0x20] ss:$8 sps:$4 sm:$0xff]  }
   0x3   :  { %236 = vmatpush1.bf16.msra.mxu0 %v343_v1  ;;  %v350_v6 = vld [vmem:[%s522_s1 + $0x34] ss:$8 sps:$4 sm:$0xff]   ;;  %v352_v7 = vld [vmem:[%s522_s1 + $0x30] ss:$8 sps:$4 sm:$0xff]   ;;  %v353_v8 = vld [vmem:[%s522_s1 + $0x44] ss:$8 sps:$4 sm:$0xff]  }
   0x4   :  { %237 = vmatprep.subr.bf16.mxu0 %v344_v2  ;;  %v355_v9 = vld [vmem:[%s522_s1 + $0x40] ss:$8 sps:$4 sm:$0xff]   ;;  %v356_v10 = vld [vmem:[%s522_s1 + $0x54] ss:$8 sps:$4 sm:$0xff]   ;;  %v358_v11 = vld [vmem:[%s522_s1 + $0x50] ss:$8 sps:$4 sm:$0xff]  }
   0x5   :  { %v359_v12 = vld [vmem:[%s522_s1 + $0x64] ss:$8 sps:$4 sm:$0xff]   ;;  %v306_v13 = vld.sshfl [vmem:[%s523_s0] sm:$0x33 pattern:$0x76325410] }
   0x6   :  { %v26_v14 = vcombine.high %v306_v13, %v306_v13  ;;  %v361_v15 = vld [vmem:[%s522_s1 + $0x60] ss:$8 sps:$4 sm:$0xff]   ;;  %v362_v16 = vld [vmem:[%s522_s1 + $0x74] ss:$8 sps:$4 sm:$0xff]   ;;  %v364_v18 = vld [vmem:[%s522_s1 + $0x70] ss:$8 sps:$4 sm:$0xff]   ;;  %v29_v35 = vpack.c.bf16 %v306_v13, %v306_v13 }
   0x7   :  { %238 = vmatpush1.bf16.msra.mxu0 %v346_v3  ;;  %v365_v19 = vld [vmem:[%s522_s1 + $0x84] ss:$8 sps:$4 sm:$0xff]   ;;  %v367_v20 = vld [vmem:[%s522_s1 + $0x80] ss:$8 sps:$4 sm:$0xff]   ;;  %v368_v21 = vld [vmem:[%s522_s1 + $0x94] ss:$8 sps:$4 sm:$0xff]  }
   0x8   :  { %239 = vmatprep.subr.bf16.mxu0 %v347_v4  ;;  %v30_v17 = vpack.c.bf16 %v26_v14, %v26_v14  ;;  %v370_v22 = vld [vmem:[%s522_s1 + $0x90] ss:$8 sps:$4 sm:$0xff]   ;;  %v371_v23 = vld [vmem:[%s522_s1 + $0xa4] ss:$8 sps:$4 sm:$0xff]   ;;  %v373_v24 = vld [vmem:[%s522_s1 + $0xa0] ss:$8 sps:$4 sm:$0xff]  }
   0x9   :  { %v374_v25 = vld [vmem:[%s522_s1 + $0xb4] ss:$8 sps:$4 sm:$0xff]   ;;  %v376_v26 = vld [vmem:[%s522_s1 + $0xb0] ss:$8 sps:$4 sm:$0xff]   ;;  %v377_v27 = vld [vmem:[%s522_s1 + $0xc4] ss:$8 sps:$4 sm:$0xff]  }
   0xa   :  { %267 = vmatprep.mubr.bf16.mxu0 %v30_v17  ;;  %v379_v28 = vld [vmem:[%s522_s1 + $0xc0] ss:$8 sps:$4 sm:$0xff]   ;;  %v380_v29 = vld [vmem:[%s522_s1 + $0xd4] ss:$8 sps:$4 sm:$0xff]   ;;  %v382_v30 = vld [vmem:[%s522_s1 + $0xd0] ss:$8 sps:$4 sm:$0xff]  }
   0xb   :  { %240 = vmatpush1.bf16.msra.mxu0 %v349_v5  ;;  %v383_v31 = vld [vmem:[%s522_s1 + $0xe4] ss:$8 sps:$4 sm:$0xff]   ;;  %v385_v32 = vld [vmem:[%s522_s1 + $0xe0] ss:$8 sps:$4 sm:$0xff]   ;;  %v386_v33 = vld [vmem:[%s522_s1 + $0xf4] ss:$8 sps:$4 sm:$0xff]  }
   0xc   :  { %241 = vmatprep.subr.bf16.mxu0 %v350_v6  ;;  %v388_v34 = vld [vmem:[%s522_s1 + $0xf0] ss:$8 sps:$4 sm:$0xff]   ;;  %v66_v37 = vshrl.u32 %v65_v36, 7  ;;  %v63_v39 = vld [vmem:[%s524_s2] sm:$0x3] }
   0xd   :  { %v339_v42 = vld.sshfl [vmem:[%s525_s3] sm:$0x33 pattern:$0x76325410] }
   0xe   :  { %v67_v38 = vsub.s32 0, %v66_v37  ;;  %v71_v40 = vsub.s32 1, %v66_v37  ;;  %v285_v45 = vcombine.high %v339_v42, %v339_v42 }
   0xf   :  { %242 = vmatpush1.bf16.msra.mxu0 %v352_v7 }
  0x10   :  { %243 = vmatprep.subr.bf16.mxu0 %v353_v8  ;;  %v68_v41 = vrot.slane %v63_v39, %v67_v38  ;;  %v72_v43 = vrot.slane %v63_v39, %v71_v40 }
  0x13   :  { %244 = vmatpush1.bf16.msra.mxu0 %v355_v9 }
  0x14   :  { %245 = vmatprep.subr.bf16.mxu0 %v356_v10 }
  0x17   :  { %246 = vmatpush1.bf16.msra.mxu0 %v358_v11 }
  0x18   :  { %247 = vmatprep.subr.bf16.mxu0 %v359_v12 }
  0x1b   :  { %248 = vmatpush1.bf16.msra.mxu0 %v361_v15 }
  0x1c   :  { %249 = vmatprep.subr.bf16.mxu0 %v362_v16 }
  0x1f   :  { %250 = vmatpush1.bf16.msra.mxu0 %v364_v18 }
  0x20   :  { %251 = vmatprep.subr.bf16.mxu0 %v365_v19 }
  0x23   :  { %252 = vmatpush1.bf16.msra.mxu0 %v367_v20 }
  0x24   :  { %253 = vmatprep.subr.bf16.mxu0 %v368_v21 }
  0x27   :  { %254 = vmatpush1.bf16.msra.mxu0 %v370_v22 }
  0x28   :  { %255 = vmatprep.subr.bf16.mxu0 %v371_v23 }
  0x2b   :  { %256 = vmatpush1.bf16.msra.mxu0 %v373_v24 }
  0x2c   :  { %257 = vmatprep.subr.bf16.mxu0 %v374_v25 }
  0x2f   :  { %258 = vmatpush1.bf16.msra.mxu0 %v376_v26 }
  0x30   :  { %259 = vmatprep.subr.bf16.mxu0 %v377_v27 }
  0x33   :  { %260 = vmatpush1.bf16.msra.mxu0 %v379_v28 }
  0x34   :  { %261 = vmatprep.subr.bf16.mxu0 %v380_v29 }
  0x37   :  { %262 = vmatpush1.bf16.msra.mxu0 %v382_v30 }
  0x38   :  { %263 = vmatprep.subr.bf16.mxu0 %v383_v31 }
  0x3b   :  { %264 = vmatpush1.bf16.msra.mxu0 %v385_v32 }
  0x3c   :  { %265 = vmatprep.subr.bf16.mxu0 %v386_v33 }
  0x3f   :  { %266 = vmatpush1.bf16.msra.mxu0 %v388_v34 }
  0x42   :  { %268 = vmatmul.mubr.bf16.vlgmr.msra.gmra.mrb[0].mxu0 %v29_v35 }
 0x115   :  { %v269_v44 = vpop.f32.mrb[0].mxu0 }
 0x116   :  { %v270_v46 = vadd.f32 %v269_v44, %v68_v41  ;;  %v271_v47 = vpop.f32.mrb[1].mxu0 }
 0x117   :  { %v272_v48 = vadd.f32 %v271_v47, %v72_v43  ;;  %v273_v49 = vpop.f32.mrb[2].mxu0 }
 0x118   :  { %v288_v50 = vadd.f32 %v339_v42, %v270_v46  ;;  %v274_v51 = vpop.f32.mrb[3].mxu0 }
 0x119   :  { %v289_v52 = vadd.f32 %v285_v45, %v272_v48 }
 0x11b   :  { %v292_v53 = vcombine.low %v288_v50, %v289_v52 }
 0x11d   :  { %340 = vst.sshfl [vmem:[%s526_s4] sm:$0x33 pattern:$0x76325410] %v292_v53 }

// kernel: cross_transformer_forward.14
= control target key start
LH: loop header
LB: loop body
LE: loop exit
PB: predicated region body
PF: predicated region fallthrough
CT: control target
= control target key end

     0   :  { %v62_v36 = vlaneseq  ;;  %s558_s1 = inlined_call_operand.vmem [shape: bf16[256,256], index: 1, kind: input, shape index: {}]   ;;  %s559_s0 = inlined_call_operand.vmem [shape: f32[2,256], index: 0, kind: input, shape index: {}]   ;;  %s560_s2 = inlined_call_operand.vmem [shape: f32[1,256], index: 2, kind: input, shape index: {}]   ;;  %s561_s3 = inlined_call_operand.vmem [shape: f32[2,256], index: 3, kind: output, shape index: {}]  }
   0x1   :  { %v377_v0 = vld [vmem:[%s558_s1 + $0x4] ss:$8 sps:$4 sm:$0xff]   ;;  %v379_v1 = vld [vmem:[%s558_s1] ss:$8 sps:$4 sm:$0xff]   ;;  %v380_v2 = vld [vmem:[%s558_s1 + $0x14] ss:$8 sps:$4 sm:$0xff]  }
   0x2   :  { %232 = vmatprep.subr.bf16.mxu0 %v377_v0  ;;  %v382_v3 = vld [vmem:[%s558_s1 + $0x10] ss:$8 sps:$4 sm:$0xff]   ;;  %v383_v4 = vld [vmem:[%s558_s1 + $0x24] ss:$8 sps:$4 sm:$0xff]   ;;  %v385_v5 = vld [vmem:[%s558_s1 + $0x20] ss:$8 sps:$4 sm:$0xff]  }
   0x3   :  { %233 = vmatpush1.bf16.msra.mxu0 %v379_v1  ;;  %v386_v6 = vld [vmem:[%s558_s1 + $0x34] ss:$8 sps:$4 sm:$0xff]   ;;  %v388_v7 = vld [vmem:[%s558_s1 + $0x30] ss:$8 sps:$4 sm:$0xff]   ;;  %v389_v8 = vld [vmem:[%s558_s1 + $0x44] ss:$8 sps:$4 sm:$0xff]  }
   0x4   :  { %234 = vmatprep.subr.bf16.mxu0 %v380_v2  ;;  %v391_v9 = vld [vmem:[%s558_s1 + $0x40] ss:$8 sps:$4 sm:$0xff]   ;;  %v392_v10 = vld [vmem:[%s558_s1 + $0x54] ss:$8 sps:$4 sm:$0xff]   ;;  %v394_v11 = vld [vmem:[%s558_s1 + $0x50] ss:$8 sps:$4 sm:$0xff]  }
   0x5   :  { %v395_v12 = vld [vmem:[%s558_s1 + $0x64] ss:$8 sps:$4 sm:$0xff]   ;;  %v343_v13 = vld.sshfl [vmem:[%s559_s0] sm:$0x33 pattern:$0x76325410] }
   0x6   :  { %v23_v14 = vcombine.high %v343_v13, %v343_v13  ;;  %v397_v15 = vld [vmem:[%s558_s1 + $0x60] ss:$8 sps:$4 sm:$0xff]   ;;  %v398_v16 = vld [vmem:[%s558_s1 + $0x74] ss:$8 sps:$4 sm:$0xff]   ;;  %v400_v18 = vld [vmem:[%s558_s1 + $0x70] ss:$8 sps:$4 sm:$0xff]   ;;  %v26_v35 = vpack.c.bf16 %v343_v13, %v343_v13 }
   0x7   :  { %235 = vmatpush1.bf16.msra.mxu0 %v382_v3  ;;  %v401_v19 = vld [vmem:[%s558_s1 + $0x84] ss:$8 sps:$4 sm:$0xff]   ;;  %v403_v20 = vld [vmem:[%s558_s1 + $0x80] ss:$8 sps:$4 sm:$0xff]   ;;  %v404_v21 = vld [vmem:[%s558_s1 + $0x94] ss:$8 sps:$4 sm:$0xff]  }
   0x8   :  { %236 = vmatprep.subr.bf16.mxu0 %v383_v4  ;;  %v27_v17 = vpack.c.bf16 %v23_v14, %v23_v14  ;;  %v406_v22 = vld [vmem:[%s558_s1 + $0x90] ss:$8 sps:$4 sm:$0xff]   ;;  %v407_v23 = vld [vmem:[%s558_s1 + $0xa4] ss:$8 sps:$4 sm:$0xff]   ;;  %v409_v24 = vld [vmem:[%s558_s1 + $0xa0] ss:$8 sps:$4 sm:$0xff]  }
   0x9   :  { %v410_v25 = vld [vmem:[%s558_s1 + $0xb4] ss:$8 sps:$4 sm:$0xff]   ;;  %v412_v26 = vld [vmem:[%s558_s1 + $0xb0] ss:$8 sps:$4 sm:$0xff]   ;;  %v413_v27 = vld [vmem:[%s558_s1 + $0xc4] ss:$8 sps:$4 sm:$0xff]  }
   0xa   :  { %264 = vmatprep.mubr.bf16.mxu0 %v27_v17  ;;  %v415_v28 = vld [vmem:[%s558_s1 + $0xc0] ss:$8 sps:$4 sm:$0xff]   ;;  %v416_v29 = vld [vmem:[%s558_s1 + $0xd4] ss:$8 sps:$4 sm:$0xff]   ;;  %v418_v30 = vld [vmem:[%s558_s1 + $0xd0] ss:$8 sps:$4 sm:$0xff]  }
   0xb   :  { %237 = vmatpush1.bf16.msra.mxu0 %v385_v5  ;;  %v419_v31 = vld [vmem:[%s558_s1 + $0xe4] ss:$8 sps:$4 sm:$0xff]   ;;  %v421_v32 = vld [vmem:[%s558_s1 + $0xe0] ss:$8 sps:$4 sm:$0xff]   ;;  %v422_v33 = vld [vmem:[%s558_s1 + $0xf4] ss:$8 sps:$4 sm:$0xff]  }
   0xc   :  { %238 = vmatprep.subr.bf16.mxu0 %v386_v6  ;;  %v424_v34 = vld [vmem:[%s558_s1 + $0xf0] ss:$8 sps:$4 sm:$0xff]   ;;  %v63_v37 = vshrl.u32 %v62_v36, 7  ;;  %v60_v39 = vld [vmem:[%s560_s2] sm:$0x3] }
   0xe   :  { %v64_v38 = vsub.s32 0, %v63_v37  ;;  %v68_v40 = vsub.s32 1, %v63_v37 }
   0xf   :  { %239 = vmatpush1.bf16.msra.mxu0 %v388_v7 }
  0x10   :  { %240 = vmatprep.subr.bf16.mxu0 %v389_v8  ;;  %v65_v41 = vrot.slane %v60_v39, %v64_v38  ;;  %v69_v42 = vrot.slane %v60_v39, %v68_v40 }
  0x13   :  { %241 = vmatpush1.bf16.msra.mxu0 %v391_v9 }
  0x14   :  { %242 = vmatprep.subr.bf16.mxu0 %v392_v10 }
  0x17   :  { %243 = vmatpush1.bf16.msra.mxu0 %v394_v11 }
  0x18   :  { %244 = vmatprep.subr.bf16.mxu0 %v395_v12 }
  0x1b   :  { %245 = vmatpush1.bf16.msra.mxu0 %v397_v15 }
  0x1c   :  { %246 = vmatprep.subr.bf16.mxu0 %v398_v16 }
  0x1f   :  { %247 = vmatpush1.bf16.msra.mxu0 %v400_v18 }
  0x20   :  { %248 = vmatprep.subr.bf16.mxu0 %v401_v19 }
  0x23   :  { %249 = vmatpush1.bf16.msra.mxu0 %v403_v20 }
  0x24   :  { %250 = vmatprep.subr.bf16.mxu0 %v404_v21 }
  0x27   :  { %251 = vmatpush1.bf16.msra.mxu0 %v406_v22 }
  0x28   :  { %252 = vmatprep.subr.bf16.mxu0 %v407_v23 }
  0x2b   :  { %253 = vmatpush1.bf16.msra.mxu0 %v409_v24 }
  0x2c   :  { %254 = vmatprep.subr.bf16.mxu0 %v410_v25 }
  0x2f   :  { %255 = vmatpush1.bf16.msra.mxu0 %v412_v26 }
  0x30   :  { %256 = vmatprep.subr.bf16.mxu0 %v413_v27 }
  0x33   :  { %257 = vmatpush1.bf16.msra.mxu0 %v415_v28 }
  0x34   :  { %258 = vmatprep.subr.bf16.mxu0 %v416_v29 }
  0x37   :  { %259 = vmatpush1.bf16.msra.mxu0 %v418_v30 }
  0x38   :  { %260 = vmatprep.subr.bf16.mxu0 %v419_v31 }
  0x3b   :  { %261 = vmatpush1.bf16.msra.mxu0 %v421_v32 }
  0x3c   :  { %262 = vmatprep.subr.bf16.mxu0 %v422_v33 }
  0x3f   :  { %263 = vmatpush1.bf16.msra.mxu0 %v424_v34 }
  0x42   :  { %265 = vmatmul.mubr.bf16.vlgmr.msra.gmra.mrb[0].mxu0 %v26_v35 }
 0x115   :  { %v266_v43 = vpop.f32.mrb[0].mxu0 }
 0x116   :  { %v267_v44 = vadd.f32 %v266_v43, %v65_v41  ;;  %v268_v45 = vpop.f32.mrb[1].mxu0 }
 0x117   :  { %v269_v46 = vadd.f32 %v268_v45, %v69_v42  ;;  %v270_v47 = vpop.f32.mrb[2].mxu0 }
 0x118   :  { %v275_v48 = vmul.f32 0.70710677, %v267_v44  ;;  %v271_v49 = vpop.f32.mrb[3].mxu0  ;;  %v273_v28 = vmul.f32 0.5, %v267_v44 }
 0x119   :  { %v276_v50 = vmul.f32 0.70710677, %v269_v46  ;;  %v274_v31 = vmul.f32 0.5, %v269_v46 }
 0x11a   :  { %v277_v51 = vand.u32 2147483647, %v275_v48  ;;  %vm317_vm0 = vcmp.lt.f32.partialorder %v275_v48, 0.0 }
 0x11b   :  { %v278_v52 = vand.u32 2147483647, %v276_v50  ;;  %vm318_vm1 = vcmp.lt.f32.partialorder %v276_v50, 0.0 }
 0x11c   :  { %v279_v53 = vmul.f32 0.3275911, %v277_v51  ;;  %v305_v57 = vsub.f32 0.0, %v277_v51 }
 0x11d   :  { %v280_v54 = vmul.f32 0.3275911, %v278_v52  ;;  %v306_v58 = vsub.f32 0.0, %v278_v52 }
 0x11e   :  { %v281_v55 = vadd.f32 1.0, %v279_v53  ;;  %v307_v60 = vmul.f32 %v305_v57, %v277_v51 }
 0x11f   :  { %v282_v56 = vadd.f32 1.0, %v280_v54  ;;  %v308_v63 = vmul.f32 %v306_v58, %v278_v52 }
 0x120   :  { %425 = vrcp.f32 %v281_v55  ;;  %v309_v2 = vmul.f32 1.442695, %v307_v60 }
 0x121   :  { %427 = vrcp.f32 %v282_v56  ;;  %v311_v5 = vmul.f32 1.442695, %v308_v63 }
 0x122   :  { %429 = vpow2.f32 %v309_v2 }
 0x123   :  { %431 = vpow2.f32 %v311_v5 }
 0x12a   :  { %v426_v59 = vpop.eup %425 }
 0x12b   :  { %v428_v61 = vpop.eup %427  ;;  %v287_v62 = vmul.f32 1.0614054, %v426_v59 }
 0x12c   :  { %v288_v0 = vmul.f32 1.0614054, %v428_v61  ;;  %v430_v18 = vpop.eup %429 }
 0x12d   :  { %v289_v1 = vadd.f32 -1.4531521, %v287_v62  ;;  %v432_v20 = vpop.eup %431 }
 0x12e   :  { %v290_v3 = vadd.f32 -1.4531521, %v288_v0 }
 0x12f   :  { %v291_v4 = vmul.f32 %v426_v59, %v289_v1 }
 0x130   :  { %v292_v6 = vmul.f32 %v428_v61, %v290_v3 }
 0x131   :  { %v293_v7 = vadd.f32 1.4214138, %v291_v4 }
 0x132   :  { %v294_v8 = vadd.f32 1.4214138, %v292_v6 }
 0x133   :  { %v295_v9 = vmul.f32 %v426_v59, %v293_v7 }
 0x134   :  { %v296_v10 = vmul.f32 %v428_v61, %v294_v8 }
 0x135   :  { %v297_v11 = vadd.f32 -0.28449672, %v295_v9 }
 0x136   :  { %v298_v12 = vadd.f32 -0.28449672, %v296_v10 }
 0x137   :  { %v299_v13 = vmul.f32 %v426_v59, %v297_v11 }
 0x138   :  { %v300_v14 = vmul.f32 %v428_v61, %v298_v12 }
 0x139   :  { %v301_v15 = vadd.f32 0.2548296, %v299_v13 }
 0x13a   :  { %v302_v16 = vadd.f32 0.2548296, %v300_v14 }
 0x13b   :  { %v303_v17 = vmul.f32 %v426_v59, %v301_v15 }
 0x13c   :  { %v304_v19 = vmul.f32 %v428_v61, %v302_v16 }
 0x13d   :  { %v313_v21 = vmul.f32 %v430_v18, %v303_v17 }
 0x13e   :  { %v314_v22 = vmul.f32 %v432_v20, %v304_v19 }
 0x13f   :  { %v315_v23 = vsub.f32 1.0, %v313_v21 }
 0x140   :  { %v316_v24 = vsub.f32 1.0, %v314_v22 }
 0x141   :  { %v319_v25 = vsub.f32 0.0, %v315_v23 }
 0x142   :  { %v320_v26 = vsub.f32 0.0, %v316_v24 }
 0x143   :  { %v321_v27 = vsel %vm317_vm0, %v319_v25, %v315_v23 }
 0x144   :  { %v323_v29 = vadd.f32 1.0, %v321_v27  ;;  %v322_v30 = vsel %vm318_vm1, %v320_v26, %v316_v24 }
 0x145   :  { %v324_v32 = vadd.f32 1.0, %v322_v30 }
 0x146   :  { %v325_v33 = vmul.f32 %v323_v29, %v273_v28 }
 0x147   :  { %v326_v34 = vmul.f32 %v324_v32, %v274_v31 }
 0x149   :  { %v329_v35 = vcombine.low %v325_v33, %v326_v34 }
 0x14b   :  { %376 = vst.sshfl [vmem:[%s561_s3] sm:$0x33 pattern:$0x76325410] %v329_v35 }

// kernel: cross_transformer_forward.15
= control target key start
LH: loop header
LB: loop body
LE: loop exit
PB: predicated region body
PF: predicated region fallthrough
CT: control target
= control target key end

     0   :  { %s568_s0 = inlined_call_operand.vmem [shape: f32[2,256], index: 0, kind: input, shape index: {}]   ;;  %s569_s1 = inlined_call_operand.vmem [shape: bf16[256,256], index: 1, kind: input, shape index: {}]   ;;  %s570_s2 = inlined_call_operand.vmem [shape: f32[1,256], index: 2, kind: input, shape index: {}]   ;;  %s571_s3 = inlined_call_operand.vmem [shape: f32[2,256], index: 3, kind: input, shape index: {}]   ;;  %s572_s4 = inlined_call_operand.hbm [shape: f32[2,256], index: 4, kind: output, shape index: {}]  }
   0x1   :  { %v353_v0 = vld [vmem:[%s569_s1 + $0x4] ss:$8 sps:$4 sm:$0xff]   ;;  %v355_v1 = vld [vmem:[%s569_s1] ss:$8 sps:$4 sm:$0xff]   ;;  %v356_v2 = vld [vmem:[%s569_s1 + $0x14] ss:$8 sps:$4 sm:$0xff]  }
   0x2   :  { %236 = vmatprep.subr.bf16.mxu0 %v353_v0  ;;  %v358_v3 = vld [vmem:[%s569_s1 + $0x10] ss:$8 sps:$4 sm:$0xff]   ;;  %v359_v4 = vld [vmem:[%s569_s1 + $0x24] ss:$8 sps:$4 sm:$0xff]   ;;  %v361_v5 = vld [vmem:[%s569_s1 + $0x20] ss:$8 sps:$4 sm:$0xff]  }
   0x3   :  { %237 = vmatpush1.bf16.msra.mxu0 %v355_v1  ;;  %v362_v6 = vld [vmem:[%s569_s1 + $0x34] ss:$8 sps:$4 sm:$0xff]   ;;  %v364_v7 = vld [vmem:[%s569_s1 + $0x30] ss:$8 sps:$4 sm:$0xff]   ;;  %v365_v8 = vld [vmem:[%s569_s1 + $0x44] ss:$8 sps:$4 sm:$0xff]  }
   0x4   :  { %238 = vmatprep.subr.bf16.mxu0 %v356_v2  ;;  %v367_v9 = vld [vmem:[%s569_s1 + $0x40] ss:$8 sps:$4 sm:$0xff]   ;;  %v368_v10 = vld [vmem:[%s569_s1 + $0x54] ss:$8 sps:$4 sm:$0xff]   ;;  %v370_v11 = vld [vmem:[%s569_s1 + $0x50] ss:$8 sps:$4 sm:$0xff]  }
   0x5   :  { %v371_v12 = vld [vmem:[%s569_s1 + $0x64] ss:$8 sps:$4 sm:$0xff]   ;;  %v317_v13 = vld.sshfl [vmem:[%s568_s0] sm:$0x33 pattern:$0x76325410] }
   0x6   :  { %v27_v14 = vcombine.high %v317_v13, %v317_v13 }
   0x7   :  { %239 = vmatpush1.bf16.msra.mxu0 %v358_v3 }
   0x8   :  { %240 = vmatprep.subr.bf16.mxu0 %v359_v4 }
   0xb   :  { %241 = vmatpush1.bf16.msra.mxu0 %v361_v5 }
   0xc   :  { %242 = vmatprep.subr.bf16.mxu0 %v362_v6 }
   0xf   :  { %243 = vmatpush1.bf16.msra.mxu0 %v364_v7 }
  0x10   :  { %244 = vmatprep.subr.bf16.mxu0 %v365_v8 }
  0x13   :  { %245 = vmatpush1.bf16.msra.mxu0 %v367_v9 }
  0x14   :  { %246 = vmatprep.subr.bf16.mxu0 %v368_v10 }
  0x15   :  { %9 = vsyncpa [#allocation3], 0  ;;  %v373_v15 = vld [vmem:[%s569_s1 + $0x60] ss:$8 sps:$4 sm:$0xff]   ;;  %v374_v16 = vld [vmem:[%s569_s1 + $0x74] ss:$8 sps:$4 sm:$0xff]   ;;  %v31_v17 = vpack.c.bf16 %v27_v14, %v27_v14  ;;  %v30_v35 = vpack.c.bf16 %v317_v13, %v317_v13  ;;  %v66_v36 = vlaneseq }
  0x16   :  { %v376_v18 = vld [vmem:[%s569_s1 + $0x70] ss:$8 sps:$4 sm:$0xff]   ;;  %v377_v19 = vld [vmem:[%s569_s1 + $0x84] ss:$8 sps:$4 sm:$0xff]   ;;  %v379_v20 = vld [vmem:[%s569_s1 + $0x80] ss:$8 sps:$4 sm:$0xff]  }
  0x17   :  { %247 = vmatpush1.bf16.msra.mxu0 %v370_v11  ;;  %268 = vmatprep.mubr.bf16.mxu0 %v31_v17  ;;  %v380_v21 = vld [vmem:[%s569_s1 + $0x94] ss:$8 sps:$4 sm:$0xff]   ;;  %v382_v22 = vld [vmem:[%s569_s1 + $0x90] ss:$8 sps:$4 sm:$0xff]   ;;  %v383_v23 = vld [vmem:[%s569_s1 + $0xa4] ss:$8 sps:$4 sm:$0xff]  }
  0x18   :  { %248 = vmatprep.subr.bf16.mxu0 %v371_v12  ;;  %v385_v24 = vld [vmem:[%s569_s1 + $0xa0] ss:$8 sps:$4 sm:$0xff]   ;;  %v386_v25 = vld [vmem:[%s569_s1 + $0xb4] ss:$8 sps:$4 sm:$0xff]   ;;  %v388_v26 = vld [vmem:[%s569_s1 + $0xb0] ss:$8 sps:$4 sm:$0xff]  }
  0x19   :  { %v389_v27 = vld [vmem:[%s569_s1 + $0xc4] ss:$8 sps:$4 sm:$0xff]   ;;  %v391_v28 = vld [vmem:[%s569_s1 + $0xc0] ss:$8 sps:$4 sm:$0xff]   ;;  %v392_v29 = vld [vmem:[%s569_s1 + $0xd4] ss:$8 sps:$4 sm:$0xff]  }
  0x1a   :  { %v394_v30 = vld [vmem:[%s569_s1 + $0xd0] ss:$8 sps:$4 sm:$0xff]   ;;  %v395_v31 = vld [vmem:[%s569_s1 + $0xe4] ss:$8 sps:$4 sm:$0xff]   ;;  %v397_v32 = vld [vmem:[%s569_s1 + $0xe0] ss:$8 sps:$4 sm:$0xff]  }
  0x1b   :  { %249 = vmatpush1.bf16.msra.mxu0 %v373_v15  ;;  %v398_v33 = vld [vmem:[%s569_s1 + $0xf4] ss:$8 sps:$4 sm:$0xff]   ;;  %v400_v34 = vld [vmem:[%s569_s1 + $0xf0] ss:$8 sps:$4 sm:$0xff]   ;;  %v67_v37 = vshrl.u32 %v66_v36, 7  ;;  %s425_s1 = smov [#allocation2]  }
  0x1c   :  { %250 = vmatprep.subr.bf16.mxu0 %v374_v16  ;;  %v64_v39 = vld [vmem:[%s570_s2] sm:$0x3]  ;;  %s309_s5 = sshll.u32 %s425_s1, 4  ;;  %s310_s5 = int_to_ptr.vmem [resolvable:$true] %s309_s5 }
  0x1d   :  { %v68_v38 = vsub.s32 0, %v67_v37  ;;  %v72_v40 = vsub.s32 1, %v67_v37  ;;  %v350_v42 = vld.sshfl [vmem:[%s571_s3] sm:$0x33 pattern:$0x76325410]  ;;  %p406_p1 = scmp.lt.s32.totalorder %s310_s5, %s310_s5 }
  0x1e   :  { %v286_v45 = vcombine.high %v350_v42, %v350_v42  ;;  %s401_s2 = scalar_lea.vmem %s310_s5, 64 }
  0x1f   :  { %251 = vmatpush1.bf16.msra.mxu0 %v376_v18  ;;  %v69_v41 = vrot.slane %v64_v39, %v68_v38  ;;  %v73_v43 = vrot.slane %v64_v39, %v72_v40  ;;  %p402_p0 = scmp.ne.s32.totalorder %s310_s5, %s401_s2  ;;  %p407_p2 = scmp.lt.s32.totalorder %s401_s2, %s401_s2 }
  0x20   :  { %252 = vmatprep.subr.bf16.mxu0 %v377_v19 }
  0x21   :  { %p408_p3 = por %p407_p2, %p406_p1 }
  0x23   :  { %253 = vmatpush1.bf16.msra.mxu0 %v379_v20  ;;  %p409_p4 = pnand %p408_p3, %p402_p0 }
  0x24   :  { %254 = vmatprep.subr.bf16.mxu0 %v380_v21 }
  0x27   :  { %255 = vmatpush1.bf16.msra.mxu0 %v382_v22 }
  0x28   :  { %256 = vmatprep.subr.bf16.mxu0 %v383_v23 }
  0x2b   :  { %257 = vmatpush1.bf16.msra.mxu0 %v385_v24 }
  0x2c   :  { %258 = vmatprep.subr.bf16.mxu0 %v386_v25 }
  0x2f   :  { %259 = vmatpush1.bf16.msra.mxu0 %v388_v26 }
  0x30   :  { %260 = vmatprep.subr.bf16.mxu0 %v389_v27 }
  0x33   :  { %261 = vmatpush1.bf16.msra.mxu0 %v391_v28 }
  0x34   :  { %262 = vmatprep.subr.bf16.mxu0 %v392_v29 }
  0x37   :  { %263 = vmatpush1.bf16.msra.mxu0 %v394_v30 }
  0x38   :  { %264 = vmatprep.subr.bf16.mxu0 %v395_v31 }
  0x3b   :  { %265 = vmatpush1.bf16.msra.mxu0 %v397_v32 }
  0x3c   :  { %266 = vmatprep.subr.bf16.mxu0 %v398_v33 }
  0x3f   :  { %267 = vmatpush1.bf16.msra.mxu0 %v400_v34 }
  0x42   :  { %269 = vmatmul.mubr.bf16.vlgmr.msra.gmra.mrb[0].mxu0 %v30_v35 }
 0x115   :  { %v270_v44 = vpop.f32.mrb[0].mxu0 }
 0x116   :  { %v271_v46 = vadd.f32 %v270_v44, %v69_v41  ;;  %v272_v47 = vpop.f32.mrb[1].mxu0 }
 0x117   :  { %v273_v48 = vadd.f32 %v272_v47, %v73_v43  ;;  %v274_v49 = vpop.f32.mrb[2].mxu0 }
 0x118   :  { %v289_v50 = vadd.f32 %v350_v42, %v271_v46  ;;  %v275_v51 = vpop.f32.mrb[3].mxu0 }
 0x119   :  { %v290_v52 = vadd.f32 %v286_v45, %v273_v48 }
 0x11b   :  { %v293_v53 = vcombine.low %v289_v50, %v290_v52 }
 0x11d   :  { %351 = vst.sshfl [vmem:[#allocation2] sm:$0x33 pattern:$0x76325410] %v293_v53 }
 0x11e   :  { %412 = shalt.err (!%p409_p4)
}
 0x11f   :  { %s413_s7 = scalar_lea.hbm %s572_s4, 64 }
 0x120   :  { %p414_p5 = scmp.ne.s32.totalorder %s572_s4, %s413_s7  ;;  %p417_p6 = scmp.lt.u32.totalorder %s413_s7, %s572_s4 }
 0x122   :  { %p419_p7 = pnand %p417_p6, %p414_p5 }
 0x124   :  { %422 = shalt.err (!%p419_p7)
}
 0x125   :  { %312 = dma.vmem_to_hbm [thread:$0]  %s310_s5, 64, %s572_s4, [#allocation3]  }
 0x126   :  { %423 = dma.done.wait [#allocation3], 64  }
 0x127   :  { %424 = vsyncadd [#allocation3], 4294967232 }
 0x128   :  { %316 = vsyncpa [#allocation3], 1 }

// kernel: cross_transformer_forward.11
= control target key start
LH: loop header
LB: loop body
LE: loop exit
PB: predicated region body
PF: predicated region fallthrough
CT: control target
= control target key end

     0   :  { %s2516_s15 = smov 0   ;;  %s2518_s16 = smov 0   ;;  %s4153_s0 = inlined_call_operand.vmem [shape: f32[2,256,1], index: 0, kind: input, shape index: {}]   ;;  %s4154_s1 = inlined_call_operand.vmem [shape: f32[2,1,384], index: 1, kind: input, shape index: {}]   ;;  %s4155_s2 = inlined_call_operand.vmem [shape: f32[2,1,384], index: 2, kind: input, shape index: {}]   ;;  %s4156_s3 = inlined_call_operand.vmem [shape: f32[2,256,1], index: 3, kind: input, shape index: {}]   ;;  %s4157_s4 = inlined_call_operand.vmem [shape: f32[2,256,1], index: 4, kind: output, shape index: {}]  }
   0x1   :  { %s2520_s17 = smov 0  }
   0x2 LB: > { %s2161_s18 = sadd.s32 4294967295, %s2488_s17   ;;  %s2533_s19 = sadd.s32 1, %s2488_s17   ;;  %s2488_s17 = sphi %s2520_s17, %s4493_s17   ;;  %s2484_s16 = sphi %s2518_s16, %s4492_s16   ;;  %s2480_s15 = sphi %s2516_s15, %s4491_s15  }
   0x3   : > { %s18_s20 = ssub.s32 %s2488_s17, %s2533_s19  ;;  %s21_s21 = sadd.s32 1, %s2484_s16 }
   0x4   : > { %p19_p0 = scmp.eq.s32.totalorder %s18_s20, 0  ;;  %p28_p1 = scmp.ne.s32.totalorder %s2484_s16, %s2480_s15 }
   0x5   : > { %p29_p2 = scmp.eq.s32.totalorder %s2488_s17, 0  ;;  %p126_p3 = scmp.eq.s32.totalorder %s2161_s18, 1 }
   0x6   : > { %s2544_s22 = scalar_select %p19_p0, %s2484_s16, %s21_s21  }
   0x7   : > { %p2546_p4 = por %p29_p2, %p28_p1  ;;  %p2550_p5 = por %p126_p3, %p28_p1 }
   0x8   : > { %p2164_p6 = scmp.ge.s32.totalorder %s2488_s17, 2 }
   0xa   : > { %154 = sbr.rel (%p2164_p6) target bundleno = 57 (0x39), region = 24 }
  0x11   : > { %157 = sbr.rel (!%p2546_p4) target bundleno = 37 (0x25), region = 28  ;;  %s159_s25 = sand.u32 (%p2546_p4), 1, %s2484_s16  }
  0x12   : > { %s2180_s26 = sshll.u32 (%p2546_p4), %s2488_s17, 7  ;;  %s2165_s27 = sshll.u32 (%p2546_p4), %s159_s25, 8 }
  0x13   : > { %s2562_s30 = scalar_lea.vmem (%p2546_p4), %s4153_s0, %s2180_s26  ;;  %s2567_s5 = scalar_lea.vmem (%p2546_p4), [#allocation2], %s2165_s27 }
  0x14   : > { %v254_v0 = vld [vmem:[%s2562_s30] sm:$0xff] (%p2546_p4)  ;;  %v256_v1 = vld [vmem:[%s2562_s30 + $0x8] sm:$0xff] (%p2546_p4)  ;;  %v258_v2 = vld [vmem:[%s2562_s30 + $0x10] sm:$0xff] (%p2546_p4) }
  0x15   : > { %255 = vst [vmem:[%s2567_s5] sm:$0xff] (%p2546_p4), %v254_v0  ;;  %257 = vst [vmem:[%s2567_s5 + $0x8] sm:$0xff] (%p2546_p4), %v256_v1  ;;  %v260_v3 = vld [vmem:[%s2562_s30 + $0x18] sm:$0xff] (%p2546_p4)  ;;  %v262_v4 = vld [vmem:[%s2562_s30 + $0x20] sm:$0xff] (%p2546_p4) }
  0x16   : > { %259 = vst [vmem:[%s2567_s5 + $0x10] sm:$0xff] (%p2546_p4), %v258_v2  ;;  %v264_v5 = vld [vmem:[%s2562_s30 + $0x28] sm:$0xff] (%p2546_p4)  ;;  %261 = vst [vmem:[%s2567_s5 + $0x18] sm:$0xff] (%p2546_p4), %v260_v3  ;;  %v266_v6 = vld [vmem:[%s2562_s30 + $0x30] sm:$0xff] (%p2546_p4) }
  0x17   : > { %263 = vst [vmem:[%s2567_s5 + $0x20] sm:$0xff] (%p2546_p4), %v262_v4  ;;  %265 = vst [vmem:[%s2567_s5 + $0x28] sm:$0xff] (%p2546_p4), %v264_v5  ;;  %v268_v7 = vld [vmem:[%s2562_s30 + $0x38] sm:$0xff] (%p2546_p4)  ;;  %v270_v8 = vld [vmem:[%s2562_s30 + $0x40] sm:$0xff] (%p2546_p4) }
  0x18   : > { %267 = vst [vmem:[%s2567_s5 + $0x30] sm:$0xff] %v266_v6  ;;  %269 = vst [vmem:[%s2567_s5 + $0x38] sm:$0xff] %v268_v7  ;;  %v272_v9 = vld [vmem:[%s2562_s30 + $0x48] sm:$0xff]  ;;  %v274_v10 = vld [vmem:[%s2562_s30 + $0x50] sm:$0xff] }
  0x19   : > { %271 = vst [vmem:[%s2567_s5 + $0x40] sm:$0xff] %v270_v8  ;;  %v276_v11 = vld [vmem:[%s2562_s30 + $0x58] sm:$0xff]  ;;  %273 = vst [vmem:[%s2567_s5 + $0x48] sm:$0xff] %v272_v9  ;;  %v278_v12 = vld [vmem:[%s2562_s30 + $0x60] sm:$0xff] }
  0x1a   : > { %275 = vst [vmem:[%s2567_s5 + $0x50] sm:$0xff] %v274_v10  ;;  %277 = vst [vmem:[%s2567_s5 + $0x58] sm:$0xff] %v276_v11  ;;  %v280_v13 = vld [vmem:[%s2562_s30 + $0x68] sm:$0xff]  ;;  %v282_v14 = vld [vmem:[%s2562_s30 + $0x70] sm:$0xff] }
  0x1b   : > { %279 = vst [vmem:[%s2567_s5 + $0x60] sm:$0xff] %v278_v12  ;;  %281 = vst [vmem:[%s2567_s5 + $0x68] sm:$0xff] %v280_v13  ;;  %v284_v15 = vld [vmem:[%s2562_s30 + $0x78] sm:$0xff]  ;;  %v286_v16 = vld [vmem:[%s2562_s30 + $0x100] sm:$0xff] }
  0x1c   : > { %283 = vst [vmem:[%s2567_s5 + $0x70] sm:$0xff] %v282_v14  ;;  %v288_v17 = vld [vmem:[%s2562_s30 + $0x108] sm:$0xff]  ;;  %285 = vst [vmem:[%s2567_s5 + $0x78] sm:$0xff] %v284_v15  ;;  %v290_v18 = vld [vmem:[%s2562_s30 + $0x110] sm:$0xff] }
  0x1d   : > { %287 = vst [vmem:[%s2567_s5 + $0x80] sm:$0xff] %v286_v16  ;;  %289 = vst [vmem:[%s2567_s5 + $0x88] sm:$0xff] %v288_v17  ;;  %v292_v19 = vld [vmem:[%s2562_s30 + $0x118] sm:$0xff]  ;;  %v294_v20 = vld [vmem:[%s2562_s30 + $0x120] sm:$0xff] }
  0x1e   : > { %291 = vst [vmem:[%s2567_s5 + $0x90] sm:$0xff] %v290_v18  ;;  %293 = vst [vmem:[%s2567_s5 + $0x98] sm:$0xff] %v292_v19  ;;  %v296_v21 = vld [vmem:[%s2562_s30 + $0x128] sm:$0xff]  ;;  %v298_v22 = vld [vmem:[%s2562_s30 + $0x130] sm:$0xff] }
  0x1f   : > { %295 = vst [vmem:[%s2567_s5 + $0xa0] sm:$0xff] %v294_v20  ;;  %v300_v23 = vld [vmem:[%s2562_s30 + $0x138] sm:$0xff]  ;;  %297 = vst [vmem:[%s2567_s5 + $0xa8] sm:$0xff] %v296_v21  ;;  %v302_v24 = vld [vmem:[%s2562_s30 + $0x140] sm:$0xff] }
  0x20   : > { %299 = vst [vmem:[%s2567_s5 + $0xb0] sm:$0xff] %v298_v22  ;;  %301 = vst [vmem:[%s2567_s5 + $0xb8] sm:$0xff] %v300_v23  ;;  %v304_v25 = vld [vmem:[%s2562_s30 + $0x148] sm:$0xff]  ;;  %v306_v26 = vld [vmem:[%s2562_s30 + $0x150] sm:$0xff] }
  0x21   : > { %303 = vst [vmem:[%s2567_s5 + $0xc0] sm:$0xff] %v302_v24  ;;  %305 = vst [vmem:[%s2567_s5 + $0xc8] sm:$0xff] %v304_v25  ;;  %v308_v27 = vld [vmem:[%s2562_s30 + $0x158] sm:$0xff]  ;;  %v310_v28 = vld [vmem:[%s2562_s30 + $0x160] sm:$0xff] }
  0x22   : > { %307 = vst [vmem:[%s2567_s5 + $0xd0] sm:$0xff] %v306_v26  ;;  %v312_v29 = vld [vmem:[%s2562_s30 + $0x168] sm:$0xff]  ;;  %309 = vst [vmem:[%s2567_s5 + $0xd8] sm:$0xff] %v308_v27  ;;  %v314_v30 = vld [vmem:[%s2562_s30 + $0x170] sm:$0xff] }
  0x23   : > { %311 = vst [vmem:[%s2567_s5 + $0xe0] sm:$0xff] %v310_v28  ;;  %313 = vst [vmem:[%s2567_s5 + $0xe8] sm:$0xff] %v312_v29  ;;  %v316_v31 = vld [vmem:[%s2562_s30 + $0x178] sm:$0xff] }
  0x24   : > { %315 = vst [vmem:[%s2567_s5 + $0xf0] sm:$0xff] %v314_v30  ;;  %317 = vst [vmem:[%s2567_s5 + $0xf8] sm:$0xff] %v316_v31 }
  0x25 PF: > { %323 = sbr.rel (!%p2546_p4) target bundleno = 57 (0x39), region = 66  ;;  %s325_s6 = sand.u32 (%p2546_p4), 1, %s2484_s16  }
  0x26   : > { %s2181_s7 = sshll.u32 (%p2546_p4), %s2488_s17, 7  ;;  %s2168_s8 = sshll.u32 (%p2546_p4), %s325_s6, 8 }
  0x27   : > { %s2637_s11 = scalar_lea.vmem (%p2546_p4), %s4156_s3, %s2181_s7  ;;  %s2642_s12 = scalar_lea.vmem (%p2546_p4), [#allocation3], %s2168_s8 }
  0x28   : > { %v420_v32 = vld [vmem:[%s2637_s11] sm:$0xff] (%p2546_p4)  ;;  %v422_v33 = vld [vmem:[%s2637_s11 + $0x8] sm:$0xff] (%p2546_p4)  ;;  %v424_v34 = vld [vmem:[%s2637_s11 + $0x10] sm:$0xff] (%p2546_p4) }
  0x29   : > { %421 = vst [vmem:[%s2642_s12] sm:$0xff] (%p2546_p4), %v420_v32  ;;  %423 = vst [vmem:[%s2642_s12 + $0x8] sm:$0xff] (%p2546_p4), %v422_v33  ;;  %v426_v35 = vld [vmem:[%s2637_s11 + $0x18] sm:$0xff] (%p2546_p4)  ;;  %v428_v36 = vld [vmem:[%s2637_s11 + $0x20] sm:$0xff] (%p2546_p4) }
  0x2a   : > { %425 = vst [vmem:[%s2642_s12 + $0x10] sm:$0xff] (%p2546_p4), %v424_v34  ;;  %v430_v37 = vld [vmem:[%s2637_s11 + $0x28] sm:$0xff] (%p2546_p4)  ;;  %427 = vst [vmem:[%s2642_s12 + $0x18] sm:$0xff] (%p2546_p4), %v426_v35  ;;  %v432_v38 = vld [vmem:[%s2637_s11 + $0x30] sm:$0xff] (%p2546_p4) }
  0x2b   : > { %429 = vst [vmem:[%s2642_s12 + $0x20] sm:$0xff] (%p2546_p4), %v428_v36  ;;  %431 = vst [vmem:[%s2642_s12 + $0x28] sm:$0xff] (%p2546_p4), %v430_v37  ;;  %v434_v39 = vld [vmem:[%s2637_s11 + $0x38] sm:$0xff] (%p2546_p4)  ;;  %v436_v40 = vld [vmem:[%s2637_s11 + $0x40] sm:$0xff] (%p2546_p4) }
  0x2c   : > { %433 = vst [vmem:[%s2642_s12 + $0x30] sm:$0xff] %v432_v38  ;;  %435 = vst [vmem:[%s2642_s12 + $0x38] sm:$0xff] %v434_v39  ;;  %v438_v41 = vld [vmem:[%s2637_s11 + $0x48] sm:$0xff]  ;;  %v440_v42 = vld [vmem:[%s2637_s11 + $0x50] sm:$0xff] }
  0x2d   : > { %437 = vst [vmem:[%s2642_s12 + $0x40] sm:$0xff] %v436_v40  ;;  %v442_v43 = vld [vmem:[%s2637_s11 + $0x58] sm:$0xff]  ;;  %439 = vst [vmem:[%s2642_s12 + $0x48] sm:$0xff] %v438_v41  ;;  %v444_v44 = vld [vmem:[%s2637_s11 + $0x60] sm:$0xff] }
  0x2e   : > { %441 = vst [vmem:[%s2642_s12 + $0x50] sm:$0xff] %v440_v42  ;;  %443 = vst [vmem:[%s2642_s12 + $0x58] sm:$0xff] %v442_v43  ;;  %v446_v45 = vld [vmem:[%s2637_s11 + $0x68] sm:$0xff]  ;;  %v448_v46 = vld [vmem:[%s2637_s11 + $0x70] sm:$0xff] }
  0x2f   : > { %445 = vst [vmem:[%s2642_s12 + $0x60] sm:$0xff] %v444_v44  ;;  %447 = vst [vmem:[%s2642_s12 + $0x68] sm:$0xff] %v446_v45  ;;  %v450_v47 = vld [vmem:[%s2637_s11 + $0x78] sm:$0xff]  ;;  %v452_v48 = vld [vmem:[%s2637_s11 + $0x100] sm:$0xff] }
  0x30   : > { %449 = vst [vmem:[%s2642_s12 + $0x70] sm:$0xff] %v448_v46  ;;  %v454_v49 = vld [vmem:[%s2637_s11 + $0x108] sm:$0xff]  ;;  %451 = vst [vmem:[%s2642_s12 + $0x78] sm:$0xff] %v450_v47  ;;  %v456_v50 = vld [vmem:[%s2637_s11 + $0x110] sm:$0xff] }
  0x31   : > { %453 = vst [vmem:[%s2642_s12 + $0x80] sm:$0xff] %v452_v48  ;;  %455 = vst [vmem:[%s2642_s12 + $0x88] sm:$0xff] %v454_v49  ;;  %v458_v51 = vld [vmem:[%s2637_s11 + $0x118] sm:$0xff]  ;;  %v460_v52 = vld [vmem:[%s2637_s11 + $0x120] sm:$0xff] }
  0x32   : > { %457 = vst [vmem:[%s2642_s12 + $0x90] sm:$0xff] %v456_v50  ;;  %459 = vst [vmem:[%s2642_s12 + $0x98] sm:$0xff] %v458_v51  ;;  %v462_v53 = vld [vmem:[%s2637_s11 + $0x128] sm:$0xff]  ;;  %v464_v54 = vld [vmem:[%s2637_s11 + $0x130] sm:$0xff] }
  0x33   : > { %461 = vst [vmem:[%s2642_s12 + $0xa0] sm:$0xff] %v460_v52  ;;  %v466_v55 = vld [vmem:[%s2637_s11 + $0x138] sm:$0xff]  ;;  %463 = vst [vmem:[%s2642_s12 + $0xa8] sm:$0xff] %v462_v53  ;;  %v468_v56 = vld [vmem:[%s2637_s11 + $0x140] sm:$0xff] }
  0x34   : > { %465 = vst [vmem:[%s2642_s12 + $0xb0] sm:$0xff] %v464_v54  ;;  %467 = vst [vmem:[%s2642_s12 + $0xb8] sm:$0xff] %v466_v55  ;;  %v470_v57 = vld [vmem:[%s2637_s11 + $0x148] sm:$0xff]  ;;  %v472_v58 = vld [vmem:[%s2637_s11 + $0x150] sm:$0xff] }
  0x35   : > { %469 = vst [vmem:[%s2642_s12 + $0xc0] sm:$0xff] %v468_v56  ;;  %471 = vst [vmem:[%s2642_s12 + $0xc8] sm:$0xff] %v470_v57  ;;  %v474_v59 = vld [vmem:[%s2637_s11 + $0x158] sm:$0xff]  ;;  %v476_v60 = vld [vmem:[%s2637_s11 + $0x160] sm:$0xff] }
  0x36   : > { %473 = vst [vmem:[%s2642_s12 + $0xd0] sm:$0xff] %v472_v58  ;;  %v478_v61 = vld [vmem:[%s2637_s11 + $0x168] sm:$0xff]  ;;  %475 = vst [vmem:[%s2642_s12 + $0xd8] sm:$0xff] %v474_v59  ;;  %v480_v62 = vld [vmem:[%s2637_s11 + $0x170] sm:$0xff] }
  0x37   : > { %477 = vst [vmem:[%s2642_s12 + $0xe0] sm:$0xff] %v476_v60  ;;  %479 = vst [vmem:[%s2642_s12 + $0xe8] sm:$0xff] %v478_v61  ;;  %v482_v63 = vld [vmem:[%s2637_s11 + $0x178] sm:$0xff] }
  0x38   : > { %481 = vst [vmem:[%s2642_s12 + $0xf0] sm:$0xff] %v480_v62  ;;  %483 = vst [vmem:[%s2642_s12 + $0xf8] sm:$0xff] %v482_v63 }
  0x39 PF: > { %p2171_p7 = scmp.ge.s32.totalorder %s2488_s17, 1  ;;  %p488_p8 = scmp.lt.s32.totalorder %s2488_s17, 3 }
  0x3b   : > { %p489_p9 = pnand %p2171_p7, %p488_p8 }
  0x3d   : > { %492 = sbr.rel (%p489_p9) target bundleno = 683 (0x2ab), region = 104 }
  0x44   : > { %s495_s13 = sand.u32 1, %s2480_s15   ;;  %v2490_v0 = vmov 0   ;;  %v4158_v33 = vlaneseq  ;;  %v565_v37 = vld [vmem:[%s4154_s1] sm:$0x7]  ;;  %vm1888_vm1 = vcmask 7168   ;;  %s2182_s6 = sshll.u32 (%p2550_p5), %s2161_s18, 7 }
  0x45   : > { %2209 = vset.pattern.permute.xlu1 %v2490_v0  ;;  %2208 = vset.pattern.permute.xlu0 %v2490_v0  ;;  %s2708_s14 = sshll.u32 %s495_s13, 8  ;;  %s4080_s24 = scalar_lea.vmem (%p2550_p5), %s4157_s4, %s2182_s6 }
  0x46   : > { %s2711_s20 = scalar_lea.vmem [#allocation2], %s2708_s14  ;;  %v730_v34 = vshrl.u32 %v4158_v33, 7  ;;  %s3946_s30 = scalar_lea.vmem [#allocation3], %s2708_s14 }
  0x47   : > { %v535_v1 = vld [vmem:[%s2711_s20 + $0x10] sm:$0xff]  ;;  %v533_v2 = vld [vmem:[%s2711_s20] sm:$0xff]  ;;  %v536_v3 = vld [vmem:[%s2711_s20 + $0x18] sm:$0xff]  ;;  %s3953_s5 = scalar_lea.vmem [#allocation4], %s2708_s14 }
  0x48   : > { %579 = vperm.xlu1 %2209, %v535_v1   ;;  %569 = vperm.xlu0 %2208, %v533_v2   ;;  %v534_v4 = vld [vmem:[%s2711_s20 + $0x8] sm:$0xff]  ;;  %v537_v6 = vld [vmem:[%s2711_s20 + $0x20] sm:$0xff]  ;;  %v540_v7 = vld [vmem:[%s2711_s20 + $0x38] sm:$0xff]  ;;  %v2746_v35 = vsub.s32 0, %v730_v34  ;;  %v2748_v36 = vsub.s32 1, %v730_v34  ;;  %v2753_v38 = vsub.s32 2, %v730_v34 }
  0x49   : > { %v538_v5 = vld [vmem:[%s2711_s20 + $0x28] sm:$0xff]  ;;  %v539_v8 = vld [vmem:[%s2711_s20 + $0x30] sm:$0xff]  ;;  %v541_v10 = vld [vmem:[%s2711_s20 + $0x40] sm:$0xff] }
  0x4a   : > { %v542_v9 = vld [vmem:[%s2711_s20 + $0x48] sm:$0xff]  ;;  %v544_v11 = vld [vmem:[%s2711_s20 + $0x58] sm:$0xff]  ;;  %v543_v12 = vld [vmem:[%s2711_s20 + $0x50] sm:$0xff]  ;;  %4269 = vst [vmem:[#allocation5_spill] sm:$0xff] %v2748_v36  ;;  %v2756_v39 = vrot.slane %v565_v37, %v2746_v35  ;;  %v2759_v40 = vrot.slane %v565_v37, %v2748_v36  ;;  %v2762_v41 = vrot.slane %v565_v37, %v2753_v38 }
  0x4b   : > { %v546_v13 = vld [vmem:[%s2711_s20 + $0x68] sm:$0xff]  ;;  %v545_v14 = vld [vmem:[%s2711_s20 + $0x60] sm:$0xff]  ;;  %v548_v15 = vld [vmem:[%s2711_s20 + $0x78] sm:$0xff] }
  0x4c   : > { %584 = vperm.xlu1 %2209, %v536_v3   ;;  %574 = vperm.xlu0 %2208, %v534_v4   ;;  %v547_v16 = vld [vmem:[%s2711_s20 + $0x70] sm:$0xff]  ;;  %v550_v17 = vld [vmem:[%s2711_s20 + $0x88] sm:$0xff]  ;;  %v549_v18 = vld [vmem:[%s2711_s20 + $0x80] sm:$0xff] }
  0x4d   : > { %v552_v19 = vld [vmem:[%s2711_s20 + $0x98] sm:$0xff]  ;;  %v551_v20 = vld [vmem:[%s2711_s20 + $0x90] sm:$0xff]  ;;  %v554_v21 = vld [vmem:[%s2711_s20 + $0xa8] sm:$0xff] }
  0x4e   : > { %v553_v22 = vld [vmem:[%s2711_s20 + $0xa0] sm:$0xff]  ;;  %v556_v23 = vld [vmem:[%s2711_s20 + $0xb8] sm:$0xff]  ;;  %v555_v24 = vld [vmem:[%s2711_s20 + $0xb0] sm:$0xff] }
  0x4f   : > { %v558_v25 = vld [vmem:[%s2711_s20 + $0xc8] sm:$0xff]  ;;  %v557_v26 = vld [vmem:[%s2711_s20 + $0xc0] sm:$0xff]  ;;  %v560_v27 = vld [vmem:[%s2711_s20 + $0xd8] sm:$0xff] }
  0x50   : > { %594 = vperm.xlu1 %2209, %v538_v5   ;;  %589 = vperm.xlu0 %2208, %v537_v6   ;;  %v559_v28 = vld [vmem:[%s2711_s20 + $0xd0] sm:$0xff]  ;;  %v562_v29 = vld [vmem:[%s2711_s20 + $0xe8] sm:$0xff]  ;;  %v561_v30 = vld [vmem:[%s2711_s20 + $0xe0] sm:$0xff] }
  0x51   : > { %v564_v31 = vld [vmem:[%s2711_s20 + $0xf8] sm:$0xff]  ;;  %v563_v32 = vld [vmem:[%s2711_s20 + $0xf0] sm:$0xff] }
  0x54   : > { %604 = vperm.xlu1 %2209, %v540_v7   ;;  %599 = vperm.xlu0 %2208, %v539_v8  }
  0x58   : > { %614 = vperm.xlu1 %2209, %v542_v9   ;;  %609 = vperm.xlu0 %2208, %v541_v10  }
  0x5c   : > { %624 = vperm.xlu1 %2209, %v544_v11   ;;  %619 = vperm.xlu0 %2208, %v543_v12  }
  0x60   : > { %634 = vperm.xlu1 %2209, %v546_v13   ;;  %629 = vperm.xlu0 %2208, %v545_v14  }
  0x64   : > { %644 = vperm.xlu1 %2209, %v548_v15   ;;  %639 = vperm.xlu0 %2208, %v547_v16  }
  0x68   : > { %654 = vperm.xlu1 %2209, %v550_v17   ;;  %649 = vperm.xlu0 %2208, %v549_v18  }
  0x6c   : > { %664 = vperm.xlu1 %2209, %v552_v19   ;;  %659 = vperm.xlu0 %2208, %v551_v20  }
  0x70   : > { %674 = vperm.xlu1 %2209, %v554_v21   ;;  %669 = vperm.xlu0 %2208, %v553_v22  }
  0x74   : > { %684 = vperm.xlu1 %2209, %v556_v23   ;;  %679 = vperm.xlu0 %2208, %v555_v24  }
  0x78   : > { %694 = vperm.xlu1 %2209, %v558_v25   ;;  %689 = vperm.xlu0 %2208, %v557_v26  }
  0x7c   : > { %704 = vperm.xlu1 %2209, %v560_v27   ;;  %699 = vperm.xlu0 %2208, %v559_v28  }
  0x80   : > { %714 = vperm.xlu1 %2209, %v562_v29   ;;  %709 = vperm.xlu0 %2208, %v561_v30  }
  0x84   : > { %724 = vperm.xlu1 %2209, %v564_v31   ;;  %719 = vperm.xlu0 %2208, %v563_v32  }
  0xc7   : > { %v580_v42 = vpop.permute.xlu1 %579  ;;  %v570_v43 = vpop.permute.xlu0 %569 }
  0xc8   : > { %v2765_v44 = vmul.f32 %v2756_v39, %v570_v43  ;;  %v2768_v45 = vmul.f32 %v2759_v40, %v570_v43  ;;  %v2771_v46 = vmul.f32 %v2756_v39, %v580_v42  ;;  %v2774_v47 = vmul.f32 %v2759_v40, %v580_v42 }
  0xc9   : > { %v2777_v48 = vmul.f32 %v2762_v41, %v570_v43  ;;  %v2782_v52 = vmul.f32 %v2762_v41, %v580_v42 }
  0xca   : > { %v859_v49 = vmax.f32 %v2765_v44, %v2768_v45  ;;  %v867_v53 = vmax.f32 %v2771_v46, %v2774_v47 }
  0xcb   : > { %v585_v50 = vpop.permute.xlu1 %584  ;;  %v575_v51 = vpop.permute.xlu0 %574 }
  0xcc   : > { %v860_v54 = vmax.f32 %v859_v49, %v2777_v48  ;;  %v2788_v55 = vmul.f32 %v2756_v39, %v575_v51  ;;  %v2791_v56 = vmul.f32 %v2759_v40, %v575_v51  ;;  %v2794_v57 = vmul.f32 %v2756_v39, %v585_v50 }
  0xcd   : > { %v2797_v58 = vmul.f32 %v2759_v40, %v585_v50  ;;  %v2800_v59 = vmul.f32 %v2762_v41, %v575_v51  ;;  %v868_v63 = vmax.f32 %v867_v53, %v2782_v52  ;;  %v2821_v6 = vmul.f32 %v2762_v41, %v585_v50 }
  0xce   : > { %861 = vmax.xlane.f32.xlu0 %v860_v54  ;;  %v863_v60 = vmax.f32 %v2788_v55, %v2791_v56 }
  0xcf   : > { %v595_v61 = vpop.permute.xlu1 %594  ;;  %v590_v62 = vpop.permute.xlu0 %589  ;;  %v871_v1 = vmax.f32 %v2794_v57, %v2797_v58 }
  0xd0   : > { %v864_v0 = vmax.f32 %v863_v60, %v2800_v59  ;;  %v2809_v2 = vmul.f32 %v2756_v39, %v590_v62  ;;  %v2812_v3 = vmul.f32 %v2759_v40, %v590_v62  ;;  %v2815_v4 = vmul.f32 %v2756_v39, %v595_v61 }
  0xd1   : > { %v2818_v5 = vmul.f32 %v2759_v40, %v595_v61  ;;  %v2824_v7 = vmul.f32 %v2762_v41, %v590_v62  ;;  %v872_v12 = vmax.f32 %v871_v1, %v2821_v6  ;;  %v2839_v16 = vmul.f32 %v2762_v41, %v595_v61 }
  0xd2   : > { %869 = vmax.xlane.f32.xlu0 %v868_v63  ;;  %865 = vmax.xlane.f32.xlu1 %v864_v0  ;;  %v875_v8 = vmax.f32 %v2809_v2, %v2812_v3 }
  0xd3   : > { %v605_v9 = vpop.permute.xlu1 %604  ;;  %v600_v10 = vpop.permute.xlu0 %599  ;;  %v879_v11 = vmax.f32 %v2815_v4, %v2818_v5 }
  0xd4   : > { %v876_v13 = vmax.f32 %v875_v8, %v2824_v7  ;;  %v2833_v14 = vmul.f32 %v2756_v39, %v600_v10  ;;  %v2836_v15 = vmul.f32 %v2759_v40, %v600_v10  ;;  %v2842_v17 = vmul.f32 %v2756_v39, %v605_v9 }
  0xd5   : > { %v2845_v18 = vmul.f32 %v2759_v40, %v605_v9  ;;  %v2848_v19 = vmul.f32 %v2762_v41, %v600_v10  ;;  %v880_v23 = vmax.f32 %v879_v11, %v2839_v16  ;;  %v2869_v30 = vmul.f32 %v2762_v41, %v605_v9 }
  0xd6   : > { %873 = vmax.xlane.f32.xlu0 %v872_v12  ;;  %877 = vmax.xlane.f32.xlu1 %v876_v13  ;;  %v883_v20 = vmax.f32 %v2833_v14, %v2836_v15  ;;  %v566_v12 = vld [vmem:[%s4154_s1 + $0x3] sm:$0x7] }
  0xd7   : > { %v615_v21 = vpop.permute.xlu1 %614  ;;  %v610_v22 = vpop.permute.xlu0 %609  ;;  %v887_v25 = vmax.f32 %v2842_v17, %v2845_v18  ;;  %v2958_v33 = vrot.slane %v566_v12, %v2753_v38 }
  0xd8   : > { %v884_v24 = vmax.f32 %v883_v20, %v2848_v19  ;;  %v2857_v26 = vmul.f32 %v2756_v39, %v610_v22  ;;  %v2860_v27 = vmul.f32 %v2759_v40, %v610_v22  ;;  %v2863_v28 = vmul.f32 %v2756_v39, %v615_v21 }
  0xd9   : > { %v2866_v29 = vmul.f32 %v2759_v40, %v615_v21  ;;  %v2872_v31 = vmul.f32 %v2762_v41, %v610_v22  ;;  %v888_v43 = vmax.f32 %v887_v25, %v2869_v30  ;;  %v2887_v53 = vmul.f32 %v2762_v41, %v615_v21 }
  0xda   : > { %881 = vmax.xlane.f32.xlu0 %v880_v23  ;;  %885 = vmax.xlane.f32.xlu1 %v884_v24  ;;  %v891_v32 = vmax.f32 %v2857_v26, %v2860_v27 }
  0xdb   : > { %v625_v34 = vpop.permute.xlu1 %624  ;;  %v620_v37 = vpop.permute.xlu0 %619  ;;  %v895_v42 = vmax.f32 %v2863_v28, %v2866_v29 }
  0xdc   : > { %v892_v49 = vmax.f32 %v891_v32, %v2872_v31  ;;  %v2881_v50 = vmul.f32 %v2756_v39, %v620_v37  ;;  %v2884_v51 = vmul.f32 %v2759_v40, %v620_v37  ;;  %v2890_v54 = vmul.f32 %v2756_v39, %v625_v34 }
  0xdd   : > { %v2893_v60 = vmul.f32 %v2759_v40, %v625_v34  ;;  %v2896_v61 = vmul.f32 %v2762_v41, %v620_v37  ;;  %v896_v1 = vmax.f32 %v895_v42, %v2887_v53  ;;  %v2920_v21 = vmul.f32 %v2762_v41, %v625_v34 }
  0xde   : > { %889 = vmax.xlane.f32.xlu0 %v888_v43  ;;  %893 = vmax.xlane.f32.xlu1 %v892_v49  ;;  %v899_v62 = vmax.f32 %v2881_v50, %v2884_v51  ;;  %v2930_v37 = vrot.slane %v566_v12, %v2746_v35  ;;  %v2933_v42 = vrot.slane %v566_v12, %v2748_v36 }
  0xdf   : > { %v635_v63 = vpop.permute.xlu1 %634  ;;  %v630_v0 = vpop.permute.xlu0 %629  ;;  %v903_v9 = vmax.f32 %v2890_v54, %v2893_v60 }
  0xe0   : > { %v900_v8 = vmax.f32 %v899_v62, %v2896_v61  ;;  %v2905_v10 = vmul.f32 %v2756_v39, %v630_v0  ;;  %v2908_v11 = vmul.f32 %v2759_v40, %v630_v0  ;;  %v2914_v13 = vmul.f32 %v2756_v39, %v635_v63 }
  0xe1   : > { %v2917_v20 = vmul.f32 %v2759_v40, %v635_v63  ;;  %v2923_v22 = vmul.f32 %v2762_v41, %v630_v0  ;;  %v904_v34 = vmax.f32 %v903_v9, %v2920_v21  ;;  %v2944_v0 = vmul.f32 %v2762_v41, %v635_v63 }
  0xe2   : > { %4270 = vst [vmem:[#allocation6_spill] sm:$0xff] %v2914_v13  ;;  %897 = vmax.xlane.f32.xlu0 %v896_v1  ;;  %901 = vmax.xlane.f32.xlu1 %v900_v8  ;;  %v907_v23 = vmax.f32 %v2905_v10, %v2908_v11 }
  0xe3   : > { %4271 = vst [vmem:[#allocation7_spill] sm:$0xff] %v2917_v20  ;;  %v645_v24 = vpop.permute.xlu1 %644  ;;  %v640_v25 = vpop.permute.xlu0 %639  ;;  %v911_v32 = vmax.f32 %v2914_v13, %v2917_v20  ;;  %4273 = vst [vmem:[#allocation9_spill] sm:$0xff] %v2944_v0 }
  0xe4   : > { %v908_v43 = vmax.f32 %v907_v23, %v2923_v22  ;;  %v2938_v49 = vmul.f32 %v2756_v39, %v640_v25  ;;  %v2941_v62 = vmul.f32 %v2759_v40, %v640_v25  ;;  %v2947_v1 = vmul.f32 %v2756_v39, %v645_v24 }
  0xe5   : > { %v2950_v8 = vmul.f32 %v2759_v40, %v645_v24  ;;  %v2953_v9 = vmul.f32 %v2762_v41, %v640_v25  ;;  %v912_v13 = vmax.f32 %v911_v32, %v2944_v0  ;;  %v2977_v32 = vmul.f32 %v2762_v41, %v645_v24 }
  0xe6   : > { %4272 = vst [vmem:[#allocation8_spill] sm:$0xff] %v2941_v62  ;;  %4274 = vst [vmem:[#allocation10_spill] sm:$0xff] %v2947_v1  ;;  %905 = vmax.xlane.f32.xlu0 %v904_v34  ;;  %909 = vmax.xlane.f32.xlu1 %v908_v43  ;;  %v915_v23 = vmax.f32 %v2938_v49, %v2941_v62 }
  0xe7   : > { %4275 = vst [vmem:[#allocation11_spill] sm:$0xff] %v2950_v8  ;;  %4276 = vst [vmem:[#allocation12_spill] sm:$0xff] %v2953_v9  ;;  %v655_v20 = vpop.permute.xlu1 %654  ;;  %v650_v63 = vpop.permute.xlu0 %649  ;;  %v919_v40 = vmax.f32 %v2947_v1, %v2950_v8 }
  0xe8   : > { %v916_v39 = vmax.f32 %v915_v23, %v2953_v9  ;;  %v2965_v34 = vmul.f32 %v2930_v37, %v650_v63  ;;  %v2968_v25 = vmul.f32 %v2933_v42, %v650_v63  ;;  %v2971_v43 = vmul.f32 %v2930_v37, %v655_v20  ;;  %4280 = vst [vmem:[#allocation16_spill] sm:$0xff] %v2977_v32 }
  0xe9   : > { %v2974_v12 = vmul.f32 %v2933_v42, %v655_v20  ;;  %v2980_v23 = vmul.f32 %v2958_v33, %v650_v63  ;;  %v920_v62 = vmax.f32 %v919_v40, %v2977_v32  ;;  %v2995_v24 = vmul.f32 %v2958_v33, %v655_v20 }
  0xea   : > { %4277 = vst [vmem:[#allocation13_spill] sm:$0xff] %v2968_v25  ;;  %4278 = vst [vmem:[#allocation14_spill] sm:$0xff] %v2971_v43  ;;  %913 = vmax.xlane.f32.xlu0 %v912_v13  ;;  %917 = vmax.xlane.f32.xlu1 %v916_v39  ;;  %v923_v8 = vmax.f32 %v2965_v34, %v2968_v25 }
  0xeb   : > { %4279 = vst [vmem:[#allocation15_spill] sm:$0xff] %v2974_v12  ;;  %4281 = vst [vmem:[#allocation17_spill] sm:$0xff] %v2980_v23  ;;  %v665_v1 = vpop.permute.xlu1 %664  ;;  %v660_v0 = vpop.permute.xlu0 %659  ;;  %v927_v9 = vmax.f32 %v2971_v43, %v2974_v12 }
  0xec   : > { %v924_v36 = vmax.f32 %v923_v8, %v2980_v23  ;;  %v2989_v13 = vmul.f32 %v2930_v37, %v660_v0  ;;  %v2992_v41 = vmul.f32 %v2933_v42, %v660_v0  ;;  %4284 = vst [vmem:[#allocation20_spill] sm:$0xff] %v2995_v24  ;;  %v2998_v63 = vmul.f32 %v2930_v37, %v665_v1 }
  0xed   : > { %v3001_v39 = vmul.f32 %v2933_v42, %v665_v1  ;;  %v3004_v40 = vmul.f32 %v2958_v33, %v660_v0  ;;  %v928_v32 = vmax.f32 %v927_v9, %v2995_v24  ;;  %v3025_v9 = vmul.f32 %v2958_v33, %v665_v1 }
  0xee   : > { %4282 = vst [vmem:[#allocation18_spill] sm:$0xff] %v2989_v13  ;;  %4283 = vst [vmem:[#allocation19_spill] sm:$0xff] %v2992_v41  ;;  %921 = vmax.xlane.f32.xlu0 %v920_v62  ;;  %925 = vmax.xlane.f32.xlu1 %v924_v36  ;;  %v931_v8 = vmax.f32 %v2989_v13, %v2992_v41 }
  0xef   : > { %4285 = vst [vmem:[#allocation21_spill] sm:$0xff] %v2998_v63  ;;  %4286 = vst [vmem:[#allocation22_spill] sm:$0xff] %v3001_v39  ;;  %v675_v12 = vpop.permute.xlu1 %674  ;;  %v670_v43 = vpop.permute.xlu0 %669  ;;  %v935_v23 = vmax.f32 %v2998_v63, %v3001_v39 }
  0xf0   : > { %4287 = vst [vmem:[#allocation23_spill] sm:$0xff] %v3004_v40  ;;  %v932_v20 = vmax.f32 %v931_v8, %v3004_v40  ;;  %v3013_v25 = vmul.f32 %v2930_v37, %v670_v43  ;;  %v3016_v36 = vmul.f32 %v2933_v42, %v670_v43  ;;  %v3019_v62 = vmul.f32 %v2930_v37, %v675_v12 }
  0xf1   : > { %v3022_v0 = vmul.f32 %v2933_v42, %v675_v12  ;;  %4292 = vst [vmem:[#allocation28_spill] sm:$0xff] %v3025_v9  ;;  %v3028_v8 = vmul.f32 %v2958_v33, %v670_v43  ;;  %v936_v41 = vmax.f32 %v935_v23, %v3025_v9  ;;  %v3043_v43 = vmul.f32 %v2958_v33, %v675_v12 }
  0xf2   : > { %4288 = vst [vmem:[#allocation24_spill] sm:$0xff] %v3013_v25  ;;  %4289 = vst [vmem:[#allocation25_spill] sm:$0xff] %v3016_v36  ;;  %929 = vmax.xlane.f32.xlu0 %v928_v32  ;;  %933 = vmax.xlane.f32.xlu1 %v932_v20  ;;  %v939_v39 = vmax.f32 %v3013_v25, %v3016_v36 }
  0xf3   : > { %4290 = vst [vmem:[#allocation26_spill] sm:$0xff] %v3019_v62  ;;  %4291 = vst [vmem:[#allocation27_spill] sm:$0xff] %v3022_v0  ;;  %v685_v63 = vpop.permute.xlu1 %684  ;;  %v680_v24 = vpop.permute.xlu0 %679  ;;  %v943_v40 = vmax.f32 %v3019_v62, %v3022_v0 }
  0xf4   : > { %4293 = vst [vmem:[#allocation29_spill] sm:$0xff] %v3028_v8  ;;  %v940_v13 = vmax.f32 %v939_v39, %v3028_v8  ;;  %v3037_v32 = vmul.f32 %v2930_v37, %v680_v24  ;;  %v3040_v1 = vmul.f32 %v2933_v42, %v680_v24  ;;  %4296 = vst [vmem:[#allocation32_spill] sm:$0xff] %v3043_v43 }
  0xf5   : > { %v3046_v20 = vmul.f32 %v2930_v37, %v685_v63  ;;  %v3049_v36 = vmul.f32 %v2933_v42, %v685_v63  ;;  %v3052_v23 = vmul.f32 %v2958_v33, %v680_v24  ;;  %v944_v9 = vmax.f32 %v943_v40, %v3043_v43 }
  0xf6   : > { %4294 = vst [vmem:[#allocation30_spill] sm:$0xff] %v3037_v32  ;;  %4295 = vst [vmem:[#allocation31_spill] sm:$0xff] %v3040_v1  ;;  %937 = vmax.xlane.f32.xlu0 %v936_v41  ;;  %941 = vmax.xlane.f32.xlu1 %v940_v13  ;;  %v947_v39 = vmax.f32 %v3037_v32, %v3040_v1  ;;  %v3073_v40 = vmul.f32 %v2958_v33, %v685_v63 }
  0xf7   : > { %4297 = vst [vmem:[#allocation33_spill] sm:$0xff] %v3046_v20  ;;  %4298 = vst [vmem:[#allocation34_spill] sm:$0xff] %v3049_v36  ;;  %v695_v0 = vpop.permute.xlu1 %694  ;;  %v690_v62 = vpop.permute.xlu0 %689  ;;  %v951_v8 = vmax.f32 %v3046_v20, %v3049_v36 }
  0xf8   : > { %4299 = vst [vmem:[#allocation35_spill] sm:$0xff] %v3052_v23  ;;  %v948_v12 = vmax.f32 %v947_v39, %v3052_v23  ;;  %v3061_v25 = vmul.f32 %v2930_v37, %v690_v62  ;;  %v3064_v13 = vmul.f32 %v2933_v42, %v690_v62  ;;  %v3067_v41 = vmul.f32 %v2930_v37, %v695_v0 }
  0xf9   : > { %v3070_v24 = vmul.f32 %v2933_v42, %v695_v0  ;;  %4304 = vst [vmem:[#allocation40_spill] sm:$0xff] %v3073_v40  ;;  %v3076_v39 = vmul.f32 %v2958_v33, %v690_v62  ;;  %v952_v1 = vmax.f32 %v951_v8, %v3073_v40  ;;  %v3091_v62 = vmul.f32 %v2958_v33, %v695_v0 }
  0xfa   : > { %4300 = vst [vmem:[#allocation36_spill] sm:$0xff] %v3061_v25  ;;  %4301 = vst [vmem:[#allocation37_spill] sm:$0xff] %v3064_v13  ;;  %945 = vmax.xlane.f32.xlu0 %v944_v9  ;;  %949 = vmax.xlane.f32.xlu1 %v948_v12  ;;  %v955_v36 = vmax.f32 %v3061_v25, %v3064_v13 }
  0xfb   : > { %4302 = vst [vmem:[#allocation38_spill] sm:$0xff] %v3067_v41  ;;  %4303 = vst [vmem:[#allocation39_spill] sm:$0xff] %v3070_v24  ;;  %v705_v20 = vpop.permute.xlu1 %704  ;;  %v700_v43 = vpop.permute.xlu0 %699  ;;  %v959_v23 = vmax.f32 %v3067_v41, %v3070_v24 }
  0xfc   : > { %4305 = vst [vmem:[#allocation41_spill] sm:$0xff] %v3076_v39  ;;  %v956_v32 = vmax.f32 %v955_v36, %v3076_v39  ;;  %v3085_v9 = vmul.f32 %v2930_v37, %v700_v43  ;;  %v3088_v63 = vmul.f32 %v2933_v42, %v700_v43  ;;  %4307 = vst [vmem:[#allocation43_spill] sm:$0xff] %v3091_v62 }
  0xfd   : > { %v3094_v12 = vmul.f32 %v2930_v37, %v705_v20  ;;  %v3097_v13 = vmul.f32 %v2933_v42, %v705_v20  ;;  %v3100_v8 = vmul.f32 %v2958_v33, %v700_v43  ;;  %v960_v40 = vmax.f32 %v959_v23, %v3091_v62 }
  0xfe   : > { %4306 = vst [vmem:[#allocation42_spill] sm:$0xff] %v3088_v63  ;;  %953 = vmax.xlane.f32.xlu0 %v952_v1  ;;  %957 = vmax.xlane.f32.xlu1 %v956_v32  ;;  %v963_v36 = vmax.f32 %v3085_v9, %v3088_v63  ;;  %v3118_v43 = vmul.f32 %v2958_v33, %v705_v20 }
  0xff   : > { %4308 = vst [vmem:[#allocation44_spill] sm:$0xff] %v3094_v12  ;;  %4309 = vst [vmem:[#allocation45_spill] sm:$0xff] %v3097_v13  ;;  %v715_v24 = vpop.permute.xlu1 %714  ;;  %v710_v41 = vpop.permute.xlu0 %709  ;;  %v967_v0 = vmax.f32 %v3094_v12, %v3097_v13 }
 0x100   : > { %4310 = vst [vmem:[#allocation46_spill] sm:$0xff] %v3100_v8  ;;  %v3108_v39 = vmul.f32 %v2930_v37, %v715_v24  ;;  %v3111_v25 = vmul.f32 %v2933_v42, %v715_v24  ;;  %v964_v32 = vmax.f32 %v963_v36, %v3100_v8  ;;  %v3115_v1 = vmul.f32 %v2930_v37, %v710_v41 }
 0x101   : > { %4314 = vst [vmem:[#allocation50_spill] sm:$0xff] %v3118_v43  ;;  %v3121_v63 = vmul.f32 %v2933_v42, %v710_v41  ;;  %v968_v12 = vmax.f32 %v967_v0, %v3118_v43  ;;  %v3125_v62 = vmul.f32 %v2958_v33, %v710_v41  ;;  %v3145_v43 = vmul.f32 %v2958_v33, %v715_v24 }
 0x102   : > { %4311 = vst [vmem:[#allocation47_spill] sm:$0xff] %v3108_v39  ;;  %4312 = vst [vmem:[#allocation48_spill] sm:$0xff] %v3111_v25  ;;  %961 = vmax.xlane.f32.xlu0 %v960_v40  ;;  %965 = vmax.xlane.f32.xlu1 %v964_v32  ;;  %v975_v40 = vmax.f32 %v3108_v39, %v3111_v25 }
 0x103   : > { %4313 = vst [vmem:[#allocation49_spill] sm:$0xff] %v3115_v1  ;;  %4315 = vst [vmem:[#allocation51_spill] sm:$0xff] %v3121_v63  ;;  %v725_v23 = vpop.permute.xlu1 %724  ;;  %v720_v13 = vpop.permute.xlu0 %719  ;;  %v971_v36 = vmax.f32 %v3115_v1, %v3121_v63 }
 0x104   : > { %v3130_v8 = vmul.f32 %v2930_v37, %v725_v23  ;;  %v3133_v20 = vmul.f32 %v2933_v42, %v725_v23  ;;  %v3138_v32 = vmul.f32 %v2930_v37, %v720_v13  ;;  %v3142_v41 = vmul.f32 %v2933_v42, %v720_v13  ;;  %4318 = vst [vmem:[#allocation54_spill] sm:$0xff] %v3145_v43 }
 0x105   : > { %v972_v0 = vmax.f32 %v971_v36, %v3125_v62  ;;  %v3148_v63 = vmul.f32 %v2958_v33, %v720_v13  ;;  %v976_v25 = vmax.f32 %v975_v40, %v3145_v43  ;;  %v3157_v42 = vmul.f32 %v2958_v33, %v725_v23 }
 0x106   : > { %4316 = vst [vmem:[#allocation52_spill] sm:$0xff] %v3130_v8  ;;  %4317 = vst [vmem:[#allocation53_spill] sm:$0xff] %v3133_v20  ;;  %969 = vmax.xlane.f32.xlu0 %v968_v12  ;;  %v979_v1 = vmax.f32 %v3138_v32, %v3142_v41  ;;  %v983_v37 = vmax.f32 %v3130_v8, %v3133_v20 }
 0x107   : > { %973 = vmax.xlane.f32.xlu1 %v972_v0 }
 0x108   : > { %v980_v36 = vmax.f32 %v979_v1, %v3148_v63  ;;  %v984_v24 = vmax.f32 %v983_v37, %v3157_v42 }
 0x10a   : > { %977 = vmax.xlane.f32.xlu0 %v976_v25 }
 0x10b   : > { %981 = vmax.xlane.f32.xlu1 %v980_v36 }
 0x10e   : > { %985 = vmax.xlane.f32.xlu0 %v984_v24 }
 0x15b   : > { %v862_v13 = vpop.xlane.xlu0 %861 }
 0x15c   : > { %v990_v12 = vsub.f32 %v2765_v44, %v862_v13  ;;  %v991_v0 = vsub.f32 %v2768_v45, %v862_v13  ;;  %v992_v40 = vsub.f32 %v2777_v48, %v862_v13  ;;  %v4319_v13 = vlaneseq }
 0x15e   : > { %v1086_v43 = vmul.f32 1.442695, %v990_v12  ;;  %v1088_v39 = vmul.f32 1.442695, %v991_v0  ;;  %v1090_v20 = vmul.f32 1.442695, %v992_v40 }
 0x15f   : > { %v866_v8 = vpop.xlane.xlu1 %865  ;;  %v870_v1 = vpop.xlane.xlu0 %869  ;;  %v856_v12 = vand.u32 127, %v4319_v13 }
 0x160   : > { %v993_v25 = vsub.f32 %v2788_v55, %v866_v8  ;;  %v994_v33 = vsub.f32 %v2791_v56, %v866_v8  ;;  %v995_v23 = vsub.f32 %v2800_v59, %v866_v8  ;;  %2210 = vpow2.f32 %v1086_v43 }
 0x161   : > { %v996_v37 = vsub.f32 %v2771_v46, %v870_v1  ;;  %v997_v44 = vsub.f32 %v2774_v47, %v870_v1  ;;  %v998_v45 = vsub.f32 %v2782_v52, %v870_v1  ;;  %2212 = vpow2.f32 %v1088_v39 }
 0x162   : > { %v1092_v48 = vmul.f32 1.442695, %v993_v25  ;;  %v1094_v36 = vmul.f32 1.442695, %v994_v33  ;;  %v1096_v24 = vmul.f32 1.442695, %v995_v23  ;;  %2214 = vpow2.f32 %v1090_v20 }
 0x163   : > { %v1098_v0 = vmul.f32 1.442695, %v996_v37  ;;  %v1100_v55 = vmul.f32 1.442695, %v997_v44  ;;  %v878_v40 = vpop.xlane.xlu1 %877  ;;  %v874_v56 = vpop.xlane.xlu0 %873  ;;  %v1102_v52 = vmul.f32 1.442695, %v998_v45 }
 0x164   : > { %2216 = vpow2.f32 %v1092_v48  ;;  %v1002_v59 = vsub.f32 %v2809_v2, %v878_v40  ;;  %v1003_v46 = vsub.f32 %v2812_v3, %v878_v40  ;;  %v1004_v47 = vsub.f32 %v2824_v7, %v878_v40 }
 0x165   : > { %2218 = vpow2.f32 %v1094_v36  ;;  %v999_v39 = vsub.f32 %v2794_v57, %v874_v56  ;;  %v1000_v43 = vsub.f32 %v2797_v58, %v874_v56  ;;  %v1001_v1 = vsub.f32 %v2821_v6, %v874_v56 }
 0x166   : > { %2220 = vpow2.f32 %v1096_v24  ;;  %v1110_v8 = vmul.f32 1.442695, %v1002_v59  ;;  %v1112_v20 = vmul.f32 1.442695, %v1003_v46  ;;  %v3176_v23 = vadd.s32 256, %v856_v12 }
 0x167   : > { %2222 = vpow2.f32 %v1098_v0  ;;  %v886_v25 = vpop.xlane.xlu1 %885  ;;  %v882_v33 = vpop.xlane.xlu0 %881  ;;  %v1114_v2 = vmul.f32 1.442695, %v1004_v47  ;;  %v1104_v7 = vmul.f32 1.442695, %v999_v39  ;;  %v1106_v58 = vmul.f32 1.442695, %v1000_v43 }
 0x168   : > { %2224 = vpow2.f32 %v1100_v55  ;;  %v1008_v3 = vsub.f32 %v2833_v14, %v886_v25  ;;  %v1009_v57 = vsub.f32 %v2836_v15, %v886_v25  ;;  %v1010_v37 = vsub.f32 %v2848_v19, %v886_v25 }
 0x169   : > { %2226 = vpow2.f32 %v1102_v52  ;;  %v1108_v6 = vmul.f32 1.442695, %v1001_v1  ;;  %v1005_v45 = vsub.f32 %v2815_v4, %v882_v33  ;;  %v1006_v14 = vsub.f32 %v2818_v5, %v882_v33 }
 0x16a   : > { %2228 = vpow2.f32 %v1110_v8  ;;  %v3181_v44 = vpop.eup %2210  ;;  %v1122_v24 = vmul.f32 1.442695, %v1008_v3  ;;  %v1007_v13 = vsub.f32 %v2839_v16, %v882_v33  ;;  %vm989_vm0 = vcmp.lt.s32.totalorder %v3176_v23, 264 }
 0x16b   : > { %2230 = vpow2.f32 %v1112_v20  ;;  %v894_v48 = vpop.xlane.xlu1 %893  ;;  %v3184_v36 = vpop.eup %2212  ;;  %v1124_v19 = vmul.f32 1.442695, %v1009_v57  ;;  %v1126_v0 = vmul.f32 1.442695, %v1010_v37  ;;  %v1116_v5 = vmul.f32 1.442695, %v1005_v45 }
 0x16c   : > { %2232 = vpow2.f32 %v1114_v2  ;;  %v890_v15 = vpop.xlane.xlu0 %889  ;;  %v2215_v12 = vpop.eup %2214  ;;  %v1014_v4 = vsub.f32 %v2857_v26, %v894_v48  ;;  %v1015_v40 = vsub.f32 %v2860_v27, %v894_v48  ;;  %v1016_v56 = vsub.f32 %v2872_v31, %v894_v48 }
 0x16d   : > { %2234 = vpow2.f32 %v1104_v7  ;;  %v1011_v16 = vsub.f32 %v2842_v17, %v890_v15  ;;  %v1012_v46 = vsub.f32 %v2845_v18, %v890_v15  ;;  %v1118_v39 = vmul.f32 1.442695, %v1006_v14 }
 0x16e   : > { %v3189_v55 = vpop.eup %2216  ;;  %2236 = vpow2.f32 %v1106_v58  ;;  %v1120_v8 = vmul.f32 1.442695, %v1007_v13  ;;  %v1013_v26 = vsub.f32 %v2869_v30, %v890_v15  ;;  %v3203_v27 = vsel %vm989_vm0, %v2215_v12, 0.0 }
 0x16f   : > { %v3194_v59 = vpop.eup %2218  ;;  %2238 = vpow2.f32 %v1108_v6  ;;  %v902_v47 = vpop.xlane.xlu1 %901  ;;  %4320 = vst [vmem:[#allocation55_spill] sm:$0xff] %v3203_v27  ;;  %v1374_v31 = vadd.f32 %v3184_v36, %v3181_v44  ;;  %v1134_v18 = vmul.f32 1.442695, %v1014_v4  ;;  %v1136_v20 = vmul.f32 1.442695, %v1015_v40 }
 0x170   : > { %v2221_v52 = vpop.eup %2220  ;;  %2240 = vpow2.f32 %v1122_v24  ;;  %v1138_v1 = vmul.f32 1.442695, %v1016_v56  ;;  %v898_v25 = vpop.xlane.xlu0 %897  ;;  %v1128_v2 = vmul.f32 1.442695, %v1011_v16  ;;  %v1130_v3 = vmul.f32 1.442695, %v1012_v46 }
 0x171   : > { %v3198_v43 = vpop.eup %2222  ;;  %2242 = vpow2.f32 %v1124_v19  ;;  %v1375_v30 = vadd.f32 %v1374_v31, %v3203_v27  ;;  %v1020_v57 = vsub.f32 %v2881_v50, %v902_v47  ;;  %v3215_v37 = vsel %vm989_vm0, %v2221_v52, 0.0  ;;  %v1502_v50 = vld [vmem:[%s4155_s2] sm:$0x7]  ;;  %v4393_v27 = vld [vmem:[#allocation42_spill] sm:$0xff] }
 0x172   : > { %v3207_v17 = vpop.eup %2224  ;;  %2244 = vpow2.f32 %v1126_v0  ;;  %v1378_v58 = vadd.f32 %v3194_v59, %v3189_v55  ;;  %v1132_v45 = vmul.f32 1.442695, %v1013_v26  ;;  %v1021_v48 = vsub.f32 %v2884_v51, %v902_v47 }
 0x173   : > { %v2227_v33 = vpop.eup %2226  ;;  %2246 = vpow2.f32 %v1116_v5  ;;  %v1022_v24 = vsub.f32 %v2896_v61, %v902_v47  ;;  %1376 = vadd.xlane.f32.xlu1 %v1375_v30  ;;  %v910_v14 = vpop.xlane.xlu1 %909  ;;  %v1017_v15 = vsub.f32 %v2863_v28, %v898_v25  ;;  %v1018_v12 = vsub.f32 %v2866_v29, %v898_v25 }
 0x174   : > { %v3210_v7 = vpop.eup %2228  ;;  %2248 = vpow2.f32 %v1118_v39  ;;  %v1379_v19 = vadd.f32 %v1378_v58, %v3215_v37  ;;  %v1019_v51 = vsub.f32 %v2887_v53, %v898_v25  ;;  %v3234_v61 = vsel %vm989_vm0, %v2227_v33, 0.0  ;;  %v906_v5 = vpop.xlane.xlu0 %905 }
 0x175   : > { %4321 = vst [vmem:[#allocation56_spill] sm:$0xff] %v3210_v7  ;;  %v3219_v6 = vpop.eup %2230  ;;  %2250 = vpow2.f32 %v1120_v8  ;;  %4324 = vst [vmem:[#allocation59_spill] sm:$0xff] %v3234_v61  ;;  %v1382_v4 = vadd.f32 %v3207_v17, %v3198_v43  ;;  %v1146_v28 = vmul.f32 1.442695, %v1020_v57  ;;  %v3241_v29 = vrot.slane %v1502_v50, %v2753_v38 }
 0x176   : > { %4322 = vst [vmem:[#allocation57_spill] sm:$0xff] %v3219_v6  ;;  %v2233_v13 = vpop.eup %2232  ;;  %2252 = vpow2.f32 %v1134_v18  ;;  %1380 = vadd.xlane.f32.xlu0 %v1379_v19  ;;  %v1026_v56 = vsub.f32 %v2905_v10, %v910_v14  ;;  %v1148_v53 = vmul.f32 1.442695, %v1021_v48  ;;  %v3246_v47 = vrot.slane %v1502_v50, %v2746_v35 }
 0x177   : > { %v3229_v0 = vpop.eup %2234  ;;  %2254 = vpow2.f32 %v1136_v20  ;;  %v1383_v46 = vadd.f32 %v1382_v4, %v3234_v61  ;;  %v1150_v39 = vmul.f32 1.442695, %v1022_v24  ;;  %v1140_v8 = vmul.f32 1.442695, %v1017_v15 }
 0x178   : > { %4323 = vst [vmem:[#allocation58_spill] sm:$0xff] %v3229_v0  ;;  %v3238_v40 = vpop.eup %2236  ;;  %2256 = vpow2.f32 %v1138_v1  ;;  %v1142_v26 = vmul.f32 1.442695, %v1018_v12  ;;  %v1144_v18 = vmul.f32 1.442695, %v1019_v51  ;;  %v1027_v10 = vsub.f32 %v2908_v11, %v910_v14  ;;  %v918_v1 = vpop.xlane.xlu1 %917 }
 0x179   : > { %4325 = vst [vmem:[#allocation60_spill] sm:$0xff] %v3238_v40  ;;  %v2239_v16 = vpop.eup %2238  ;;  %2258 = vpow2.f32 %v1128_v2  ;;  %v1028_v20 = vsub.f32 %v2923_v22, %v910_v14  ;;  %1384 = vadd.xlane.f32.xlu1 %v1383_v46  ;;  %v1158_v33 = vmul.f32 1.442695, %v1026_v56  ;;  %v1023_v2 = vsub.f32 %v2890_v54, %v906_v5  ;;  %v914_v24 = vpop.xlane.xlu0 %913  ;;  %v4333_v56 = vld [vmem:[#allocation8_spill] sm:$0xff] }
 0x17a   : > { %v3248_v52 = vpop.eup %2240  ;;  %2260 = vpow2.f32 %v1130_v3  ;;  %v3257_v3 = vsel %vm989_vm0, %v2233_v13, 0.0  ;;  %v1024_v57 = vsub.f32 %v2893_v60, %v906_v5  ;;  %v1025_v11 = vsub.f32 %v2920_v21, %v906_v5  ;;  %v4330_v13 = vld [vmem:[#allocation5_spill] sm:$0xff] }
 0x17b   : > { %4326 = vst [vmem:[#allocation61_spill] sm:$0xff] %v3248_v52  ;;  %v3250_v31 = vpop.eup %2242  ;;  %2262 = vpow2.f32 %v1132_v45  ;;  %v1390_v22 = vadd.f32 %v3219_v6, %v3210_v7  ;;  %v1032_v45 = vsub.f32 %v2938_v49, %v918_v1  ;;  %v3270_v54 = vsel %vm989_vm0, %v2239_v16, 0.0  ;;  %v4334_v16 = vld [vmem:[#allocation12_spill] sm:$0xff] }
 0x17c   : > { %4327 = vst [vmem:[#allocation62_spill] sm:$0xff] %v3250_v31  ;;  %v2245_v25 = vpop.eup %2244  ;;  %2264 = vpow2.f32 %v1146_v28  ;;  %v1386_v48 = vadd.f32 %v3238_v40, %v3229_v0  ;;  %v1160_v60 = vmul.f32 1.442695, %v1027_v10  ;;  %v3276_v15 = vrot.slane %v1502_v50, %v4330_v13  ;;  %v926_v46 = vpop.xlane.xlu1 %925  ;;  %v4343_v13 = vld [vmem:[#allocation17_spill] sm:$0xff]  ;;  %v4360_v0 = vld [vmem:[#allocation20_spill] sm:$0xff] }
 0x17d   : > { %v3259_v30 = vpop.eup %2246  ;;  %2266 = vpow2.f32 %v1148_v53  ;;  %v1391_v21 = vadd.f32 %v1390_v22, %v3257_v3  ;;  %v1162_v49 = vmul.f32 1.442695, %v1028_v20  ;;  %v1152_v19 = vmul.f32 1.442695, %v1023_v2  ;;  %v4337_v2 = vld [vmem:[#allocation7_spill] sm:$0xff] }
 0x17e   : > { %4328 = vst [vmem:[#allocation63_spill] sm:$0xff] %v3259_v30  ;;  %v3265_v58 = vpop.eup %2248  ;;  %2268 = vpow2.f32 %v1150_v39  ;;  %v1387_v51 = vadd.f32 %v1386_v48, %v3270_v54  ;;  %v1154_v28 = vmul.f32 1.442695, %v1024_v57  ;;  %v1033_v5 = vsub.f32 %v4333_v56, %v918_v1 }
 0x17f   : > { %4329 = vst [vmem:[#allocation64_spill] sm:$0xff] %v3265_v58  ;;  %v2251_v14 = vpop.eup %2250  ;;  %2270 = vpow2.f32 %v1140_v8  ;;  %v1034_v53 = vsub.f32 %v4334_v16, %v918_v1  ;;  %1392 = vadd.xlane.f32.xlu1 %v1391_v21  ;;  %v1156_v50 = vmul.f32 1.442695, %v1025_v11  ;;  %v1170_v8 = vmul.f32 1.442695, %v1032_v45  ;;  %v4340_v11 = vld [vmem:[#allocation13_spill] sm:$0xff] }
 0x180   : > { %v3278_v12 = vpop.eup %2252  ;;  %2272 = vpow2.f32 %v1142_v26  ;;  %1388 = vadd.xlane.f32.xlu0 %v1387_v51  ;;  %v4335_v26 = vld [vmem:[#allocation6_spill] sm:$0xff]  ;;  %v1030_v22 = vsub.f32 %v4337_v2, %v914_v24  ;;  %v3292_v48 = vsel %vm989_vm0, %v2245_v25, 0.0  ;;  %v1039_v45 = vsub.f32 %v4340_v11, %v926_v46  ;;  %v922_v51 = vpop.xlane.xlu0 %921 }
 0x181   : > { %4331 = vst [vmem:[#allocation65_spill] sm:$0xff] %v3278_v12  ;;  %v3281_v4 = vpop.eup %2254  ;;  %2274 = vpow2.f32 %v1144_v18  ;;  %v1029_v10 = vsub.f32 %v4335_v26, %v914_v24  ;;  %v4338_v18 = vld [vmem:[#allocation9_spill] sm:$0xff]  ;;  %v1398_v21 = vadd.f32 %v3250_v31, %v3248_v52  ;;  %v1172_v56 = vmul.f32 1.442695, %v1033_v5  ;;  %v934_v11 = vpop.xlane.xlu1 %933 }
 0x182   : > { %4332 = vst [vmem:[#allocation66_spill] sm:$0xff] %v3281_v4  ;;  %v2257_v39 = vpop.eup %2256  ;;  %2276 = vpow2.f32 %v1158_v33  ;;  %v1031_v57 = vsub.f32 %v4338_v18, %v914_v24  ;;  %v1038_v33 = vsub.f32 %v2965_v34, %v926_v46  ;;  %v3302_v24 = vsel %vm989_vm0, %v2251_v14, 0.0 }
 0x183   : > { %v3286_v20 = vpop.eup %2258  ;;  %2278 = vpow2.f32 %v1160_v60  ;;  %v1394_v25 = vadd.f32 %v3265_v58, %v3259_v30  ;;  %v1174_v34 = vmul.f32 1.442695, %v1034_v53  ;;  %v1399_v26 = vadd.f32 %v1398_v21, %v3292_v48  ;;  %v4345_v53 = vld [vmem:[#allocation10_spill] sm:$0xff]  ;;  %v4346_v21 = vld [vmem:[#allocation11_spill] sm:$0xff] }
 0x184   : > { %4336 = vst [vmem:[#allocation8_spill] sm:$0xff] %v3286_v20  ;;  %v3294_v1 = vpop.eup %2260  ;;  %2280 = vpow2.f32 %v1162_v49  ;;  %v1164_v49 = vmul.f32 1.442695, %v1029_v10  ;;  %v1166_v18 = vmul.f32 1.442695, %v1030_v22  ;;  %v1040_v31 = vsub.f32 %v4343_v13, %v926_v46  ;;  %v4349_v46 = vld [vmem:[#allocation18_spill] sm:$0xff] }
 0x185   : > { %4339 = vst [vmem:[#allocation12_spill] sm:$0xff] %v3294_v1  ;;  %v2263_v60 = vpop.eup %2262  ;;  %2282 = vpow2.f32 %v1152_v19  ;;  %v1168_v19 = vmul.f32 1.442695, %v1031_v57  ;;  %v1395_v5 = vadd.f32 %v1394_v25, %v3302_v24  ;;  %v1182_v58 = vmul.f32 1.442695, %v1038_v33  ;;  %1400 = vadd.xlane.f32.xlu1 %v1399_v26  ;;  %v942_v52 = vpop.xlane.xlu1 %941 }
 0x186   : > { %v3306_v16 = vpop.eup %2264  ;;  %2284 = vpow2.f32 %v1154_v28  ;;  %v1184_v30 = vmul.f32 1.442695, %v1039_v45  ;;  %v1035_v10 = vsub.f32 %v4345_v53, %v922_v51  ;;  %v3319_v22 = vsel %vm989_vm0, %v2257_v39, 0.0  ;;  %v3330_v25 = vld [vmem:[%s4155_s2 + $0x3] sm:$0x7]  ;;  %v4351_v39 = vld [vmem:[#allocation19_spill] sm:$0xff] }
 0x187   : > { %4341 = vst [vmem:[#allocation6_spill] sm:$0xff] %v3306_v16  ;;  %v3309_v2 = vpop.eup %2266  ;;  %2286 = vpow2.f32 %v1156_v50  ;;  %1396 = vadd.xlane.f32.xlu0 %v1395_v5  ;;  %v1036_v50 = vsub.f32 %v4346_v21, %v922_v51  ;;  %v1044_v33 = vsub.f32 %v4349_v46, %v934_v11  ;;  %v1406_v45 = vadd.f32 %v3281_v4, %v3278_v12  ;;  %v4352_v53 = vld [vmem:[#allocation23_spill] sm:$0xff] }
 0x188   : > { %4342 = vst [vmem:[#allocation7_spill] sm:$0xff] %v3309_v2  ;;  %v2269_v14 = vpop.eup %2268  ;;  %2288 = vpow2.f32 %v1170_v8  ;;  %v4348_v8 = vld [vmem:[#allocation16_spill] sm:$0xff]  ;;  %4350 = vst [vmem:[#allocation17_spill] sm:$0xff] %v3330_v25  ;;  %v1045_v5 = vsub.f32 %v4351_v39, %v934_v11  ;;  %v1046_v21 = vsub.f32 %v4352_v53, %v934_v11  ;;  %v1402_v4 = vadd.f32 %v3294_v1, %v3286_v20  ;;  %v4442_v23 = vld [vmem:[#allocation65_spill] sm:$0xff] }
 0x189   : > { %v3313_v28 = vpop.eup %2270  ;;  %2290 = vpow2.f32 %v1172_v56  ;;  %v1037_v13 = vsub.f32 %v4348_v8, %v922_v51  ;;  %v930_v56 = vpop.xlane.xlu0 %929  ;;  %v3336_v51 = vsel %vm989_vm0, %v2263_v60, 0.0  ;;  %v1186_v8 = vmul.f32 1.442695, %v1040_v31 }
 0x18a   : > { %4344 = vst [vmem:[#allocation9_spill] sm:$0xff] %v3313_v28  ;;  %v3321_v57 = vpop.eup %2272  ;;  %2292 = vpow2.f32 %v1174_v34  ;;  %v1407_v46 = vadd.f32 %v1406_v45, %v3319_v22  ;;  %v1178_v39 = vmul.f32 1.442695, %v1036_v50  ;;  %v3347_v11 = vrot.slane %v3330_v25, %v2753_v38  ;;  %v4359_v38 = vld [vmem:[#allocation15_spill] sm:$0xff]  ;;  %v950_v7 = vpop.xlane.xlu1 %949 }
 0x18b   : > { %4347 = vst [vmem:[#allocation13_spill] sm:$0xff] %v3321_v57  ;;  %v2275_v26 = vpop.eup %2274  ;;  %2294 = vpow2.f32 %v1164_v49  ;;  %v1176_v49 = vmul.f32 1.442695, %v1035_v10  ;;  %v1180_v53 = vmul.f32 1.442695, %v1037_v13  ;;  %v1403_v31 = vadd.f32 %v1402_v4, %v3336_v51  ;;  %v4361_v13 = vld [vmem:[#allocation24_spill] sm:$0xff] }
 0x18c   : > { %v3338_v34 = vpop.eup %2276  ;;  %2296 = vpow2.f32 %v1166_v18  ;;  %4355 = vst [vmem:[#allocation16_spill] sm:$0xff] %v3347_v11  ;;  %v1194_v18 = vmul.f32 1.442695, %v1044_v33  ;;  %1408 = vadd.xlane.f32.xlu1 %v1407_v46  ;;  %v1196_v1 = vmul.f32 1.442695, %v1045_v5  ;;  %v1042_v40 = vsub.f32 %v4359_v38, %v930_v56 }
 0x18d   : > { %4353 = vst [vmem:[#allocation10_spill] sm:$0xff] %v3338_v34  ;;  %v3343_v12 = vpop.eup %2278  ;;  %2298 = vpow2.f32 %v1168_v19  ;;  %v1198_v20 = vmul.f32 1.442695, %v1046_v21  ;;  %v4357_v19 = vld [vmem:[#allocation14_spill] sm:$0xff]  ;;  %1404 = vadd.xlane.f32.xlu0 %v1403_v31  ;;  %v1050_v33 = vsub.f32 %v4361_v13, %v942_v52  ;;  %v938_v46 = vpop.xlane.xlu0 %937  ;;  %v1414_v4 = vadd.f32 %v3309_v2, %v3306_v16  ;;  %v4366_v13 = vld [vmem:[#allocation21_spill] sm:$0xff] }
 0x18e   : > { %4354 = vst [vmem:[#allocation11_spill] sm:$0xff] %v3343_v12  ;;  %v2281_v60 = vpop.eup %2280  ;;  %2300 = vpow2.f32 %v1182_v58  ;;  %v1041_v10 = vsub.f32 %v4357_v19, %v930_v56  ;;  %v1043_v58 = vsub.f32 %v4360_v0, %v930_v56  ;;  %v3366_v5 = vsel %vm989_vm0, %v2275_v26, 0.0  ;;  %v4363_v0 = vld [vmem:[#allocation25_spill] sm:$0xff] }
 0x18f   : > { %v3350_v45 = vpop.eup %2282  ;;  %2302 = vpow2.f32 %v1184_v30  ;;  %v3360_v30 = vsel %vm989_vm0, %v2269_v14, 0.0  ;;  %v1051_v56 = vsub.f32 %v4363_v0, %v942_v52  ;;  %v1047_v2 = vsub.f32 %v4366_v13, %v938_v46 }
 0x190   : > { %4356 = vst [vmem:[#allocation18_spill] sm:$0xff] %v3350_v45  ;;  %v3353_v50 = vpop.eup %2284  ;;  %2304 = vpow2.f32 %v1186_v8  ;;  %v4364_v8 = vld [vmem:[#allocation29_spill] sm:$0xff]  ;;  %v1188_v14 = vmul.f32 1.442695, %v1041_v10  ;;  %v1415_v38 = vadd.f32 %v1414_v4, %v3360_v30  ;;  %v1190_v16 = vmul.f32 1.442695, %v1042_v40 }
 0x191   : > { %4358 = vst [vmem:[#allocation19_spill] sm:$0xff] %v3353_v50  ;;  %v2287_v6 = vpop.eup %2286  ;;  %2306 = vpow2.f32 %v1176_v49  ;;  %v1052_v31 = vsub.f32 %v4364_v8, %v942_v52  ;;  %v1410_v49 = vadd.f32 %v3321_v57, %v3313_v28  ;;  %v3381_v52 = vrot.slane %v3330_v25, %v2746_v35  ;;  %v4383_v28 = vld [vmem:[#allocation32_spill] sm:$0xff] }
 0x192   : > { %v3368_v21 = vpop.eup %2288  ;;  %2308 = vpow2.f32 %v1178_v39  ;;  %v1192_v10 = vmul.f32 1.442695, %v1043_v58  ;;  %v1206_v4 = vmul.f32 1.442695, %v1050_v33  ;;  %1416 = vadd.xlane.f32.xlu1 %v1415_v38  ;;  %v1208_v40 = vmul.f32 1.442695, %v1051_v56 }
 0x193   : > { %4362 = vst [vmem:[#allocation23_spill] sm:$0xff] %v3368_v21  ;;  %v3374_v19 = vpop.eup %2290  ;;  %2310 = vpow2.f32 %v1180_v53  ;;  %v1411_v39 = vadd.f32 %v1410_v49, %v3366_v5  ;;  %4367 = vst [vmem:[#allocation15_spill] sm:$0xff] %v3381_v52  ;;  %v3387_v53 = vmul.f32 %v3241_v29, %v3215_v37  ;;  %v4371_v49 = vld [vmem:[#allocation22_spill] sm:$0xff]  ;;  %v4372_v52 = vld [vmem:[#allocation28_spill] sm:$0xff]  ;;  %v1200_v57 = vmul.f32 1.442695, %v1047_v2 }
 0x194   : > { %4365 = vst [vmem:[#allocation14_spill] sm:$0xff] %v3374_v19  ;;  %v2293_v26 = vpop.eup %2292  ;;  %2312 = vpow2.f32 %v1194_v18  ;;  %v1210_v18 = vmul.f32 1.442695, %v1052_v31  ;;  %v1048_v13 = vsub.f32 %v4371_v49, %v938_v46  ;;  %v1049_v25 = vsub.f32 %v4372_v52, %v938_v46  ;;  %v4374_v33 = vld [vmem:[#allocation30_spill] sm:$0xff]  ;;  %v4375_v56 = vld [vmem:[#allocation31_spill] sm:$0xff] }
 0x195   : > { %v3383_v0 = vpop.eup %2294  ;;  %4369 = vst [vmem:[#allocation24_spill] sm:$0xff] %v3387_v53  ;;  %2314 = vpow2.f32 %v1196_v1  ;;  %1412 = vadd.xlane.f32.xlu0 %v1411_v39  ;;  %v3395_v37 = vsel %vm989_vm0, %v2281_v60, 0.0  ;;  %v946_v1 = vpop.xlane.xlu0 %945  ;;  %v1057_v31 = vsub.f32 %v4375_v56, %v950_v7  ;;  %v1422_v38 = vadd.f32 %v3343_v12, %v3338_v34  ;;  %v4377_v46 = vld [vmem:[#allocation35_spill] sm:$0xff] }
 0x196   : > { %4368 = vst [vmem:[#allocation20_spill] sm:$0xff] %v3383_v0  ;;  %v3389_v8 = vpop.eup %2296  ;;  %2316 = vpow2.f32 %v1198_v20  ;;  %v1056_v20 = vsub.f32 %v4374_v33, %v950_v7  ;;  %v1058_v2 = vsub.f32 %v4377_v46, %v950_v7  ;;  %v3408_v60 = vsel %vm989_vm0, %v2287_v6, 0.0  ;;  %v4378_v33 = vld [vmem:[#allocation26_spill] sm:$0xff]  ;;  %v958_v12 = vpop.xlane.xlu1 %957 }
 0x197   : > { %4370 = vst [vmem:[#allocation25_spill] sm:$0xff] %v3389_v8  ;;  %v2299_v35 = vpop.eup %2298  ;;  %2318 = vpow2.f32 %v1188_v14  ;;  %v1418_v14 = vadd.f32 %v3353_v50, %v3350_v45  ;;  %v1202_v52 = vmul.f32 1.442695, %v1048_v13  ;;  %v1423_v49 = vadd.f32 %v1422_v38, %v3395_v37  ;;  %v4382_v38 = vld [vmem:[#allocation27_spill] sm:$0xff] }
 0x198   : > { %v3397_v58 = vpop.eup %2300  ;;  %2320 = vpow2.f32 %v1190_v16  ;;  %v1053_v56 = vsub.f32 %v4378_v33, %v946_v1  ;;  %v3420_v7 = vmul.f32 %v3241_v29, %v3257_v3  ;;  %v1204_v6 = vmul.f32 1.442695, %v1049_v25 }
 0x199   : > { %4373 = vst [vmem:[#allocation29_spill] sm:$0xff] %v3397_v58  ;;  %v3403_v39 = vpop.eup %2302  ;;  %2322 = vpow2.f32 %v1192_v10  ;;  %v1419_v10 = vadd.f32 %v1418_v14, %v3408_v60  ;;  %v1220_v13 = vmul.f32 1.442695, %v1057_v31  ;;  %1424 = vadd.xlane.f32.xlu1 %v1423_v49  ;;  %v1054_v50 = vsub.f32 %v4382_v38, %v946_v1  ;;  %v954_v14 = vpop.xlane.xlu0 %953 }
 0x19a   : > { %4376 = vst [vmem:[#allocation21_spill] sm:$0xff] %v3403_v39  ;;  %v3412_v16 = vpop.eup %2304  ;;  %2324 = vpow2.f32 %v1206_v4  ;;  %4380 = vst [vmem:[#allocation28_spill] sm:$0xff] %v3420_v7  ;;  %v1218_v4 = vmul.f32 1.442695, %v1056_v20  ;;  %v1222_v45 = vmul.f32 1.442695, %v1058_v2  ;;  %v1055_v53 = vsub.f32 %v4383_v28, %v946_v1 }
 0x19b   : > { %v3416_v34 = vpop.eup %2306  ;;  %2326 = vpow2.f32 %v1208_v40  ;;  %1420 = vadd.xlane.f32.xlu0 %v1419_v10  ;;  %v3429_v3 = vsel %vm989_vm0, %v2293_v26, 0.0  ;;  %v1212_v40 = vmul.f32 1.442695, %v1053_v56  ;;  %v1430_v31 = vadd.f32 %v3374_v19, %v3368_v21  ;;  %v4388_v28 = vld [vmem:[#allocation41_spill] sm:$0xff] }
 0x19c   : > { %4379 = vst [vmem:[#allocation22_spill] sm:$0xff] %v3416_v34  ;;  %v3423_v46 = vpop.eup %2308  ;;  %2328 = vpow2.f32 %v1210_v18  ;;  %v4385_v18 = vld [vmem:[#allocation36_spill] sm:$0xff]  ;;  %v1064_v1 = vsub.f32 %v4388_v28, %v958_v12  ;;  %v3442_v26 = vsel %vm989_vm0, %v2299_v35, 0.0  ;;  %v1426_v38 = vadd.f32 %v3389_v8, %v3383_v0  ;;  %v4390_v28 = vld [vmem:[#allocation34_spill] sm:$0xff] }
 0x19d   : > { %4381 = vst [vmem:[#allocation30_spill] sm:$0xff] %v3423_v46  ;;  %v2311_v33 = vpop.eup %2310  ;;  %2330 = vpow2.f32 %v1200_v57  ;;  %v1062_v20 = vsub.f32 %v4385_v18, %v958_v12  ;;  %v4387_v57 = vld [vmem:[#allocation37_spill] sm:$0xff]  ;;  %v1431_v56 = vadd.f32 %v1430_v31, %v3429_v3  ;;  %v966_v18 = vpop.xlane.xlu1 %965  ;;  %v1060_v21 = vsub.f32 %v4390_v28, %v954_v14 }
 0x19e   : > { %v3431_v25 = vpop.eup %2312  ;;  %2332 = vpow2.f32 %v1202_v52  ;;  %v1063_v2 = vsub.f32 %v4387_v57, %v958_v12  ;;  %v1214_v52 = vmul.f32 1.442695, %v1054_v50  ;;  %v4389_v57 = vld [vmem:[#allocation33_spill] sm:$0xff]  ;;  %v1427_v50 = vadd.f32 %v1426_v38, %v3442_v26 }
 0x19f   : > { %4384 = vst [vmem:[#allocation31_spill] sm:$0xff] %v3431_v25  ;;  %v3436_v49 = vpop.eup %2314  ;;  %2334 = vpow2.f32 %v1204_v6  ;;  %v1216_v6 = vmul.f32 1.442695, %v1055_v53  ;;  %v1059_v12 = vsub.f32 %v4389_v57, %v954_v14  ;;  %v1230_v7 = vmul.f32 1.442695, %v1062_v20  ;;  %1432 = vadd.xlane.f32.xlu1 %v1431_v56  ;;  %v962_v20 = vpop.xlane.xlu0 %961 }
 0x1a0   : > { %4386 = vst [vmem:[#allocation35_spill] sm:$0xff] %v3436_v49  ;;  %v3444_v10 = vpop.eup %2316  ;;  %2336 = vpow2.f32 %v1218_v4  ;;  %v4392_v4 = vld [vmem:[#allocation40_spill] sm:$0xff]  ;;  %v1232_v8 = vmul.f32 1.442695, %v1063_v2  ;;  %v1234_v0 = vmul.f32 1.442695, %v1064_v1  ;;  %1428 = vadd.xlane.f32.xlu0 %v1427_v50 }
 0x1a1   : > { %v3449_v19 = vpop.eup %2318  ;;  %2338 = vpow2.f32 %v1220_v13  ;;  %v1061_v31 = vsub.f32 %v4392_v4, %v954_v14  ;;  %v1068_v13 = vsub.f32 %v3085_v9, %v966_v18  ;;  %v1224_v57 = vmul.f32 1.442695, %v1059_v12  ;;  %v4395_v12 = vld [vmem:[#allocation38_spill] sm:$0xff]  ;;  %v974_v4 = vpop.xlane.xlu1 %973 }
 0x1a2   : > { %v3453_v35 = vpop.eup %2320  ;;  %2340 = vpow2.f32 %v1222_v45  ;;  %v1226_v28 = vmul.f32 1.442695, %v1060_v21  ;;  %v1069_v45 = vsub.f32 %v4393_v27, %v966_v18  ;;  %v1438_v9 = vadd.f32 %v3403_v39, %v3397_v58  ;;  %v4394_v21 = vld [vmem:[#allocation46_spill] sm:$0xff] }
 0x1a3   : > { %4391 = vst [vmem:[#allocation26_spill] sm:$0xff] %v3453_v35  ;;  %v2323_v61 = vpop.eup %2322  ;;  %2342 = vpow2.f32 %v1212_v40  ;;  %v3466_v40 = vsel %vm989_vm0, %v3412_v16, 0.0  ;;  %v3472_v14 = vsel %vm989_vm0, %v2311_v33, 0.0  ;;  %v1228_v27 = vmul.f32 1.442695, %v1061_v31  ;;  %v4396_v31 = vld [vmem:[#allocation39_spill] sm:$0xff] }
 0x1a4   : > { %v3458_v53 = vpop.eup %2324  ;;  %2344 = vpow2.f32 %v1214_v52  ;;  %v1070_v1 = vsub.f32 %v4394_v21, %v966_v18  ;;  %v1434_v52 = vadd.f32 %v3423_v46, %v3416_v34  ;;  %v1242_v16 = vmul.f32 1.442695, %v1068_v13  ;;  %v4397_v18 = vld [vmem:[#allocation43_spill] sm:$0xff] }
 0x1a5   : > { %v3461_v56 = vpop.eup %2326  ;;  %2346 = vpow2.f32 %v1216_v6  ;;  %v1439_v6 = vadd.f32 %v1438_v9, %v3466_v40  ;;  %v1065_v50 = vsub.f32 %v4395_v12, %v962_v20  ;;  %v1066_v39 = vsub.f32 %v4396_v31, %v962_v20  ;;  %v4400_v12 = vld [vmem:[#allocation49_spill] sm:$0xff]  ;;  %v970_v31 = vpop.xlane.xlu0 %969  ;;  %v4401_v34 = vld [vmem:[#allocation51_spill] sm:$0xff] }
 0x1a6   : > { %v3474_v2 = vpop.eup %2328  ;;  %2348 = vpow2.f32 %v1230_v7  ;;  %v1435_v7 = vadd.f32 %v1434_v52, %v3472_v14  ;;  %v1067_v21 = vsub.f32 %v4397_v18, %v962_v20  ;;  %v3490_v46 = vmul.f32 %v3241_v29, %v3270_v54 }
 0x1a7   : > { %v3479_v38 = vpop.eup %2330  ;;  %2350 = vpow2.f32 %v1232_v8  ;;  %v3494_v8 = vmul.f32 %v3241_v29, %v3292_v48  ;;  %v1244_v13 = vmul.f32 1.442695, %v1069_v45  ;;  %1440 = vadd.xlane.f32.xlu1 %v1439_v6  ;;  %v1236_v52 = vmul.f32 1.442695, %v1065_v50  ;;  %v982_v50 = vpop.xlane.xlu1 %981 }
 0x1a8   : > { %v3483_v33 = vpop.eup %2332  ;;  %2352 = vpow2.f32 %v1234_v0  ;;  %4398 = vst [vmem:[#allocation27_spill] sm:$0xff] %v3490_v46  ;;  %v1246_v0 = vmul.f32 1.442695, %v1070_v1  ;;  %1436 = vadd.xlane.f32.xlu0 %v1435_v7  ;;  %v1074_v20 = vsub.f32 %v4400_v12, %v974_v4  ;;  %v1238_v54 = vmul.f32 1.442695, %v1066_v39  ;;  %v4403_v7 = vld [vmem:[#allocation45_spill] sm:$0xff] }
 0x1a9   : > { %v2335_v58 = vpop.eup %2334  ;;  %4399 = vst [vmem:[#allocation32_spill] sm:$0xff] %v3494_v8  ;;  %2354 = vpow2.f32 %v1224_v57  ;;  %v1075_v46 = vsub.f32 %v4401_v34, %v974_v4  ;;  %v3505_v48 = vsel %vm989_vm0, %v3444_v10, 0.0  ;;  %v1076_v45 = vsub.f32 %v3125_v62, %v974_v4  ;;  %v4402_v10 = vld [vmem:[#allocation44_spill] sm:$0xff] }
 0x1aa   : > { %v3496_v9 = vpop.eup %2336  ;;  %2356 = vpow2.f32 %v1226_v28  ;;  %v1240_v28 = vmul.f32 1.442695, %v1067_v21  ;;  %v1446_v1 = vadd.f32 %v3436_v49, %v3431_v25  ;;  %v3514_v39 = vsel %vm989_vm0, %v2323_v61, 0.0  ;;  %v4404_v49 = vld [vmem:[#allocation50_spill] sm:$0xff] }
 0x1ab   : > { %v3499_v18 = vpop.eup %2338  ;;  %2358 = vpow2.f32 %v1228_v27  ;;  %v1442_v34 = vadd.f32 %v3453_v35, %v3449_v19  ;;  %v1071_v27 = vsub.f32 %v4402_v10, %v970_v31  ;;  %v1254_v62 = vmul.f32 1.442695, %v1074_v20  ;;  %v978_v20 = vpop.xlane.xlu0 %977 }
 0x1ac   : > { %v2341_v57 = vpop.eup %2340  ;;  %2360 = vpow2.f32 %v1242_v16  ;;  %v1447_v4 = vadd.f32 %v1446_v1, %v3505_v48  ;;  %v1072_v21 = vsub.f32 %v4403_v7, %v970_v31  ;;  %v1073_v25 = vsub.f32 %v4404_v49, %v970_v31 }
 0x1ad   : > { %v3510_v6 = vpop.eup %2342  ;;  %2362 = vpow2.f32 %v1244_v13  ;;  %v1256_v13 = vmul.f32 1.442695, %v1075_v46  ;;  %v1443_v61 = vadd.f32 %v1442_v34, %v3514_v39  ;;  %v1258_v10 = vmul.f32 1.442695, %v1076_v45 }
 0x1ae   : > { %v3519_v16 = vpop.eup %2344  ;;  %2364 = vpow2.f32 %v1246_v0  ;;  %1448 = vadd.xlane.f32.xlu1 %v1447_v4  ;;  %v1080_v35 = vsub.f32 %v3138_v32, %v982_v50  ;;  %v1081_v0 = vsub.f32 %v3142_v41, %v982_v50  ;;  %v1082_v46 = vsub.f32 %v3148_v63, %v982_v50  ;;  %v4407_v4 = vld [vmem:[#allocation47_spill] sm:$0xff] }
 0x1af   : > { %v2347_v12 = vpop.eup %2346  ;;  %2366 = vpow2.f32 %v1236_v52  ;;  %1444 = vadd.xlane.f32.xlu0 %v1443_v61  ;;  %v1248_v52 = vmul.f32 1.442695, %v1071_v27  ;;  %v3535_v49 = vsel %vm989_vm0, %v3474_v2, 0.0  ;;  %v1252_v45 = vmul.f32 1.442695, %v1073_v25 }
 0x1b0   : > { %v3525_v8 = vpop.eup %2348  ;;  %2368 = vpow2.f32 %v1238_v54  ;;  %4405 = vst [vmem:[#allocation36_spill] sm:$0xff] %v3535_v49  ;;  %v1250_v54 = vmul.f32 1.442695, %v1072_v21  ;;  %v1454_v32 = vadd.f32 %v3461_v56, %v3458_v53  ;;  %v1268_v34 = vmul.f32 1.442695, %v1081_v0  ;;  %v4408_v21 = vld [vmem:[#allocation48_spill] sm:$0xff] }
 0x1b1   : > { %v3529_v1 = vpop.eup %2350  ;;  %2370 = vpow2.f32 %v1240_v28  ;;  %v1266_v28 = vmul.f32 1.442695, %v1080_v35  ;;  %v3543_v63 = vsel %vm989_vm0, %v2335_v58, 0.0  ;;  %v1270_v2 = vmul.f32 1.442695, %v1082_v46 }
 0x1b2   : > { %v2353_v31 = vpop.eup %2352  ;;  %2372 = vpow2.f32 %v1254_v62  ;;  %4406 = vst [vmem:[#allocation37_spill] sm:$0xff] %v3543_v63  ;;  %v1455_v50 = vadd.f32 %v1454_v32, %v3535_v49  ;;  %v1450_v25 = vadd.f32 %v3483_v33, %v3479_v38  ;;  %v1077_v7 = vsub.f32 %v4407_v4, %v978_v20  ;;  %v4428_v49 = vld [vmem:[#allocation56_spill] sm:$0xff] }
 0x1b3   : > { %v3539_v41 = vpop.eup %2354  ;;  %2374 = vpow2.f32 %v1256_v13  ;;  %v1078_v35 = vsub.f32 %v4408_v21, %v978_v20  ;;  %v4409_v13 = vld [vmem:[#allocation54_spill] sm:$0xff]  ;;  %v1462_v46 = vadd.f32 %v3499_v18, %v3496_v9  ;;  %v3566_v4 = vmul.f32 %v3241_v29, %v3302_v24 }
 0x1b4   : > { %v3545_v27 = vpop.eup %2356  ;;  %2376 = vpow2.f32 %v1258_v10  ;;  %v1079_v61 = vsub.f32 %v4409_v13, %v978_v20  ;;  %1456 = vadd.xlane.f32.xlu1 %v1455_v50  ;;  %v1451_v58 = vadd.f32 %v1450_v25, %v3543_v63  ;;  %v3558_v10 = vsel %vm989_vm0, %v2341_v57, 0.0  ;;  %v4412_v63 = vld [vmem:[#allocation52_spill] sm:$0xff] }
 0x1b5   : > { %v2359_v62 = vpop.eup %2358  ;;  %2378 = vpow2.f32 %v1248_v52  ;;  %4410 = vst [vmem:[#allocation41_spill] sm:$0xff] %v3558_v10  ;;  %v986_v52 = vpop.xlane.xlu0 %985  ;;  %v3570_v20 = vmul.f32 %v3241_v29, %v3319_v22  ;;  %v1262_v57 = vmul.f32 1.442695, %v1078_v35  ;;  %v1463_v25 = vadd.f32 %v1462_v46, %v3558_v10 }
 0x1b6   : > { %v3553_v0 = vpop.eup %2360  ;;  %2380 = vpow2.f32 %v1250_v54  ;;  %v1260_v54 = vmul.f32 1.442695, %v1077_v7  ;;  %1452 = vadd.xlane.f32.xlu0 %v1451_v58  ;;  %v3575_v21 = vsel %vm989_vm0, %v2347_v12, 0.0  ;;  %v1264_v24 = vmul.f32 1.442695, %v1079_v61 }
 0x1b7   : > { %v3562_v32 = vpop.eup %2362  ;;  %2382 = vpow2.f32 %v1252_v45  ;;  %4411 = vst [vmem:[#allocation33_spill] sm:$0xff] %v3575_v21  ;;  %v1458_v22 = vadd.f32 %v3519_v16, %v3510_v6  ;;  %v1083_v45 = vsub.f32 %v4412_v63, %v986_v52  ;;  %v1085_v58 = vsub.f32 %v3157_v42, %v986_v52 }
 0x1b8   : > { %v2365_v50 = vpop.eup %2364  ;;  %2384 = vpow2.f32 %v1266_v28  ;;  %1464 = vadd.xlane.f32.xlu1 %v1463_v25  ;;  %v4413_v28 = vld [vmem:[#allocation53_spill] sm:$0xff]  ;;  %v3588_v12 = vsel %vm989_vm0, %v2353_v31, 0.0  ;;  %v1470_v63 = vadd.f32 %v3529_v1, %v3525_v8 }
 0x1b9   : > { %v3577_v13 = vpop.eup %2366  ;;  %2386 = vpow2.f32 %v1268_v34  ;;  %v1084_v35 = vsub.f32 %v4413_v28, %v986_v52  ;;  %4414 = vst [vmem:[#allocation34_spill] sm:$0xff] %v3588_v12  ;;  %v1459_v34 = vadd.f32 %v1458_v22, %v3575_v21  ;;  %v1272_v61 = vmul.f32 1.442695, %v1083_v45  ;;  %v4427_v21 = vld [vmem:[#allocation59_spill] sm:$0xff] }
 0x1ba   : > { %v3582_v7 = vpop.eup %2368  ;;  %2388 = vpow2.f32 %v1270_v2  ;;  %v3597_v2 = vmul.f32 %v3241_v29, %v3336_v51  ;;  %v1276_v52 = vmul.f32 1.442695, %v1085_v58  ;;  %v1471_v31 = vadd.f32 %v1470_v63, %v3588_v12 }
 0x1bb   : > { %v2371_v46 = vpop.eup %2370  ;;  %2390 = vpow2.f32 %v1260_v54  ;;  %v1274_v42 = vmul.f32 1.442695, %v1084_v35  ;;  %1460 = vadd.xlane.f32.xlu0 %v1459_v34  ;;  %v3604_v54 = vsel %vm989_vm0, %v2359_v62, 0.0  ;;  %v1466_v22 = vadd.f32 %v3545_v27, %v3539_v41 }
 0x1bc   : > { %v3593_v10 = vpop.eup %2372  ;;  %2392 = vpow2.f32 %v1262_v57  ;;  %4415 = vst [vmem:[#allocation40_spill] sm:$0xff] %v3604_v54  ;;  %v3610_v51 = vmul.f32 %v3241_v29, %v3360_v30  ;;  %v3614_v57 = vsel %vm989_vm0, %v2365_v50, 0.0  ;;  %v3622_v62 = vmul.f32 %v3241_v29, %v3366_v5  ;;  %1472 = vadd.xlane.f32.xlu1 %v1471_v31 }
 0x1bd   : > { %v3599_v25 = vpop.eup %2374  ;;  %2394 = vpow2.f32 %v1264_v24  ;;  %4416 = vst [vmem:[#allocation42_spill] sm:$0xff] %v3614_v57  ;;  %v1478_v24 = vadd.f32 %v3562_v32, %v3553_v0  ;;  %v1467_v35 = vadd.f32 %v1466_v22, %v3604_v54  ;;  %v3627_v30 = vsel %vm989_vm0, %v2371_v46, 0.0 }
 0x1be   : > { %v2377_v45 = vpop.eup %2376  ;;  %2396 = vpow2.f32 %v1272_v61  ;;  %4417 = vst [vmem:[#allocation46_spill] sm:$0xff] %v3627_v30  ;;  %v3633_v50 = vmul.f32 %v3241_v29, %v3395_v37  ;;  %v1474_v5 = vadd.f32 %v3582_v7, %v3577_v13  ;;  %v3640_v63 = vmul.f32 %v3241_v29, %v3408_v60 }
 0x1bf   : > { %v3618_v28 = vpop.eup %2378  ;;  %2398 = vpow2.f32 %v1274_v42  ;;  %v1479_v34 = vadd.f32 %v1478_v24, %v3614_v57  ;;  %1468 = vadd.xlane.f32.xlu0 %v1467_v35  ;;  %v3644_v46 = vsel %vm989_vm0, %v2377_v45, 0.0  ;;  %v1486_v37 = vadd.f32 %v3599_v25, %v3593_v10 }
 0x1c0   : > { %v3629_v58 = vpop.eup %2380  ;;  %2400 = vpow2.f32 %v1276_v52  ;;  %4419 = vst [vmem:[#allocation39_spill] sm:$0xff] %v3644_v46  ;;  %v1475_v31 = vadd.f32 %v1474_v5, %v3627_v30  ;;  %v1536_v60 = vmul.f32 %v3181_v44, %v3246_v47  ;;  %v1537_v45 = vmul.f32 %v3184_v36, %v3276_v15 }
 0x1c1   : > { %4418 = vst [vmem:[#allocation38_spill] sm:$0xff] %v3629_v58  ;;  %v2383_v61 = vpop.eup %2382  ;;  %v1482_v42 = vadd.f32 %v3629_v58, %v3618_v28  ;;  %v3665_v35 = vmul.f32 %v3241_v29, %v3429_v3  ;;  %v3669_v57 = vmul.f32 %v3241_v29, %v3442_v26  ;;  %v3673_v5 = vmul.f32 %v3347_v11, %v3466_v40 }
 0x1c2   : > { %v3650_v52 = vpop.eup %2384  ;;  %v3655_v22 = vsel %vm989_vm0, %v2383_v61, 0.0  ;;  %1480 = vadd.xlane.f32.xlu1 %v1479_v34  ;;  %v1487_v44 = vadd.f32 %v1486_v37, %v3644_v46  ;;  %v3678_v36 = vmul.f32 %v3241_v29, %v3472_v14  ;;  %v1542_v30 = vmul.f32 %v3198_v43, %v3246_v47 }
 0x1c3   : > { %4420 = vst [vmem:[#allocation43_spill] sm:$0xff] %v3650_v52  ;;  %4421 = vst [vmem:[#allocation49_spill] sm:$0xff] %v3655_v22  ;;  %v3661_v24 = vpop.eup %2386  ;;  %v1543_v26 = vmul.f32 %v3207_v17, %v3276_v15  ;;  %1476 = vadd.xlane.f32.xlu0 %v1475_v31  ;;  %v1483_v40 = vadd.f32 %v1482_v42, %v3655_v22  ;;  %v1539_v14 = vmul.f32 %v3189_v55, %v3246_v47  ;;  %v4426_v17 = vld [vmem:[#allocation55_spill] sm:$0xff] }
 0x1c4   : > { %4422 = vst [vmem:[#allocation51_spill] sm:$0xff] %v3661_v24  ;;  %v2389_v61 = vpop.eup %2388  ;;  %v1494_v3 = vadd.f32 %v3661_v24, %v3650_v52  ;;  %v1540_v37 = vmul.f32 %v3194_v59, %v3276_v15  ;;  %v1538_v12 = vmul.f32 %v3241_v29, %v4426_v17  ;;  %v1632_v31 = vadd.f32 %v1537_v45, %v1536_v60  ;;  %v4429_v24 = vld [vmem:[#allocation57_spill] sm:$0xff] }
 0x1c5   : > { %v3686_v54 = vpop.eup %2390  ;;  %v3691_v34 = vsel %vm989_vm0, %v2389_v61, 0.0  ;;  %v1544_v42 = vmul.f32 %v3241_v29, %v4427_v21  ;;  %v1640_v55 = vadd.f32 %v1543_v26, %v1542_v30  ;;  %v1548_v59 = vmul.f32 %v4428_v49, %v3246_v47  ;;  %v4432_v29 = vld [vmem:[#allocation58_spill] sm:$0xff] }
 0x1c6   : > { %4423 = vst [vmem:[#allocation44_spill] sm:$0xff] %v3686_v54  ;;  %4424 = vst [vmem:[#allocation45_spill] sm:$0xff] %v3691_v34  ;;  %v3697_v46 = vpop.eup %2392  ;;  %v1495_v43 = vadd.f32 %v1494_v3, %v3691_v34  ;;  %1488 = vadd.xlane.f32.xlu1 %v1487_v44  ;;  %v1549_v52 = vmul.f32 %v4429_v24, %v3276_v15  ;;  %v1636_v45 = vadd.f32 %v1540_v37, %v1539_v14  ;;  %v4433_v44 = vld [vmem:[#allocation60_spill] sm:$0xff] }
 0x1c7   : > { %4425 = vst [vmem:[#allocation50_spill] sm:$0xff] %v3697_v46  ;;  %v2395_v22 = vpop.eup %2394  ;;  %v1490_v61 = vadd.f32 %v3697_v46, %v3686_v54  ;;  %v1545_v21 = vmul.f32 %v4432_v29, %v3246_v47  ;;  %v1546_v17 = vmul.f32 %v4433_v44, %v3276_v15  ;;  %v3724_v49 = vmul.f32 %v3347_v11, %v3505_v48  ;;  %v4435_v44 = vld [vmem:[#allocation61_spill] sm:$0xff]  ;;  %v4436_v46 = vld [vmem:[#allocation62_spill] sm:$0xff] }
 0x1c8   : > { %v3710_v3 = vpop.eup %2396  ;;  %v3714_v60 = vsel %vm989_vm0, %v2395_v22, 0.0  ;;  %v3728_v24 = vmul.f32 %v3347_v11, %v3514_v39  ;;  %1484 = vadd.xlane.f32.xlu0 %v1483_v40  ;;  %v1648_v26 = vadd.f32 %v1549_v52, %v1548_v59  ;;  %v1633_v37 = vadd.f32 %v1632_v31, %v1538_v12  ;;  %v4439_v12 = vld [vmem:[#allocation64_spill] sm:$0xff] }
 0x1c9   : > { %4430 = vst [vmem:[#allocation47_spill] sm:$0xff] %v3710_v3  ;;  %4431 = vst [vmem:[#allocation48_spill] sm:$0xff] %v3714_v60  ;;  %v3720_v30 = vpop.eup %2398  ;;  %v1491_v22 = vadd.f32 %v1490_v61, %v3714_v60  ;;  %v1554_v34 = vmul.f32 %v4435_v44, %v3246_v47  ;;  %v1555_v48 = vmul.f32 %v4436_v46, %v3276_v15  ;;  %v4438_v61 = vld [vmem:[#allocation63_spill] sm:$0xff]  ;;  %v4440_v60 = vld [vmem:[#allocation24_spill] sm:$0xff] }
 0x1ca   : > { %4434 = vst [vmem:[#allocation54_spill] sm:$0xff] %v3720_v30  ;;  %v2401_v14 = vpop.eup %2400  ;;  %v1498_v29 = vadd.f32 %v3720_v30, %v3710_v3  ;;  %1496 = vadd.xlane.f32.xlu1 %v1495_v43  ;;  %v1644_v40 = vadd.f32 %v1546_v17, %v1545_v21  ;;  %v1551_v52 = vmul.f32 %v4438_v61, %v3246_v47  ;;  %v4441_v30 = vld [vmem:[#allocation28_spill] sm:$0xff]  ;;  %v4443_v21 = vld [vmem:[#allocation66_spill] sm:$0xff] }
 0x1cb   : > { %v3739_v39 = vsel %vm989_vm0, %v2401_v14, 0.0  ;;  %v1552_v31 = vmul.f32 %v4439_v12, %v3276_v15  ;;  %v1641_v59 = vadd.f32 %v1640_v55, %v1544_v42  ;;  %v1637_v11 = vadd.f32 %v1636_v45, %v4440_v60  ;;  %v4444_v61 = vld [vmem:[#allocation8_spill] sm:$0xff]  ;;  %v4446_v60 = vld [vmem:[#allocation6_spill] sm:$0xff] }
 0x1cc   : > { %4437 = vst [vmem:[#allocation52_spill] sm:$0xff] %v3739_v39  ;;  %v1649_v44 = vadd.f32 %v1648_v26, %v4441_v30  ;;  %v1656_v3 = vadd.f32 %v1555_v48, %v1554_v34  ;;  %1492 = vadd.xlane.f32.xlu0 %v1491_v22  ;;  %v1499_v46 = vadd.f32 %v1498_v29, %v3739_v39  ;;  %v4445_v42 = vld [vmem:[#allocation12_spill] sm:$0xff]  ;;  %v4447_v34 = vld [vmem:[#allocation7_spill] sm:$0xff] }
 0x1cd   : > { %v1652_v43 = vadd.f32 %v1552_v31, %v1551_v52  ;;  %v1560_v14 = vmul.f32 %v4442_v23, %v3246_v47  ;;  %v1561_v17 = vmul.f32 %v4443_v21, %v3276_v15  ;;  %v1557_v54 = vmul.f32 %v4444_v61, %v3246_v47  ;;  %v4448_v22 = vld [vmem:[#allocation27_spill] sm:$0xff]  ;;  %v4449_v29 = vld [vmem:[#allocation32_spill] sm:$0xff]  ;;  %v4450_v52 = vld [vmem:[#allocation9_spill] sm:$0xff] }
 0x1ce   : > { %v1558_v55 = vmul.f32 %v4445_v42, %v3276_v15  ;;  %v1566_v45 = vmul.f32 %v4446_v60, %v3246_v47  ;;  %v1567_v30 = vmul.f32 %v4447_v34, %v3276_v15  ;;  %1634 = vadd.xlane.f32.xlu1 %v1633_v37  ;;  %v1645_v26 = vadd.f32 %v1644_v40, %v4448_v22  ;;  %v4451_v31 = vld [vmem:[#allocation13_spill] sm:$0xff]  ;;  %v4452_v42 = vld [vmem:[#allocation10_spill] sm:$0xff]  ;;  %v4453_v39 = vld [vmem:[#allocation11_spill] sm:$0xff] }
 0x1cf   : > { %v1657_v48 = vadd.f32 %v1656_v3, %v4449_v29  ;;  %v1563_v12 = vmul.f32 %v4450_v52, %v3246_v47  ;;  %v1564_v23 = vmul.f32 %v4451_v31, %v3276_v15  ;;  %v1653_v21 = vadd.f32 %v1652_v43, %v3566_v4  ;;  %v4454_v3 = vld [vmem:[#allocation18_spill] sm:$0xff]  ;;  %v4455_v29 = vld [vmem:[#allocation19_spill] sm:$0xff] }
 0x1d0   : > { %v1672_v61 = vadd.f32 %v1567_v30, %v1566_v45  ;;  %v1572_v60 = vmul.f32 %v4452_v42, %v3246_v47  ;;  %v1573_v34 = vmul.f32 %v4453_v39, %v3276_v15  ;;  %1500 = vadd.xlane.f32.xlu0 %v1499_v46  ;;  %v1664_v37 = vadd.f32 %v1561_v17, %v1560_v14  ;;  %v4456_v43 = vld [vmem:[#allocation23_spill] sm:$0xff]  ;;  %v4457_v14 = vld [vmem:[#allocation14_spill] sm:$0xff]  ;;  %v4458_v30 = vld [vmem:[#allocation20_spill] sm:$0xff] }
 0x1d1   : > { %v1668_v40 = vadd.f32 %v1564_v23, %v1563_v12  ;;  %v1569_v22 = vmul.f32 %v4454_v3, %v3246_v47  ;;  %v1570_v52 = vmul.f32 %v4455_v29, %v3276_v15  ;;  %v1660_v58 = vadd.f32 %v1558_v55, %v1557_v54  ;;  %v4460_v23 = vld [vmem:[#allocation5_spill] sm:$0xff]  ;;  %v4464_v3 = vld [vmem:[#allocation22_spill] sm:$0xff] }
 0x1d2   : > { %v3776_v31 = vadd.f32 %v1672_v61, %v3610_v51  ;;  %v1680_v4 = vadd.f32 %v1573_v34, %v1572_v60  ;;  %v1578_v45 = vmul.f32 %v4456_v43, %v3246_v47  ;;  %1642 = vadd.xlane.f32.xlu1 %v1641_v59  ;;  %v1579_v17 = vmul.f32 %v4457_v14, %v3276_v15  ;;  %v4459_v51 = vld [vmem:[#allocation25_spill] sm:$0xff]  ;;  %v4462_v59 = vld [vmem:[#allocation15_spill] sm:$0xff] }
 0x1d3   : > { %v3781_v39 = vadd.f32 %v1668_v40, %v3622_v62  ;;  %v1676_v46 = vadd.f32 %v1570_v52, %v1569_v22  ;;  %v1575_v12 = vmul.f32 %v4458_v30, %v3246_v47  ;;  %v1576_v55 = vmul.f32 %v4459_v51, %v3276_v15  ;;  %v4461_v61 = vld [vmem:[#allocation17_spill] sm:$0xff]  ;;  %v4467_v14 = vld [vmem:[#allocation31_spill] sm:$0xff] }
 0x1d4   : > { %v3788_v54 = vadd.f32 %v1680_v4, %v3633_v50  ;;  %v3794_v42 = vrot.slane %v4461_v61, %v4460_v23  ;;  %v4463_v62 = vld [vmem:[#allocation29_spill] sm:$0xff]  ;;  %1638 = vadd.xlane.f32.xlu0 %v1637_v11  ;;  %v1688_v40 = vadd.f32 %v1579_v17, %v1578_v45  ;;  %v1581_v22 = vmul.f32 %v4464_v3, %v3246_v47  ;;  %v4465_v50 = vld [vmem:[#allocation30_spill] sm:$0xff]  ;;  %v4468_v51 = vld [vmem:[#allocation35_spill] sm:$0xff] }
 0x1d5   : > { %v1584_v60 = vmul.f32 %v4463_v62, %v4462_v59  ;;  %v3799_v34 = vadd.f32 %v1676_v46, %v3640_v63  ;;  %v1582_v29 = vmul.f32 %v4465_v50, %v3276_v15  ;;  %v1684_v52 = vadd.f32 %v1576_v55, %v1575_v12  ;;  %v4466_v4 = vld [vmem:[#allocation21_spill] sm:$0xff]  ;;  %v4469_v46 = vld [vmem:[#allocation26_spill] sm:$0xff] }
 0x1d6   : > { %v1585_v43 = vmul.f32 %v4466_v4, %v3794_v42  ;;  %v1590_v30 = vmul.f32 %v4467_v14, %v4462_v59  ;;  %v1591_v11 = vmul.f32 %v4468_v51, %v3794_v42  ;;  %1650 = vadd.xlane.f32.xlu1 %v1649_v44  ;;  %v1689_v63 = vadd.f32 %v1688_v40, %v3665_v35 }
 0x1d7   : > { %v1692_v45 = vadd.f32 %v1582_v29, %v1581_v22  ;;  %v1587_v47 = vmul.f32 %v3449_v19, %v4462_v59  ;;  %v1588_v15 = vmul.f32 %v4469_v46, %v3794_v42  ;;  %v1685_v17 = vadd.f32 %v1684_v52, %v3669_v57  ;;  %v4473_v52 = vld [vmem:[#allocation44_spill] sm:$0xff] }
 0x1d8   : > { %v1696_v12 = vadd.f32 %v1585_v43, %v1584_v60  ;;  %v1704_v55 = vadd.f32 %v1591_v11, %v1590_v30  ;;  %v1596_v23 = vmul.f32 %v3458_v53, %v4462_v59  ;;  %1646 = vadd.xlane.f32.xlu0 %v1645_v26  ;;  %v1597_v35 = vmul.f32 %v3461_v56, %v3794_v42  ;;  %v4475_v30 = vld [vmem:[#allocation47_spill] sm:$0xff]  ;;  %v4477_v46 = vld [vmem:[#allocation36_spill] sm:$0xff] }
 0x1d9   : > { %v1693_v61 = vadd.f32 %v1692_v45, %v3678_v36  ;;  %v1700_v44 = vadd.f32 %v1588_v15, %v1587_v47  ;;  %v1593_v19 = vmul.f32 %v3479_v38, %v4462_v59  ;;  %v1594_v57 = vmul.f32 %v3483_v33, %v3794_v42  ;;  %v4476_v45 = vld [vmem:[#allocation54_spill] sm:$0xff]  ;;  %v4478_v15 = vld [vmem:[#allocation16_spill] sm:$0xff] }
 0x1da   : > { %v1697_v62 = vadd.f32 %v1696_v12, %v3673_v5  ;;  %v1705_v40 = vadd.f32 %v1704_v55, %v3724_v49  ;;  %v1602_v53 = vmul.f32 %v3496_v9, %v4462_v59  ;;  %1658 = vadd.xlane.f32.xlu1 %v1657_v48  ;;  %v1712_v26 = vadd.f32 %v1597_v35, %v1596_v23  ;;  %v4479_v55 = vld [vmem:[#allocation37_spill] sm:$0xff] }
 0x1db   : > { %v1701_v36 = vadd.f32 %v1700_v44, %v3728_v24  ;;  %v1603_v56 = vmul.f32 %v3499_v18, %v3794_v42  ;;  %v1599_v38 = vmul.f32 %v3510_v6, %v4462_v59  ;;  %v1708_v60 = vadd.f32 %v1594_v57, %v1593_v19 }
 0x1dc   : > { %v1600_v5 = vmul.f32 %v3519_v16, %v3794_v42  ;;  %v1608_v33 = vmul.f32 %v3525_v8, %v4462_v59  ;;  %v1609_v9 = vmul.f32 %v3529_v1, %v3794_v42  ;;  %1654 = vadd.xlane.f32.xlu0 %v1653_v21  ;;  %v1665_v49 = vadd.f32 %v1664_v37, %v3570_v20 }
 0x1dd   : > { %v1720_v24 = vadd.f32 %v1603_v56, %v1602_v53  ;;  %v1605_v18 = vmul.f32 %v3539_v41, %v4462_v59  ;;  %v1606_v6 = vmul.f32 %v3545_v27, %v3794_v42  ;;  %v1614_v16 = vmul.f32 %v3553_v0, %v4462_v59 }
 0x1de   : > { %v1716_v48 = vadd.f32 %v1600_v5, %v1599_v38  ;;  %v1728_v3 = vadd.f32 %v1609_v9, %v1608_v33  ;;  %1666 = vadd.xlane.f32.xlu1 %v1665_v49  ;;  %v1661_v8 = vadd.f32 %v1660_v58, %v3597_v2  ;;  %v1615_v1 = vmul.f32 %v3562_v32, %v3794_v42  ;;  %v4470_v32 = vld [vmem:[#allocation38_spill] sm:$0xff]  ;;  %v4486_v38 = vld [vmem:[#allocation39_spill] sm:$0xff]  ;;  %v4487_v33 = vld [vmem:[#allocation49_spill] sm:$0xff] }
 0x1df   : > { %v1724_v22 = vadd.f32 %v1606_v6, %v1605_v18  ;;  %v1611_v20 = vmul.f32 %v3577_v13, %v4462_v59  ;;  %v1612_v41 = vmul.f32 %v3582_v7, %v3794_v42  ;;  %v1620_v27 = vmul.f32 %v3593_v10, %v4462_v59  ;;  %v4471_v13 = vld [vmem:[#allocation43_spill] sm:$0xff] }
 0x1e0   : > { %1662 = vadd.xlane.f32.xlu0 %v1661_v8  ;;  %v1736_v21 = vadd.f32 %v1615_v1, %v1614_v16  ;;  %v1621_v0 = vmul.f32 %v3599_v25, %v3794_v42  ;;  %v1617_v2 = vmul.f32 %v3618_v28, %v4462_v59  ;;  %v1618_v37 = vmul.f32 %v4470_v32, %v3794_v42  ;;  %v4472_v7 = vld [vmem:[#allocation51_spill] sm:$0xff]  ;;  %v4474_v25 = vld [vmem:[#allocation50_spill] sm:$0xff]  ;;  %v4490_v1 = vld [vmem:[#allocation52_spill] sm:$0xff] }
 0x1e1   : > { %v1732_v58 = vadd.f32 %v1612_v41, %v1611_v20  ;;  %v1626_v50 = vmul.f32 %v4471_v13, %v4462_v59  ;;  %v1627_v29 = vmul.f32 %v4472_v7, %v3794_v42  ;;  %v1623_v4 = vmul.f32 %v4473_v52, %v4462_v59 }
 0x1e2   : > { %1674 = vadd.xlane.f32.xlu1 %v3776_v31  ;;  %v1744_v10 = vadd.f32 %v1621_v0, %v1620_v27  ;;  %v1624_v43 = vmul.f32 %v4474_v25, %v3794_v42  ;;  %v1740_v28 = vadd.f32 %v1618_v37, %v1617_v2  ;;  %v1629_v51 = vmul.f32 %v4475_v30, %v4462_v59 }
 0x1e3   : > { %v1752_v14 = vadd.f32 %v1627_v29, %v1626_v50  ;;  %v1630_v47 = vmul.f32 %v4476_v45, %v3794_v42  ;;  %v1598_v12 = vmul.f32 %v4478_v15, %v4477_v46  ;;  %v1595_v59 = vmul.f32 %v4478_v15, %v4479_v55 }
 0x1e4   : > { %1670 = vadd.xlane.f32.xlu0 %v3781_v39  ;;  %v1748_v11 = vadd.f32 %v1624_v43, %v1623_v4  ;;  %v4480_v39 = vld [vmem:[#allocation41_spill] sm:$0xff]  ;;  %v1619_v9 = vmul.f32 %v4478_v15, %v4487_v33  ;;  %v1631_v20 = vmul.f32 %v4478_v15, %v4490_v1 }
 0x1e5   : > { %v1756_v31 = vadd.f32 %v1630_v47, %v1629_v51  ;;  %v1604_v23 = vmul.f32 %v4478_v15, %v4480_v39  ;;  %v1713_v42 = vadd.f32 %v1712_v26, %v1598_v12 }
 0x1e6   : > { %1682 = vadd.xlane.f32.xlu1 %v3788_v54  ;;  %v4481_v54 = vld [vmem:[#allocation33_spill] sm:$0xff]  ;;  %v1741_v16 = vadd.f32 %v1740_v28, %v1619_v9 }
 0x1e7   : > { %v1601_v44 = vmul.f32 %v4478_v15, %v4481_v54  ;;  %v1721_v35 = vadd.f32 %v1720_v24, %v1604_v23  ;;  %v4488_v24 = vld [vmem:[#allocation45_spill] sm:$0xff] }
 0x1e8   : > { %1678 = vadd.xlane.f32.xlu0 %v3799_v34  ;;  %v1709_v34 = vadd.f32 %v1708_v60, %v1595_v59  ;;  %v1622_v60 = vmul.f32 %v4478_v15, %v4486_v38  ;;  %v1628_v18 = vmul.f32 %v4478_v15, %v4488_v24  ;;  %v1824_v54 = vld [vmem:[%s3946_s30] sm:$0xff] }
 0x1e9   : > { %v1828_v38 = vld [vmem:[%s3946_s30 + $0x20] sm:$0xff] }
 0x1ea   : > { %1690 = vadd.xlane.f32.xlu1 %v1689_v63  ;;  %v4482_v63 = vld [vmem:[#allocation34_spill] sm:$0xff]  ;;  %v1745_v6 = vadd.f32 %v1744_v10, %v1622_v60 }
 0x1ec   : > { %1686 = vadd.xlane.f32.xlu0 %v1685_v17  ;;  %v1610_v17 = vmul.f32 %v4478_v15, %v4482_v63 }
 0x1ee   : > { %1698 = vadd.xlane.f32.xlu1 %v1697_v62  ;;  %v1717_v62 = vadd.f32 %v1716_v48, %v1601_v44  ;;  %v1729_v53 = vadd.f32 %v1728_v3, %v1610_v17  ;;  %v4489_v48 = vld [vmem:[#allocation48_spill] sm:$0xff] }
 0x1ef   : > { %v1625_v3 = vmul.f32 %v4478_v15, %v4489_v48 }
 0x1f0   : > { %1694 = vadd.xlane.f32.xlu0 %v1693_v61  ;;  %v4483_v61 = vld [vmem:[#allocation40_spill] sm:$0xff] }
 0x1f1   : > { %v1607_v19 = vmul.f32 %v4478_v15, %v4483_v61  ;;  %v1749_v41 = vadd.f32 %v1748_v11, %v1625_v3  ;;  %v1826_v61 = vld [vmem:[%s3946_s30 + $0x10] sm:$0xff] }
 0x1f2   : > { %1706 = vadd.xlane.f32.xlu1 %v1705_v40  ;;  %v4484_v40 = vld [vmem:[#allocation42_spill] sm:$0xff]  ;;  %v1830_v3 = vld [vmem:[%s3946_s30 + $0x30] sm:$0xff] }
 0x1f3   : > { %v1616_v57 = vmul.f32 %v4478_v15, %v4484_v40  ;;  %v1725_v56 = vadd.f32 %v1724_v22, %v1607_v19  ;;  %v1753_v22 = vadd.f32 %v1752_v14, %v1628_v18 }
 0x1f4   : > { %1702 = vadd.xlane.f32.xlu0 %v1701_v36  ;;  %v4485_v36 = vld [vmem:[#allocation46_spill] sm:$0xff] }
 0x1f5   : > { %v1613_v26 = vmul.f32 %v4478_v15, %v4485_v36  ;;  %v1737_v5 = vadd.f32 %v1736_v21, %v1616_v57  ;;  %v1757_v21 = vadd.f32 %v1756_v31, %v1631_v20  ;;  %v1825_v57 = vld [vmem:[%s3946_s30 + $0x8] sm:$0xff] }
 0x1f6   : > { %1714 = vadd.xlane.f32.xlu1 %v1713_v42  ;;  %v1829_v20 = vld [vmem:[%s3946_s30 + $0x28] sm:$0xff] }
 0x1f7   : > { %v1733_v49 = vadd.f32 %v1732_v58, %v1613_v26 }
 0x1f8   : > { %1710 = vadd.xlane.f32.xlu0 %v1709_v34 }
 0x1fa   : > { %1722 = vadd.xlane.f32.xlu1 %v1721_v35 }
 0x1fc   : > { %1718 = vadd.xlane.f32.xlu0 %v1717_v62 }
 0x1fe   : > { %1730 = vadd.xlane.f32.xlu1 %v1729_v53 }
 0x200   : > { %1726 = vadd.xlane.f32.xlu0 %v1725_v56  ;;  %v1377_v8 = vpop.xlane.xlu1 %1376 }
 0x201   : > { %2402 = vrcp.f32 %v1377_v8 }
 0x202   : > { %1738 = vadd.xlane.f32.xlu1 %v1737_v5 }
 0x203   : > { %v1381_v0 = vpop.xlane.xlu0 %1380 }
 0x204   : > { %1734 = vadd.xlane.f32.xlu0 %v1733_v49  ;;  %v1827_v49 = vld [vmem:[%s3946_s30 + $0x18] sm:$0xff] }
 0x206   : > { %1746 = vadd.xlane.f32.xlu1 %v1745_v6  ;;  %v1385_v27 = vpop.xlane.xlu1 %1384 }
 0x207   : > { %2404 = vrcp.f32 %v1385_v27 }
 0x208   : > { %1742 = vadd.xlane.f32.xlu0 %v1741_v16  ;;  %2406 = vrcp.f32 %v1381_v0 }
 0x20a   : > { %1754 = vadd.xlane.f32.xlu1 %v1753_v22 }
 0x20b   : > { %v2403_v42 = vpop.eup %2402 }
 0x20c   : > { %1750 = vadd.xlane.f32.xlu0 %v1749_v41  ;;  %v1393_v2 = vpop.xlane.xlu1 %1392 }
 0x20d   : > { %v1389_v58 = vpop.xlane.xlu0 %1388  ;;  %2408 = vrcp.f32 %v1393_v2  ;;  %v1832_v2 = vld [vmem:[%s3946_s30 + $0x40] sm:$0xff] }
 0x20e   : > { %2410 = vrcp.f32 %v1389_v58 }
 0x210   : > { %1758 = vadd.xlane.f32.xlu0 %v1757_v21 }
 0x211   : > { %v2405_v35 = vpop.eup %2404 }
 0x212   : > { %v1401_v32 = vpop.xlane.xlu1 %1400  ;;  %v2407_v40 = vpop.eup %2406 }
 0x213   : > { %2412 = vrcp.f32 %v1401_v32 }
 0x214   : > { %v1397_v37 = vpop.xlane.xlu0 %1396 }
 0x215   : > { %2414 = vrcp.f32 %v1397_v37 }
 0x217   : > { %v2409_v56 = vpop.eup %2408 }
 0x218   : > { %v2411_v9 = vpop.eup %2410 }
 0x219   : > { %v1409_v13 = vpop.xlane.xlu1 %1408 }
 0x21a   : > { %v1405_v50 = vpop.xlane.xlu0 %1404  ;;  %2416 = vrcp.f32 %v1409_v13 }
 0x21b   : > { %2418 = vrcp.f32 %v1405_v50  ;;  %v1831_v50 = vld [vmem:[%s3946_s30 + $0x38] sm:$0xff] }
 0x21d   : > { %v2413_v48 = vpop.eup %2412 }
 0x21f   : > { %v1417_v7 = vpop.xlane.xlu1 %1416  ;;  %v2415_v1 = vpop.eup %2414 }
 0x220   : > { %2420 = vrcp.f32 %v1417_v7 }
 0x222   : > { %v1413_v29 = vpop.xlane.xlu0 %1412 }
 0x223   : > { %2422 = vrcp.f32 %v1413_v29 }
 0x224   : > { %v2417_v0 = vpop.eup %2416 }
 0x225   : > { %v2419_v13 = vpop.eup %2418 }
 0x226   : > { %v3905_v10 = vpop.xlane.xlu1 %1424 }
 0x227   : > { %2424 = vrcp.f32 %v3905_v10 }
 0x228   : > { %v3907_v52 = vpop.xlane.xlu0 %1420 }
 0x229   : > { %2426 = vrcp.f32 %v3907_v52  ;;  %v1834_v52 = vld [vmem:[%s3946_s30 + $0x50] sm:$0xff] }
 0x22c   : > { %v3909_v4 = vpop.xlane.xlu1 %1432 }
 0x22d   : > { %v3911_v25 = vpop.xlane.xlu0 %1428  ;;  %2428 = vrcp.f32 %v3909_v4  ;;  %v1833_v4 = vld [vmem:[%s3946_s30 + $0x48] sm:$0xff] }
 0x22e   : > { %2430 = vrcp.f32 %v3911_v25  ;;  %v1836_v25 = vld [vmem:[%s3946_s30 + $0x60] sm:$0xff] }
 0x234   : > { %v3913_v43 = vpop.xlane.xlu1 %1440 }
 0x235   : > { %v3915_v28 = vpop.xlane.xlu0 %1436  ;;  %2432 = vrcp.f32 %v3913_v43  ;;  %v1835_v43 = vld [vmem:[%s3946_s30 + $0x58] sm:$0xff] }
 0x236   : > { %2434 = vrcp.f32 %v3915_v28  ;;  %v1838_v28 = vld [vmem:[%s3946_s30 + $0x70] sm:$0xff] }
 0x23b   : > { %v3917_v14 = vpop.xlane.xlu1 %1448 }
 0x23c   : > { %v3919_v30 = vpop.xlane.xlu0 %1444  ;;  %2436 = vrcp.f32 %v3917_v14  ;;  %v1837_v14 = vld [vmem:[%s3946_s30 + $0x68] sm:$0xff] }
 0x23d   : > { %2438 = vrcp.f32 %v3919_v30  ;;  %v1840_v30 = vld [vmem:[%s3946_s30 + $0x80] sm:$0xff] }
 0x241   : > { %v3921_v51 = vpop.xlane.xlu1 %1456 }
 0x242   : > { %2440 = vrcp.f32 %v3921_v51  ;;  %v1839_v51 = vld [vmem:[%s3946_s30 + $0x78] sm:$0xff] }
 0x243   : > { %v3923_v11 = vpop.xlane.xlu0 %1452 }
 0x244   : > { %2442 = vrcp.f32 %v3923_v11  ;;  %v1842_v11 = vld [vmem:[%s3946_s30 + $0x90] sm:$0xff] }
 0x245   : > { %v3925_v45 = vpop.xlane.xlu1 %1464 }
 0x246   : > { %2444 = vrcp.f32 %v3925_v45  ;;  %v1841_v45 = vld [vmem:[%s3946_s30 + $0x88] sm:$0xff] }
 0x248   : > { %v3927_v47 = vpop.xlane.xlu0 %1460 }
 0x249   : > { %v3929_v31 = vpop.xlane.xlu1 %1472  ;;  %2446 = vrcp.f32 %v3927_v47  ;;  %v1844_v47 = vld [vmem:[%s3946_s30 + $0xa0] sm:$0xff] }
 0x24a   : > { %2448 = vrcp.f32 %v3929_v31  ;;  %v1843_v31 = vld [vmem:[%s3946_s30 + $0x98] sm:$0xff] }
 0x24c   : > { %v3931_v46 = vpop.xlane.xlu0 %1468 }
 0x24d   : > { %2450 = vrcp.f32 %v3931_v46  ;;  %v1846_v46 = vld [vmem:[%s3946_s30 + $0xb0] sm:$0xff] }
 0x24f   : > { %v3933_v15 = vpop.xlane.xlu1 %1480 }
 0x250   : > { %v3935_v12 = vpop.xlane.xlu0 %1476 }
 0x253   : > { %v3937_v55 = vpop.xlane.xlu1 %1488 }
 0x255   : > { %v3939_v59 = vpop.xlane.xlu0 %1484 }
 0x257   : > { %v3941_v39 = vpop.xlane.xlu1 %1496 }
 0x259   : > { %v3943_v23 = vpop.xlane.xlu0 %1492 }
 0x25b   : > { %v1635_v44 = vpop.xlane.xlu1 %1634 }
 0x25c   : > { %v1792_v34 = vmul.f32 %v2403_v42, %v1635_v44  ;;  %v2421_v42 = vpop.eup %2420  ;;  %2452 = vrcp.f32 %v3933_v15  ;;  %v1845_v15 = vld [vmem:[%s3946_s30 + $0xa8] sm:$0xff] }
 0x25d   : > { %v3949_v63 = vpop.xlane.xlu0 %1500 }
 0x25e   : > { %v1856_v17 = vadd.f32 %v1824_v54, %v1792_v34 }
 0x25f   : > { %v1643_v19 = vpop.xlane.xlu1 %1642 }
 0x260   : > { %1889 = vst.msk [vmem:[%s3953_s5] sm:$0xff] %vm1888_vm1, %v1856_v17  ;;  %v1794_v62 = vmul.f32 %v2405_v35, %v1643_v19  ;;  %v2423_v17 = vpop.eup %2422  ;;  %2454 = vrcp.f32 %v3935_v12  ;;  %v1848_v12 = vld [vmem:[%s3946_s30 + $0xc0] sm:$0xff] }
 0x261   : > { %v1639_v53 = vpop.xlane.xlu0 %1638 }
 0x262   : > { %v1858_v36 = vadd.f32 %v1826_v61, %v1794_v62  ;;  %v1793_v26 = vmul.f32 %v2407_v40, %v1639_v53  ;;  %v2425_v62 = vpop.eup %2424  ;;  %2456 = vrcp.f32 %v3937_v55 }
 0x263   : > { %v1651_v60 = vpop.xlane.xlu1 %1650 }
 0x264   : > { %1891 = vst.msk [vmem:[%s3953_s5 + $0x10] sm:$0xff] %vm1888_vm1, %v1858_v36  ;;  %v1857_v5 = vadd.f32 %v1825_v57, %v1793_v26  ;;  %v1796_v33 = vmul.f32 %v2409_v56, %v1651_v60  ;;  %v2427_v36 = vpop.eup %2426  ;;  %2458 = vrcp.f32 %v3939_v59 }
 0x265   : > { %v1647_v24 = vpop.xlane.xlu0 %1646  ;;  %v2429_v60 = vpop.eup %2428  ;;  %2460 = vrcp.f32 %v3941_v39 }
 0x266   : > { %1890 = vst.msk [vmem:[%s3953_s5 + $0x8] sm:$0xff] %vm1888_vm1, %v1857_v5  ;;  %v1860_v18 = vadd.f32 %v1828_v38, %v1796_v33  ;;  %v1795_v6 = vmul.f32 %v2411_v9, %v1647_v24 }
 0x267   : > { %v1659_v16 = vpop.xlane.xlu1 %1658 }
 0x268   : > { %1893 = vst.msk [vmem:[%s3953_s5 + $0x20] sm:$0xff] %vm1888_vm1, %v1860_v18  ;;  %v1859_v8 = vadd.f32 %v1827_v49, %v1795_v6  ;;  %v1798_v22 = vmul.f32 %v2413_v48, %v1659_v16  ;;  %v2431_v49 = vpop.eup %2430  ;;  %2462 = vrcp.f32 %v3943_v23  ;;  %v1852_v23 = vld [vmem:[%s3946_s30 + $0xe0] sm:$0xff] }
 0x269   : > { %v1655_v41 = vpop.xlane.xlu0 %1654  ;;  %v2433_v48 = vpop.eup %2432  ;;  %2464 = vrcp.f32 %v3949_v63 }
 0x26a   : > { %1892 = vst.msk [vmem:[%s3953_s5 + $0x18] sm:$0xff] %vm1888_vm1, %v1859_v8  ;;  %v1862_v27 = vadd.f32 %v1830_v3, %v1798_v22  ;;  %v1797_v21 = vmul.f32 %v2415_v1, %v1655_v41  ;;  %v2435_v22 = vpop.eup %2434 }
 0x26b   : > { %v1667_v58 = vpop.xlane.xlu1 %1666 }
 0x26c   : > { %1895 = vst.msk [vmem:[%s3953_s5 + $0x30] sm:$0xff] %vm1888_vm1, %v1862_v27  ;;  %v1861_v32 = vadd.f32 %v1829_v20, %v1797_v21  ;;  %v1800_v37 = vmul.f32 %v2417_v0, %v1667_v58  ;;  %v2437_v27 = vpop.eup %2436 }
 0x26d   : > { %v1663_v7 = vpop.xlane.xlu0 %1662  ;;  %v2439_v58 = vpop.eup %2438 }
 0x26e   : > { %1894 = vst.msk [vmem:[%s3953_s5 + $0x28] sm:$0xff] %vm1888_vm1, %v1861_v32  ;;  %v1864_v29 = vadd.f32 %v1832_v2, %v1800_v37  ;;  %v1799_v10 = vmul.f32 %v2419_v13, %v1663_v7 }
 0x26f   : > { %v1675_v54 = vpop.xlane.xlu1 %1674 }
 0x270   : > { %1897 = vst.msk [vmem:[%s3953_s5 + $0x40] sm:$0xff] %vm1888_vm1, %v1864_v29  ;;  %v1863_v44 = vadd.f32 %v1831_v50, %v1799_v10  ;;  %v1802_v34 = vmul.f32 %v2421_v42, %v1675_v54  ;;  %v2441_v50 = vpop.eup %2440 }
 0x271   : > { %v1671_v35 = vpop.xlane.xlu0 %1670  ;;  %v2443_v42 = vpop.eup %2442 }
 0x272   : > { %1896 = vst.msk [vmem:[%s3953_s5 + $0x38] sm:$0xff] %vm1888_vm1, %v1863_v44  ;;  %v1866_v61 = vadd.f32 %v1834_v52, %v1802_v34  ;;  %v1801_v19 = vmul.f32 %v2423_v17, %v1671_v35  ;;  %v2445_v34 = vpop.eup %2444 }
 0x273   : > { %v1683_v40 = vpop.xlane.xlu1 %1682 }
 0x274   : > { %1899 = vst.msk [vmem:[%s3953_s5 + $0x50] sm:$0xff] %vm1888_vm1, %v1866_v61  ;;  %v1865_v57 = vadd.f32 %v1833_v4, %v1801_v19  ;;  %v1804_v53 = vmul.f32 %v2425_v62, %v1683_v40  ;;  %v2447_v61 = vpop.eup %2446 }
 0x275   : > { %v1679_v26 = vpop.xlane.xlu0 %1678  ;;  %v2449_v40 = vpop.eup %2448 }
 0x276   : > { %1898 = vst.msk [vmem:[%s3953_s5 + $0x48] sm:$0xff] %vm1888_vm1, %v1865_v57  ;;  %v1868_v56 = vadd.f32 %v1836_v25, %v1804_v53  ;;  %v1803_v38 = vmul.f32 %v2427_v36, %v1679_v26  ;;  %v2451_v55 = vpop.eup %2450 }
 0x277   : > { %v1691_v5 = vpop.xlane.xlu1 %1690  ;;  %v2453_v59 = vpop.eup %2452 }
 0x278   : > { %1901 = vst.msk [vmem:[%s3953_s5 + $0x60] sm:$0xff] %vm1888_vm1, %v1868_v56  ;;  %v1867_v33 = vadd.f32 %v1835_v43, %v1803_v38  ;;  %v1806_v9 = vmul.f32 %v2429_v60, %v1691_v5  ;;  %v1847_v43 = vld [vmem:[%s3946_s30 + $0xb8] sm:$0xff]  ;;  %v1850_v60 = vld [vmem:[%s3946_s30 + $0xd0] sm:$0xff]  ;;  %v2455_v39 = vpop.eup %2454 }
 0x279   : > { %v1687_v24 = vpop.xlane.xlu0 %1686 }
 0x27a   : > { %1900 = vst.msk [vmem:[%s3953_s5 + $0x58] sm:$0xff] %vm1888_vm1, %v1867_v33  ;;  %v1870_v18 = vadd.f32 %v1838_v28, %v1806_v9  ;;  %v1805_v6 = vmul.f32 %v2431_v49, %v1687_v24  ;;  %v1849_v9 = vld [vmem:[%s3946_s30 + $0xc8] sm:$0xff] }
 0x27b   : > { %v1699_v3 = vpop.xlane.xlu1 %1698 }
 0x27c   : > { %1903 = vst.msk [vmem:[%s3953_s5 + $0x70] sm:$0xff] %vm1888_vm1, %v1870_v18  ;;  %v1869_v16 = vadd.f32 %v1837_v14, %v1805_v6  ;;  %v1808_v8 = vmul.f32 %v2433_v48, %v1699_v3  ;;  %v2457_v18 = vpop.eup %2456 }
 0x27d   : > { %v1695_v1 = vpop.xlane.xlu0 %1694  ;;  %v2459_v3 = vpop.eup %2458 }
 0x27e   : > { %1902 = vst.msk [vmem:[%s3953_s5 + $0x68] sm:$0xff] %vm1888_vm1, %v1869_v16  ;;  %v1872_v20 = vadd.f32 %v1840_v30, %v1808_v8  ;;  %v1807_v41 = vmul.f32 %v2435_v22, %v1695_v1  ;;  %v1851_v16 = vld [vmem:[%s3946_s30 + $0xd8] sm:$0xff]  ;;  %v2461_v1 = vpop.eup %2460 }
 0x27f   : > { %v1707_v21 = vpop.xlane.xlu1 %1706 }
 0x280   : > { %1905 = vst.msk [vmem:[%s3953_s5 + $0x80] sm:$0xff] %vm1888_vm1, %v1872_v20  ;;  %v1871_v0 = vadd.f32 %v1839_v51, %v1807_v41  ;;  %v1810_v2 = vmul.f32 %v2437_v27, %v1707_v21  ;;  %v1854_v20 = vld [vmem:[%s3946_s30 + $0xf0] sm:$0xff]  ;;  %v1853_v21 = vld [vmem:[%s3946_s30 + $0xe8] sm:$0xff] }
 0x281   : > { %v1703_v32 = vpop.xlane.xlu0 %1702 }
 0x282   : > { %1904 = vst.msk [vmem:[%s3953_s5 + $0x78] sm:$0xff] %vm1888_vm1, %v1871_v0  ;;  %v1874_v37 = vadd.f32 %v1842_v11, %v1810_v2  ;;  %v1809_v13 = vmul.f32 %v2439_v58, %v1703_v32  ;;  %v2463_v11 = vpop.eup %2462 }
 0x283   : > { %v1715_v7 = vpop.xlane.xlu1 %1714  ;;  %v2465_v32 = vpop.eup %2464 }
 0x284   : > { %1907 = vst.msk [vmem:[%s3953_s5 + $0x90] sm:$0xff] %vm1888_vm1, %v1874_v37  ;;  %v1873_v29 = vadd.f32 %v1841_v45, %v1809_v13  ;;  %v1812_v10 = vmul.f32 %v2441_v50, %v1715_v7  ;;  %v1855_v37 = vld [vmem:[%s3946_s30 + $0xf8] sm:$0xff]  ;;  %v2020_v7 = vld [vmem:[%s3953_s5] sm:$0xff] (%p2550_p5) }
 0x285   : > { %v1711_v52 = vpop.xlane.xlu0 %1710  ;;  %2021 = vst [vmem:[%s4080_s24] sm:$0xff] (%p2550_p5), %v2020_v7 }
 0x286   : > { %1906 = vst.msk [vmem:[%s3953_s5 + $0x88] sm:$0xff] %vm1888_vm1, %v1873_v29  ;;  %v1876_v54 = vadd.f32 %v1844_v47, %v1812_v10  ;;  %v1811_v44 = vmul.f32 %v2443_v42, %v1711_v52  ;;  %v2022_v29 = vld [vmem:[%s3953_s5 + $0x8] sm:$0xff] (%p2550_p5)  ;;  %v2024_v10 = vld [vmem:[%s3953_s5 + $0x10] sm:$0xff] (%p2550_p5)  ;;  %v2026_v42 = vld [vmem:[%s3953_s5 + $0x18] sm:$0xff] (%p2550_p5) }
 0x287   : > { %v1723_v17 = vpop.xlane.xlu1 %1722  ;;  %v2030_v52 = vld [vmem:[%s3953_s5 + $0x28] sm:$0xff] (%p2550_p5)  ;;  %2023 = vst [vmem:[%s4080_s24 + $0x8] sm:$0xff] (%p2550_p5), %v2022_v29  ;;  %2025 = vst [vmem:[%s4080_s24 + $0x10] sm:$0xff] (%p2550_p5), %v2024_v10 }
 0x288   : > { %1909 = vst.msk [vmem:[%s3953_s5 + $0xa0] sm:$0xff] %vm1888_vm1, %v1876_v54  ;;  %v1875_v4 = vadd.f32 %v1843_v31, %v1811_v44  ;;  %v1814_v35 = vmul.f32 %v2445_v34, %v1723_v17  ;;  %v2028_v31 = vld [vmem:[%s3953_s5 + $0x20] sm:$0xff] (%p2550_p5)  ;;  %2027 = vst [vmem:[%s4080_s24 + $0x18] sm:$0xff] (%p2550_p5), %v2026_v42  ;;  %v2032_v54 = vld [vmem:[%s3953_s5 + $0x30] sm:$0xff] (%p2550_p5) }
 0x289   : > { %v1719_v19 = vpop.xlane.xlu0 %1718  ;;  %2029 = vst [vmem:[%s4080_s24 + $0x20] sm:$0xff] (%p2550_p5), %v2028_v31  ;;  %2031 = vst [vmem:[%s4080_s24 + $0x28] sm:$0xff] (%p2550_p5), %v2030_v52  ;;  %v2034_v44 = vld [vmem:[%s3953_s5 + $0x38] sm:$0xff] (%p2550_p5)  ;;  %v2036_v34 = vld [vmem:[%s3953_s5 + $0x40] sm:$0xff] (%p2550_p5) }
 0x28a   : > { %1908 = vst.msk [vmem:[%s3953_s5 + $0x98] sm:$0xff] %vm1888_vm1, %v1875_v4  ;;  %v1878_v62 = vadd.f32 %v1846_v46, %v1814_v35  ;;  %v1813_v25 = vmul.f32 %v2447_v61, %v1719_v19  ;;  %2033 = vst [vmem:[%s4080_s24 + $0x30] sm:$0xff] (%p2550_p5), %v2032_v54  ;;  %v2038_v46 = vld [vmem:[%s3953_s5 + $0x48] sm:$0xff] (%p2550_p5)  ;;  %v2040_v17 = vld [vmem:[%s3953_s5 + $0x50] sm:$0xff] (%p2550_p5) }
 0x28b   : > { %v1731_v57 = vpop.xlane.xlu1 %1730  ;;  %2035 = vst [vmem:[%s4080_s24 + $0x38] sm:$0xff] (%p2550_p5), %v2034_v44  ;;  %2037 = vst [vmem:[%s4080_s24 + $0x40] sm:$0xff] (%p2550_p5), %v2036_v34  ;;  %v2042_v4 = vld [vmem:[%s3953_s5 + $0x58] sm:$0xff] (%p2550_p5)  ;;  %v2044_v35 = vld [vmem:[%s3953_s5 + $0x60] sm:$0xff] (%p2550_p5) }
 0x28c   : > { %1911 = vst.msk [vmem:[%s3953_s5 + $0xb0] sm:$0xff] %vm1888_vm1, %v1878_v62  ;;  %v1877_v53 = vadd.f32 %v1845_v15, %v1813_v25  ;;  %v1816_v36 = vmul.f32 %v2449_v40, %v1731_v57  ;;  %2039 = vst [vmem:[%s4080_s24 + $0x48] sm:$0xff] (%p2550_p5), %v2038_v46  ;;  %v2046_v61 = vld [vmem:[%s3953_s5 + $0x68] sm:$0xff] (%p2550_p5)  ;;  %v2048_v15 = vld [vmem:[%s3953_s5 + $0x70] sm:$0xff] (%p2550_p5) }
 0x28d   : > { %v1727_v26 = vpop.xlane.xlu0 %1726  ;;  %2041 = vst [vmem:[%s4080_s24 + $0x50] sm:$0xff] (%p2550_p5), %v2040_v17  ;;  %2043 = vst [vmem:[%s4080_s24 + $0x58] sm:$0xff] (%p2550_p5), %v2042_v4  ;;  %v2050_v19 = vld [vmem:[%s3953_s5 + $0x78] sm:$0xff] (%p2550_p5)  ;;  %v2052_v62 = vld [vmem:[%s3953_s5 + $0x80] sm:$0xff] (%p2550_p5) }
 0x28e   : > { %1910 = vst.msk [vmem:[%s3953_s5 + $0xa8] sm:$0xff] %vm1888_vm1, %v1877_v53  ;;  %v1880_v56 = vadd.f32 %v1848_v12, %v1816_v36  ;;  %v1815_v38 = vmul.f32 %v2451_v55, %v1727_v26  ;;  %2045 = vst [vmem:[%s4080_s24 + $0x60] sm:$0xff] (%p2550_p5), %v2044_v35  ;;  %v2054_v25 = vld [vmem:[%s3953_s5 + $0x88] sm:$0xff] (%p2550_p5)  ;;  %v2056_v40 = vld [vmem:[%s3953_s5 + $0x90] sm:$0xff] (%p2550_p5) }
 0x28f   : > { %v1739_v28 = vpop.xlane.xlu1 %1738  ;;  %2047 = vst [vmem:[%s4080_s24 + $0x68] sm:$0xff] (%p2550_p5), %v2046_v61  ;;  %2049 = vst [vmem:[%s4080_s24 + $0x70] sm:$0xff] (%p2550_p5), %v2048_v15  ;;  %v2060_v57 = vld [vmem:[%s3953_s5 + $0xa0] sm:$0xff] (%p2550_p5) }
 0x290   : > { %1913 = vst.msk [vmem:[%s3953_s5 + $0xc0] sm:$0xff] %vm1888_vm1, %v1880_v56  ;;  %v1879_v5 = vadd.f32 %v1847_v43, %v1815_v38  ;;  %v1818_v33 = vmul.f32 %v2453_v59, %v1739_v28  ;;  %2051 = vst [vmem:[%s4080_s24 + $0x78] sm:$0xff] (%p2550_p5), %v2050_v19 }
 0x291   : > { %v1735_v49 = vpop.xlane.xlu0 %1734  ;;  %2053 = vst [vmem:[%s4080_s24 + $0x100] sm:$0xff] (%p2550_p5), %v2052_v62  ;;  %2055 = vst [vmem:[%s4080_s24 + $0x108] sm:$0xff] (%p2550_p5), %v2054_v25  ;;  %v2058_v12 = vld [vmem:[%s3953_s5 + $0x98] sm:$0xff] (%p2550_p5) }
 0x292   : > { %1912 = vst.msk [vmem:[%s3953_s5 + $0xb8] sm:$0xff] %vm1888_vm1, %v1879_v5  ;;  %v1882_v14 = vadd.f32 %v1850_v60, %v1818_v33  ;;  %v1817_v24 = vmul.f32 %v2455_v39, %v1735_v49  ;;  %2057 = vst [vmem:[%s4080_s24 + $0x110] sm:$0xff] (%p2550_p5), %v2056_v40 }
 0x293   : > { %v1747_v6 = vpop.xlane.xlu1 %1746  ;;  %2059 = vst [vmem:[%s4080_s24 + $0x118] sm:$0xff] (%p2550_p5), %v2058_v12  ;;  %2061 = vst [vmem:[%s4080_s24 + $0x120] sm:$0xff] (%p2550_p5), %v2060_v57  ;;  %v2064_v36 = vld [vmem:[%s3953_s5 + $0xb0] sm:$0xff] (%p2550_p5) }
 0x294   : > { %1915 = vst.msk [vmem:[%s3953_s5 + $0xd0] sm:$0xff] %vm1888_vm1, %v1882_v14  ;;  %v1881_v48 = vadd.f32 %v1849_v9, %v1817_v24  ;;  %v1820_v30 = vmul.f32 %v2457_v18, %v1747_v6  ;;  %2065 = vst [vmem:[%s4080_s24 + $0x130] sm:$0xff] (%p2550_p5), %v2064_v36 }
 0x295   : > { %v1743_v8 = vpop.xlane.xlu0 %1742  ;;  %v2062_v53 = vld [vmem:[%s3953_s5 + $0xa8] sm:$0xff] (%p2550_p5) }
 0x296   : > { %1914 = vst.msk [vmem:[%s3953_s5 + $0xc8] sm:$0xff] %vm1888_vm1, %v1881_v48  ;;  %v1884_v22 = vadd.f32 %v1852_v23, %v1820_v30  ;;  %v1819_v51 = vmul.f32 %v2459_v3, %v1743_v8  ;;  %2063 = vst [vmem:[%s4080_s24 + $0x128] sm:$0xff] (%p2550_p5), %v2062_v53 }
 0x297   : > { %v1755_v63 = vpop.xlane.xlu1 %1754  ;;  %v2068_v43 = vld [vmem:[%s3953_s5 + $0xc0] sm:$0xff] (%p2550_p5) }
 0x298   : > { %1917 = vst.msk [vmem:[%s3953_s5 + $0xe0] sm:$0xff] %vm1888_vm1, %v1884_v22  ;;  %v1883_v41 = vadd.f32 %v1851_v16, %v1819_v51  ;;  %v1822_v27 = vmul.f32 %v2461_v1, %v1755_v63  ;;  %2069 = vst [vmem:[%s4080_s24 + $0x140] sm:$0xff] (%p2550_p5), %v2068_v43 }
 0x299   : > { %v1751_v0 = vpop.xlane.xlu0 %1750  ;;  %v2066_v55 = vld [vmem:[%s3953_s5 + $0xb8] sm:$0xff] (%p2550_p5) }
 0x29a   : > { %1916 = vst.msk [vmem:[%s3953_s5 + $0xd8] sm:$0xff] %vm1888_vm1, %v1883_v41  ;;  %v1886_v2 = vadd.f32 %v1854_v20, %v1822_v27  ;;  %v1821_v58 = vmul.f32 %v2463_v11, %v1751_v0  ;;  %2067 = vst [vmem:[%s4080_s24 + $0x138] sm:$0xff] (%p2550_p5), %v2066_v55 }
 0x29b   : > { %v2072_v56 = vld [vmem:[%s3953_s5 + $0xd0] sm:$0xff] (%p2550_p5) }
 0x29c   : > { %1919 = vst.msk [vmem:[%s3953_s5 + $0xf0] sm:$0xff] %vm1888_vm1, %v1886_v2  ;;  %v1885_v45 = vadd.f32 %v1853_v21, %v1821_v58  ;;  %1927 = sbr.rel (!%p2550_p5) target bundleno = 683 (0x2ab), region = 116  ;;  %2073 = vst [vmem:[%s4080_s24 + $0x150] sm:$0xff] (%p2550_p5), %v2072_v56 }
 0x29d   : > { %v1759_v13 = vpop.xlane.xlu0 %1758  ;;  %v2070_v26 = vld [vmem:[%s3953_s5 + $0xc8] sm:$0xff] (%p2550_p5) }
 0x29e   : > { %1918 = vst.msk [vmem:[%s3953_s5 + $0xe8] sm:$0xff] %vm1888_vm1, %v1885_v45  ;;  %v1823_v50 = vmul.f32 %v2465_v32, %v1759_v13  ;;  %2071 = vst [vmem:[%s4080_s24 + $0x148] sm:$0xff] (%p2550_p5), %v2070_v26 }
 0x29f   : > { %v2076_v59 = vld [vmem:[%s3953_s5 + $0xe0] sm:$0xff] (%p2550_p5) }
 0x2a0   : > { %v1887_v47 = vadd.f32 %v1855_v37, %v1823_v50  ;;  %2077 = vst [vmem:[%s4080_s24 + $0x160] sm:$0xff] (%p2550_p5), %v2076_v59 }
 0x2a1   : > { %v2074_v38 = vld [vmem:[%s3953_s5 + $0xd8] sm:$0xff] (%p2550_p5) }
 0x2a2   : > { %1920 = vst.msk [vmem:[%s3953_s5 + $0xf8] sm:$0xff] %vm1888_vm1, %v1887_v47  ;;  %2075 = vst [vmem:[%s4080_s24 + $0x158] sm:$0xff] (%p2550_p5), %v2074_v38 }
 0x2a3   : > { %v2080_v28 = vld [vmem:[%s3953_s5 + $0xf0] sm:$0xff] }
 0x2a4   : > { %2081 = vst [vmem:[%s4080_s24 + $0x170] sm:$0xff] %v2080_v28 }
 0x2a5   : > { %v2078_v60 = vld [vmem:[%s3953_s5 + $0xe8] sm:$0xff] }
 0x2a6   : > { %2079 = vst [vmem:[%s4080_s24 + $0x168] sm:$0xff] %v2078_v60 }
 0x2a9   : > { %v2082_v5 = vld [vmem:[%s3953_s5 + $0xf8] sm:$0xff] }
 0x2aa   : > { %2083 = vst [vmem:[%s4080_s24 + $0x178] sm:$0xff] %v2082_v5 }
 0x2ab PF: > { %p11_p10 = scmp.ge.s32.totalorder %s2533_s19, 4   ;;  %s4491_s15 = smov %s2484_s16 }
 0x2ac   : > { %s4492_s16 = smov %s2544_s22  ;;  %s4493_s17 = smov %s2533_s19 }
 0x2ad   :  { %13 = sbr.rel (!%p11_p10) target bundleno = 2 (0x2), region = 193 }

</bundles_post_ra>
